<compile_context>
chip_gen: v6e
topology: v6e:2x2x1
jax: 0.10.0
libtpu: 0.0.40
codegen_flags: <defaults>
</compile_context>

<pallas_src>
import jax
import jax.numpy as jnp
from jax import lax
from jax.experimental import pallas as pl
from jax.experimental.pallas import tpu as pltpu  # noqa: F401  (TPU backend import)


def _make_generalist_kernel(seq_len, s_pad, out_pad, hidden_size, apply_sigmoid):
    H = hidden_size

    def kernel(x_ref, enc_w_ref, enc_b_ref,
               w_ih0_ref, w_hh0_ref, b_gi0_ref, b_hn0_ref,
               w_ih1_ref, w_hh1_ref, b_gi1_ref, b_hn1_ref,
               dec_w_ref, dec_b_ref, h0_ref,
               out_ref, hid_ref):
        # --- notes_encoder: Linear(input_size -> hidden_size); dropout = identity ---
        layer_in = (jnp.dot(x_ref[...], enc_w_ref[...],
                            preferred_element_type=jnp.float32) + enc_b_ref[...])

        layers = ((w_ih0_ref, w_hh0_ref, b_gi0_ref, b_hn0_ref),
                  (w_ih1_ref, w_hh1_ref, b_gi1_ref, b_hn1_ref))

        # --- 2-layer GRU recurrence (fully unrolled) ---
        for l, (w_ih, w_hh, b_gi, b_hn) in enumerate(layers):
            # Input projections for every timestep at once (one big MXU matmul).
            # b_gi already contains b_ih + (b_hh for the r/z gates).
            gi_all = (jnp.dot(layer_in, w_ih[...],
                              preferred_element_type=jnp.float32) + b_gi[...])

            # Hoist loop invariants out of the recurrence.
            w_hh_v = w_hh[...]          # (H, 3H)
            b_hn_v = b_hn[...]          # (1, H)  -- n-gate hidden bias only

            h = h0_ref[l:l + 1, :]      # (1, H)
            h_final = h
            rows = []
            for t in range(s_pad):      # static unroll; all slices are static
                gi = gi_all[t:t + 1, :]                                  # (1, 3H)
                gh = jnp.dot(h, w_hh_v, preferred_element_type=jnp.float32)
                r = jax.nn.sigmoid(gi[:, 0:H] + gh[:, 0:H])
                z = jax.nn.sigmoid(gi[:, H:2 * H] + gh[:, H:2 * H])
                n = jnp.tanh(gi[:, 2 * H:] + r * (gh[:, 2 * H:] + b_hn_v))
                h = (1.0 - z) * n + z * h
                rows.append(h)
                if t == seq_len - 1:    # trace-time check; padding steps are discarded
                    h_final = h
            hid_ref[l:l + 1, :] = h_final
            layer_in = jnp.concatenate(rows, axis=0)   # (s_pad, H) -> next layer input

        # --- ReLU + notes_decoder: Linear(hidden_size -> input_size), lane-padded ---
        act = jnp.maximum(layer_in, 0.0)
        dec = (jnp.dot(act, dec_w_ref[...],
                       preferred_element_type=jnp.float32) + dec_b_ref[...])
        if apply_sigmoid:
            dec = jax.nn.sigmoid(dec)
        out_ref[...] = dec

    return kernel


def generalist_forward(x, params, hidden=None, sigmoid=False):
    """x: (seq_len, 1, input_size) float32. Returns (lstm_out, hidden) like the
    PyTorch module: (seq_len, 1, input_size) and (n_layers, 1, hidden_size)."""
    seq_len, batch, input_size = x.shape
    assert batch == 1, "PyTorch module uses batch=1 (hidden init is (n_layers, 1, H))"
    hidden_size = params["enc_w"].shape[1]
    H = hidden_size
    n_layers = 2
    if hidden is None:
        hidden = jnp.zeros((n_layers, 1, hidden_size), jnp.float32)

    GROUP = 8
    s_pad = ((seq_len + GROUP - 1) // GROUP) * GROUP          # sublane-aligned seq
    out_pad = ((input_size + 127) // 128) * 128               # lane-dense output width

    x2d = x.reshape(seq_len, input_size)
    if s_pad != seq_len:
        x2d = jnp.pad(x2d, ((0, s_pad - seq_len), (0, 0)))
    h0 = hidden.reshape(n_layers, hidden_size)

    # Fold the r/z components of b_hh into the batched input-projection bias.
    # Only the n-gate hidden bias must stay inside the recurrence (multiplied by r).
    def fold_bias(l):
        b_ih, b_hh = params[f"b_ih{l}"], params[f"b_hh{l}"]
        b_gi = b_ih + jnp.concatenate(
            [b_hh[:, :2 * H], jnp.zeros((1, H), jnp.float32)], axis=1)
        b_hn = b_hh[:, 2 * H:]
        return b_gi, b_hn

    b_gi0, b_hn0 = fold_bias(0)
    b_gi1, b_hn1 = fold_bias(1)

    # Pad decoder weight/bias so the output block is lane-dense (unmasked stores).
    dec_w, dec_b = params["dec_w"], params["dec_b"]
    if out_pad != input_size:
        dec_w = jnp.pad(dec_w, ((0, 0), (0, out_pad - input_size)))
        dec_b = jnp.pad(dec_b, ((0, 0), (0, out_pad - input_size)))

    kernel = _make_generalist_kernel(seq_len, s_pad, out_pad, H, sigmoid)
    out2d, hid2d = pl.pallas_call(
        kernel,
        out_shape=(jax.ShapeDtypeStruct((s_pad, out_pad), jnp.float32),
                   jax.ShapeDtypeStruct((n_layers, H), jnp.float32)),
    )(x2d, params["enc_w"], params["enc_b"],
      params["w_ih0"], params["w_hh0"], b_gi0, b_hn0,
      params["w_ih1"], params["w_hh1"], b_gi1, b_hn1,
      dec_w, dec_b, h0)

    out2d = out2d[:seq_len, :input_size]
    return (out2d.reshape(seq_len, 1, input_size),
            hid2d.reshape(n_layers, 1, hidden_size))


def init_params(key, input_size, hidden_size):
    """Deterministic synthetic parameters (PyTorch-style uniform(-1/sqrt(fan), ...))."""
    H = hidden_size
    ks = jax.random.split(key, 12)

    def u(k, shape, fan_in):
        s = 1.0 / float(fan_in) ** 0.5
        return jax.random.uniform(k, shape, jnp.float32, -s, s)

    p = {
        "enc_w": u(ks[0], (input_size, H), input_size),   # Linear weight, pre-transposed
        "enc_b": u(ks[1], (1, H), input_size),
        "dec_w": u(ks[2], (H, input_size), H),
        "dec_b": u(ks[3], (1, input_size), H),
    }
    for l in range(2):
        base = 4 + 4 * l
        p[f"w_ih{l}"] = u(ks[base + 0], (H, 3 * H), H)    # weight_ih_l{l}.T (gates r,z,n)
        p[f"w_hh{l}"] = u(ks[base + 1], (H, 3 * H), H)    # weight_hh_l{l}.T
        p[f"b_ih{l}"] = u(ks[base + 2], (1, 3 * H), H)
        p[f"b_hh{l}"] = u(ks[base + 3], (1, 3 * H), H)
    return p


def reference_forward(x, params, hidden, sigmoid=False):
    """Pure-JAX reference replicating torch semantics (eval mode)."""
    seq_len, _, input_size = x.shape
    H = params["enc_w"].shape[1]
    inp = x.reshape(seq_len, input_size) @ params["enc_w"] + params["enc_b"]
    finals = []
    for l in range(2):
        h = hidden[l]  # (1, H)
        gi_all = inp @ params[f"w_ih{l}"] + params[f"b_ih{l}"]
        outs = []
        for t in range(seq_len):
            gi = gi_all[t:t + 1]
            gh = h @ params[f"w_hh{l}"] + params[f"b_hh{l}"]
            r = jax.nn.sigmoid(gi[:, :H] + gh[:, :H])
            z = jax.nn.sigmoid(gi[:, H:2 * H] + gh[:, H:2 * H])
            n = jnp.tanh(gi[:, 2 * H:] + r * gh[:, 2 * H:])
            h = (1.0 - z) * n + z * h
            outs.append(h)
        inp = jnp.concatenate(outs, axis=0)
        finals.append(h)
    out = jnp.maximum(inp, 0.0) @ params["dec_w"] + params["dec_b"]
    if sigmoid:
        out = jax.nn.sigmoid(out)
    return out.reshape(seq_len, 1, input_size), jnp.stack(finals, 0)


if __name__ == "__main__":
    SEQ, D_IN, HIDDEN, NUM_TAGS, N_LAYERS = 8, 32, 128, 4, 2  # num_tags unused in forward

    key = jax.random.PRNGKey(0)
    pkey, xkey = jax.random.split(key)
    params = init_params(pkey, D_IN, HIDDEN)
    x = jax.random.normal(xkey, (SEQ, 1, D_IN), jnp.float32)
    h_zero = jnp.zeros((N_LAYERS, 1, HIDDEN), jnp.float32)

    # sigmoid=False path
    out, hid = generalist_forward(x, params, hidden=None, sigmoid=False)
    out = jax.block_until_ready(out)
    hid = jax.block_until_ready(hid)
    ref_out, ref_hid = reference_forward(x, params, h_zero, sigmoid=False)
    assert out.shape == (SEQ, 1, D_IN) and hid.shape == (N_LAYERS, 1, HIDDEN)
    assert jnp.allclose(out, ref_out, atol=1e-4, rtol=1e-4)
    assert jnp.allclose(hid, ref_hid, atol=1e-4, rtol=1e-4)

    # sigmoid=True path
    out_s, hid_s = generalist_forward(x, params, hidden=None, sigmoid=True)
    out_s = jax.block_until_ready(out_s)
    hid_s = jax.block_until_ready(hid_s)
    ref_out_s, ref_hid_s = reference_forward(x, params, h_zero, sigmoid=True)
    assert jnp.allclose(out_s, ref_out_s, atol=1e-4, rtol=1e-4)
    assert jnp.allclose(hid_s, ref_hid_s, atol=1e-4, rtol=1e-4)

    print("KERNEL_OK")
</pallas_src>

<mosaic_0001>
module attributes {stable_mosaic.version = 11 : i64} {
  func.func @kernel(%arg0: memref<8x32xf32, #tpu.memory_space<vmem>>, %arg1: memref<32x128xf32, #tpu.memory_space<vmem>>, %arg2: memref<1x128xf32, #tpu.memory_space<vmem>>, %arg3: memref<128x384xf32, #tpu.memory_space<vmem>>, %arg4: memref<128x384xf32, #tpu.memory_space<vmem>>, %arg5: memref<1x384xf32, #tpu.memory_space<vmem>>, %arg6: memref<1x128xf32, #tpu.memory_space<vmem>>, %arg7: memref<128x384xf32, #tpu.memory_space<vmem>>, %arg8: memref<128x384xf32, #tpu.memory_space<vmem>>, %arg9: memref<1x384xf32, #tpu.memory_space<vmem>>, %arg10: memref<1x128xf32, #tpu.memory_space<vmem>>, %arg11: memref<128x128xf32, #tpu.memory_space<vmem>>, %arg12: memref<1x128xf32, #tpu.memory_space<vmem>>, %arg13: memref<2x128xf32, #tpu.memory_space<vmem>>, %arg14: memref<8x128xf32, #tpu.memory_space<vmem>>, %arg15: memref<2x128xf32, #tpu.memory_space<vmem>>) attributes {dimension_semantics = [], scalar_prefetch = 0 : i64, scratch_operands = 0 : i64, tpu.core_type = #tpu.core_type<tc>} {
    %c0 = arith.constant 0 : index
    %c0_0 = arith.constant 0 : index
    %0 = vector.load %arg0[%c0, %c0_0] : memref<8x32xf32, #tpu.memory_space<vmem>>, vector<8x32xf32>
    %c0_1 = arith.constant 0 : index
    %c0_2 = arith.constant 0 : index
    %1 = vector.load %arg1[%c0_1, %c0_2] : memref<32x128xf32, #tpu.memory_space<vmem>>, vector<32x128xf32>
    %cst = arith.constant dense<0.000000e+00> : vector<8x128xf32>
    %2 = tpu.matmul %0, %1, %cst {dimension_numbers = #tpu.dot_dimension_numbers<[1], [0], [0], [1], [0, 0, 1, 1], [], []>} : vector<8x32xf32>, vector<32x128xf32>, vector<8x128xf32> -> vector<8x128xf32>
    %c0_3 = arith.constant 0 : index
    %c0_4 = arith.constant 0 : index
    %3 = vector.load %arg2[%c0_3, %c0_4] : memref<1x128xf32, #tpu.memory_space<vmem>>, vector<1x128xf32>
    %4 = vector.broadcast %3 : vector<1x128xf32> to vector<8x128xf32>
    %5 = arith.addf %2, %4 : vector<8x128xf32>
    %c0_5 = arith.constant 0 : index
    %c0_6 = arith.constant 0 : index
    %6 = vector.load %arg3[%c0_5, %c0_6] : memref<128x384xf32, #tpu.memory_space<vmem>>, vector<128x384xf32>
    %cst_7 = arith.constant dense<0.000000e+00> : vector<8x384xf32>
    %7 = tpu.matmul %5, %6, %cst_7 {dimension_numbers = #tpu.dot_dimension_numbers<[1], [0], [0], [1], [0, 0, 1, 1], [], []>} : vector<8x128xf32>, vector<128x384xf32>, vector<8x384xf32> -> vector<8x384xf32>
    %c0_8 = arith.constant 0 : index
    %c0_9 = arith.constant 0 : index
    %8 = vector.load %arg5[%c0_8, %c0_9] : memref<1x384xf32, #tpu.memory_space<vmem>>, vector<1x384xf32>
    %9 = vector.broadcast %8 : vector<1x384xf32> to vector<8x384xf32>
    %10 = arith.addf %7, %9 : vector<8x384xf32>
    %c0_10 = arith.constant 0 : index
    %c0_11 = arith.constant 0 : index
    %11 = vector.load %arg4[%c0_10, %c0_11] : memref<128x384xf32, #tpu.memory_space<vmem>>, vector<128x384xf32>
    %c0_12 = arith.constant 0 : index
    %c0_13 = arith.constant 0 : index
    %12 = vector.load %arg6[%c0_12, %c0_13] : memref<1x128xf32, #tpu.memory_space<vmem>>, vector<1x128xf32>
    %c0_14 = arith.constant 0 : index
    %c0_15 = arith.constant 0 : index
    %13 = vector.load %arg13[%c0_14, %c0_15] : memref<2x128xf32, #tpu.memory_space<vmem>>, vector<1x128xf32>
    %14 = vector.extract_strided_slice %10 {offsets = [0, 0], sizes = [1, 384], strides = [1, 1]} : vector<8x384xf32> to vector<1x384xf32>
    %cst_16 = arith.constant dense<0.000000e+00> : vector<1x384xf32>
    %15 = tpu.matmul %13, %11, %cst_16 {dimension_numbers = #tpu.dot_dimension_numbers<[1], [0], [0], [1], [0, 0, 1, 1], [], []>} : vector<1x128xf32>, vector<128x384xf32>, vector<1x384xf32> -> vector<1x384xf32>
    %16 = vector.extract_strided_slice %14 {offsets = [0, 0], sizes = [1, 128], strides = [1, 1]} : vector<1x384xf32> to vector<1x128xf32>
    %17 = vector.extract_strided_slice %15 {offsets = [0, 0], sizes = [1, 128], strides = [1, 1]} : vector<1x384xf32> to vector<1x128xf32>
    %18 = arith.addf %16, %17 : vector<1x128xf32>
    %19 = arith.negf %18 : vector<1x128xf32>
    %20 = math.exp %19 : vector<1x128xf32>
    %cst_17 = arith.constant 1.000000e+00 : f32
    %21 = vector.broadcast %cst_17 : f32 to vector<1x128xf32>
    %22 = arith.addf %21, %20 : vector<1x128xf32>
    %23 = arith.divf %21, %22 : vector<1x128xf32>
    %24 = vector.extract_strided_slice %14 {offsets = [0, 128], sizes = [1, 128], strides = [1, 1]} : vector<1x384xf32> to vector<1x128xf32>
    %25 = vector.extract_strided_slice %15 {offsets = [0, 128], sizes = [1, 128], strides = [1, 1]} : vector<1x384xf32> to vector<1x128xf32>
    %26 = arith.addf %24, %25 : vector<1x128xf32>
    %27 = arith.negf %26 : vector<1x128xf32>
    %28 = math.exp %27 : vector<1x128xf32>
    %cst_18 = arith.constant 1.000000e+00 : f32
    %29 = vector.broadcast %cst_18 : f32 to vector<1x128xf32>
    %30 = arith.addf %29, %28 : vector<1x128xf32>
    %31 = arith.divf %29, %30 : vector<1x128xf32>
    %32 = vector.extract_strided_slice %14 {offsets = [0, 256], sizes = [1, 128], strides = [1, 1]} : vector<1x384xf32> to vector<1x128xf32>
    %33 = vector.extract_strided_slice %15 {offsets = [0, 256], sizes = [1, 128], strides = [1, 1]} : vector<1x384xf32> to vector<1x128xf32>
    %34 = arith.addf %33, %12 : vector<1x128xf32>
    %35 = arith.mulf %23, %34 : vector<1x128xf32>
    %36 = arith.addf %32, %35 : vector<1x128xf32>
    %37 = math.tanh %36 : vector<1x128xf32>
    %cst_19 = arith.constant 1.000000e+00 : f32
    %38 = vector.broadcast %cst_19 : f32 to vector<1x128xf32>
    %39 = arith.subf %38, %31 : vector<1x128xf32>
    %40 = arith.mulf %39, %37 : vector<1x128xf32>
    %41 = arith.mulf %31, %13 : vector<1x128xf32>
    %42 = arith.addf %40, %41 : vector<1x128xf32>
    %43 = vector.extract_strided_slice %10 {offsets = [1, 0], sizes = [1, 384], strides = [1, 1]} : vector<8x384xf32> to vector<1x384xf32>
    %cst_20 = arith.constant dense<0.000000e+00> : vector<1x384xf32>
    %44 = tpu.matmul %42, %11, %cst_20 {dimension_numbers = #tpu.dot_dimension_numbers<[1], [0], [0], [1], [0, 0, 1, 1], [], []>} : vector<1x128xf32>, vector<128x384xf32>, vector<1x384xf32> -> vector<1x384xf32>
    %45 = vector.extract_strided_slice %43 {offsets = [0, 0], sizes = [1, 128], strides = [1, 1]} : vector<1x384xf32> to vector<1x128xf32>
    %46 = vector.extract_strided_slice %44 {offsets = [0, 0], sizes = [1, 128], strides = [1, 1]} : vector<1x384xf32> to vector<1x128xf32>
    %47 = arith.addf %45, %46 : vector<1x128xf32>
    %48 = arith.negf %47 : vector<1x128xf32>
    %49 = math.exp %48 : vector<1x128xf32>
    %cst_21 = arith.constant 1.000000e+00 : f32
    %50 = vector.broadcast %cst_21 : f32 to vector<1x128xf32>
    %51 = arith.addf %50, %49 : vector<1x128xf32>
    %52 = arith.divf %50, %51 : vector<1x128xf32>
    %53 = vector.extract_strided_slice %43 {offsets = [0, 128], sizes = [1, 128], strides = [1, 1]} : vector<1x384xf32> to vector<1x128xf32>
    %54 = vector.extract_strided_slice %44 {offsets = [0, 128], sizes = [1, 128], strides = [1, 1]} : vector<1x384xf32> to vector<1x128xf32>
    %55 = arith.addf %53, %54 : vector<1x128xf32>
    %56 = arith.negf %55 : vector<1x128xf32>
    %57 = math.exp %56 : vector<1x128xf32>
    %cst_22 = arith.constant 1.000000e+00 : f32
    %58 = vector.broadcast %cst_22 : f32 to vector<1x128xf32>
    %59 = arith.addf %58, %57 : vector<1x128xf32>
    %60 = arith.divf %58, %59 : vector<1x128xf32>
    %61 = vector.extract_strided_slice %43 {offsets = [0, 256], sizes = [1, 128], strides = [1, 1]} : vector<1x384xf32> to vector<1x128xf32>
    %62 = vector.extract_strided_slice %44 {offsets = [0, 256], sizes = [1, 128], strides = [1, 1]} : vector<1x384xf32> to vector<1x128xf32>
    %63 = arith.addf %62, %12 : vector<1x128xf32>
    %64 = arith.mulf %52, %63 : vector<1x128xf32>
    %65 = arith.addf %61, %64 : vector<1x128xf32>
    %66 = math.tanh %65 : vector<1x128xf32>
    %cst_23 = arith.constant 1.000000e+00 : f32
    %67 = vector.broadcast %cst_23 : f32 to vector<1x128xf32>
    %68 = arith.subf %67, %60 : vector<1x128xf32>
    %69 = arith.mulf %68, %66 : vector<1x128xf32>
    %70 = arith.mulf %60, %42 : vector<1x128xf32>
    %71 = arith.addf %69, %70 : vector<1x128xf32>
    %72 = vector.extract_strided_slice %10 {offsets = [2, 0], sizes = [1, 384], strides = [1, 1]} : vector<8x384xf32> to vector<1x384xf32>
    %cst_24 = arith.constant dense<0.000000e+00> : vector<1x384xf32>
    %73 = tpu.matmul %71, %11, %cst_24 {dimension_numbers = #tpu.dot_dimension_numbers<[1], [0], [0], [1], [0, 0, 1, 1], [], []>} : vector<1x128xf32>, vector<128x384xf32>, vector<1x384xf32> -> vector<1x384xf32>
    %74 = vector.extract_strided_slice %72 {offsets = [0, 0], sizes = [1, 128], strides = [1, 1]} : vector<1x384xf32> to vector<1x128xf32>
    %75 = vector.extract_strided_slice %73 {offsets = [0, 0], sizes = [1, 128], strides = [1, 1]} : vector<1x384xf32> to vector<1x128xf32>
    %76 = arith.addf %74, %75 : vector<1x128xf32>
    %77 = arith.negf %76 : vector<1x128xf32>
    %78 = math.exp %77 : vector<1x128xf32>
    %cst_25 = arith.constant 1.000000e+00 : f32
    %79 = vector.broadcast %cst_25 : f32 to vector<1x128xf32>
    %80 = arith.addf %79, %78 : vector<1x128xf32>
    %81 = arith.divf %79, %80 : vector<1x128xf32>
    %82 = vector.extract_strided_slice %72 {offsets = [0, 128], sizes = [1, 128], strides = [1, 1]} : vector<1x384xf32> to vector<1x128xf32>
    %83 = vector.extract_strided_slice %73 {offsets = [0, 128], sizes = [1, 128], strides = [1, 1]} : vector<1x384xf32> to vector<1x128xf32>
    %84 = arith.addf %82, %83 : vector<1x128xf32>
    %85 = arith.negf %84 : vector<1x128xf32>
    %86 = math.exp %85 : vector<1x128xf32>
    %cst_26 = arith.constant 1.000000e+00 : f32
    %87 = vector.broadcast %cst_26 : f32 to vector<1x128xf32>
    %88 = arith.addf %87, %86 : vector<1x128xf32>
    %89 = arith.divf %87, %88 : vector<1x128xf32>
    %90 = vector.extract_strided_slice %72 {offsets = [0, 256], sizes = [1, 128], strides = [1, 1]} : vector<1x384xf32> to vector<1x128xf32>
    %91 = vector.extract_strided_slice %73 {offsets = [0, 256], sizes = [1, 128], strides = [1, 1]} : vector<1x384xf32> to vector<1x128xf32>
    %92 = arith.addf %91, %12 : vector<1x128xf32>
    %93 = arith.mulf %81, %92 : vector<1x128xf32>
    %94 = arith.addf %90, %93 : vector<1x128xf32>
    %95 = math.tanh %94 : vector<1x128xf32>
    %cst_27 = arith.constant 1.000000e+00 : f32
    %96 = vector.broadcast %cst_27 : f32 to vector<1x128xf32>
    %97 = arith.subf %96, %89 : vector<1x128xf32>
    %98 = arith.mulf %97, %95 : vector<1x128xf32>
    %99 = arith.mulf %89, %71 : vector<1x128xf32>
    %100 = arith.addf %98, %99 : vector<1x128xf32>
    %101 = vector.extract_strided_slice %10 {offsets = [3, 0], sizes = [1, 384], strides = [1, 1]} : vector<8x384xf32> to vector<1x384xf32>
    %cst_28 = arith.constant dense<0.000000e+00> : vector<1x384xf32>
    %102 = tpu.matmul %100, %11, %cst_28 {dimension_numbers = #tpu.dot_dimension_numbers<[1], [0], [0], [1], [0, 0, 1, 1], [], []>} : vector<1x128xf32>, vector<128x384xf32>, vector<1x384xf32> -> vector<1x384xf32>
    %103 = vector.extract_strided_slice %101 {offsets = [0, 0], sizes = [1, 128], strides = [1, 1]} : vector<1x384xf32> to vector<1x128xf32>
    %104 = vector.extract_strided_slice %102 {offsets = [0, 0], sizes = [1, 128], strides = [1, 1]} : vector<1x384xf32> to vector<1x128xf32>
    %105 = arith.addf %103, %104 : vector<1x128xf32>
    %106 = arith.negf %105 : vector<1x128xf32>
    %107 = math.exp %106 : vector<1x128xf32>
    %cst_29 = arith.constant 1.000000e+00 : f32
    %108 = vector.broadcast %cst_29 : f32 to vector<1x128xf32>
    %109 = arith.addf %108, %107 : vector<1x128xf32>
    %110 = arith.divf %108, %109 : vector<1x128xf32>
    %111 = vector.extract_strided_slice %101 {offsets = [0, 128], sizes = [1, 128], strides = [1, 1]} : vector<1x384xf32> to vector<1x128xf32>
    %112 = vector.extract_strided_slice %102 {offsets = [0, 128], sizes = [1, 128], strides = [1, 1]} : vector<1x384xf32> to vector<1x128xf32>
    %113 = arith.addf %111, %112 : vector<1x128xf32>
    %114 = arith.negf %113 : vector<1x128xf32>
    %115 = math.exp %114 : vector<1x128xf32>
    %cst_30 = arith.constant 1.000000e+00 : f32
    %116 = vector.broadcast %cst_30 : f32 to vector<1x128xf32>
    %117 = arith.addf %116, %115 : vector<1x128xf32>
    %118 = arith.divf %116, %117 : vector<1x128xf32>
    %119 = vector.extract_strided_slice %101 {offsets = [0, 256], sizes = [1, 128], strides = [1, 1]} : vector<1x384xf32> to vector<1x128xf32>
    %120 = vector.extract_strided_slice %102 {offsets = [0, 256], sizes = [1, 128], strides = [1, 1]} : vector<1x384xf32> to vector<1x128xf32>
    %121 = arith.addf %120, %12 : vector<1x128xf32>
    %122 = arith.mulf %110, %121 : vector<1x128xf32>
    %123 = arith.addf %119, %122 : vector<1x128xf32>
    %124 = math.tanh %123 : vector<1x128xf32>
    %cst_31 = arith.constant 1.000000e+00 : f32
    %125 = vector.broadcast %cst_31 : f32 to vector<1x128xf32>
    %126 = arith.subf %125, %118 : vector<1x128xf32>
    %127 = arith.mulf %126, %124 : vector<1x128xf32>
    %128 = arith.mulf %118, %100 : vector<1x128xf32>
    %129 = arith.addf %127, %128 : vector<1x128xf32>
    %130 = vector.extract_strided_slice %10 {offsets = [4, 0], sizes = [1, 384], strides = [1, 1]} : vector<8x384xf32> to vector<1x384xf32>
    %cst_32 = arith.constant dense<0.000000e+00> : vector<1x384xf32>
    %131 = tpu.matmul %129, %11, %cst_32 {dimension_numbers = #tpu.dot_dimension_numbers<[1], [0], [0], [1], [0, 0, 1, 1], [], []>} : vector<1x128xf32>, vector<128x384xf32>, vector<1x384xf32> -> vector<1x384xf32>
    %132 = vector.extract_strided_slice %130 {offsets = [0, 0], sizes = [1, 128], strides = [1, 1]} : vector<1x384xf32> to vector<1x128xf32>
    %133 = vector.extract_strided_slice %131 {offsets = [0, 0], sizes = [1, 128], strides = [1, 1]} : vector<1x384xf32> to vector<1x128xf32>
    %134 = arith.addf %132, %133 : vector<1x128xf32>
    %135 = arith.negf %134 : vector<1x128xf32>
    %136 = math.exp %135 : vector<1x128xf32>
    %cst_33 = arith.constant 1.000000e+00 : f32
    %137 = vector.broadcast %cst_33 : f32 to vector<1x128xf32>
    %138 = arith.addf %137, %136 : vector<1x128xf32>
    %139 = arith.divf %137, %138 : vector<1x128xf32>
    %140 = vector.extract_strided_slice %130 {offsets = [0, 128], sizes = [1, 128], strides = [1, 1]} : vector<1x384xf32> to vector<1x128xf32>
    %141 = vector.extract_strided_slice %131 {offsets = [0, 128], sizes = [1, 128], strides = [1, 1]} : vector<1x384xf32> to vector<1x128xf32>
    %142 = arith.addf %140, %141 : vector<1x128xf32>
    %143 = arith.negf %142 : vector<1x128xf32>
    %144 = math.exp %143 : vector<1x128xf32>
    %cst_34 = arith.constant 1.000000e+00 : f32
    %145 = vector.broadcast %cst_34 : f32 to vector<1x128xf32>
    %146 = arith.addf %145, %144 : vector<1x128xf32>
    %147 = arith.divf %145, %146 : vector<1x128xf32>
    %148 = vector.extract_strided_slice %130 {offsets = [0, 256], sizes = [1, 128], strides = [1, 1]} : vector<1x384xf32> to vector<1x128xf32>
    %149 = vector.extract_strided_slice %131 {offsets = [0, 256], sizes = [1, 128], strides = [1, 1]} : vector<1x384xf32> to vector<1x128xf32>
    %150 = arith.addf %149, %12 : vector<1x128xf32>
    %151 = arith.mulf %139, %150 : vector<1x128xf32>
    %152 = arith.addf %148, %151 : vector<1x128xf32>
    %153 = math.tanh %152 : vector<1x128xf32>
    %cst_35 = arith.constant 1.000000e+00 : f32
    %154 = vector.broadcast %cst_35 : f32 to vector<1x128xf32>
    %155 = arith.subf %154, %147 : vector<1x128xf32>
    %156 = arith.mulf %155, %153 : vector<1x128xf32>
    %157 = arith.mulf %147, %129 : vector<1x128xf32>
    %158 = arith.addf %156, %157 : vector<1x128xf32>
    %159 = vector.extract_strided_slice %10 {offsets = [5, 0], sizes = [1, 384], strides = [1, 1]} : vector<8x384xf32> to vector<1x384xf32>
    %cst_36 = arith.constant dense<0.000000e+00> : vector<1x384xf32>
    %160 = tpu.matmul %158, %11, %cst_36 {dimension_numbers = #tpu.dot_dimension_numbers<[1], [0], [0], [1], [0, 0, 1, 1], [], []>} : vector<1x128xf32>, vector<128x384xf32>, vector<1x384xf32> -> vector<1x384xf32>
    %161 = vector.extract_strided_slice %159 {offsets = [0, 0], sizes = [1, 128], strides = [1, 1]} : vector<1x384xf32> to vector<1x128xf32>
    %162 = vector.extract_strided_slice %160 {offsets = [0, 0], sizes = [1, 128], strides = [1, 1]} : vector<1x384xf32> to vector<1x128xf32>
    %163 = arith.addf %161, %162 : vector<1x128xf32>
    %164 = arith.negf %163 : vector<1x128xf32>
    %165 = math.exp %164 : vector<1x128xf32>
    %cst_37 = arith.constant 1.000000e+00 : f32
    %166 = vector.broadcast %cst_37 : f32 to vector<1x128xf32>
    %167 = arith.addf %166, %165 : vector<1x128xf32>
    %168 = arith.divf %166, %167 : vector<1x128xf32>
    %169 = vector.extract_strided_slice %159 {offsets = [0, 128], sizes = [1, 128], strides = [1, 1]} : vector<1x384xf32> to vector<1x128xf32>
    %170 = vector.extract_strided_slice %160 {offsets = [0, 128], sizes = [1, 128], strides = [1, 1]} : vector<1x384xf32> to vector<1x128xf32>
    %171 = arith.addf %169, %170 : vector<1x128xf32>
    %172 = arith.negf %171 : vector<1x128xf32>
    %173 = math.exp %172 : vector<1x128xf32>
    %cst_38 = arith.constant 1.000000e+00 : f32
    %174 = vector.broadcast %cst_38 : f32 to vector<1x128xf32>
    %175 = arith.addf %174, %173 : vector<1x128xf32>
    %176 = arith.divf %174, %175 : vector<1x128xf32>
    %177 = vector.extract_strided_slice %159 {offsets = [0, 256], sizes = [1, 128], strides = [1, 1]} : vector<1x384xf32> to vector<1x128xf32>
    %178 = vector.extract_strided_slice %160 {offsets = [0, 256], sizes = [1, 128], strides = [1, 1]} : vector<1x384xf32> to vector<1x128xf32>
    %179 = arith.addf %178, %12 : vector<1x128xf32>
    %180 = arith.mulf %168, %179 : vector<1x128xf32>
    %181 = arith.addf %177, %180 : vector<1x128xf32>
    %182 = math.tanh %181 : vector<1x128xf32>
    %cst_39 = arith.constant 1.000000e+00 : f32
    %183 = vector.broadcast %cst_39 : f32 to vector<1x128xf32>
    %184 = arith.subf %183, %176 : vector<1x128xf32>
    %185 = arith.mulf %184, %182 : vector<1x128xf32>
    %186 = arith.mulf %176, %158 : vector<1x128xf32>
    %187 = arith.addf %185, %186 : vector<1x128xf32>
    %188 = vector.extract_strided_slice %10 {offsets = [6, 0], sizes = [1, 384], strides = [1, 1]} : vector<8x384xf32> to vector<1x384xf32>
    %cst_40 = arith.constant dense<0.000000e+00> : vector<1x384xf32>
    %189 = tpu.matmul %187, %11, %cst_40 {dimension_numbers = #tpu.dot_dimension_numbers<[1], [0], [0], [1], [0, 0, 1, 1], [], []>} : vector<1x128xf32>, vector<128x384xf32>, vector<1x384xf32> -> vector<1x384xf32>
    %190 = vector.extract_strided_slice %188 {offsets = [0, 0], sizes = [1, 128], strides = [1, 1]} : vector<1x384xf32> to vector<1x128xf32>
    %191 = vector.extract_strided_slice %189 {offsets = [0, 0], sizes = [1, 128], strides = [1, 1]} : vector<1x384xf32> to vector<1x128xf32>
    %192 = arith.addf %190, %191 : vector<1x128xf32>
    %193 = arith.negf %192 : vector<1x128xf32>
    %194 = math.exp %193 : vector<1x128xf32>
    %cst_41 = arith.constant 1.000000e+00 : f32
    %195 = vector.broadcast %cst_41 : f32 to vector<1x128xf32>
    %196 = arith.addf %195, %194 : vector<1x128xf32>
    %197 = arith.divf %195, %196 : vector<1x128xf32>
    %198 = vector.extract_strided_slice %188 {offsets = [0, 128], sizes = [1, 128], strides = [1, 1]} : vector<1x384xf32> to vector<1x128xf32>
    %199 = vector.extract_strided_slice %189 {offsets = [0, 128], sizes = [1, 128], strides = [1, 1]} : vector<1x384xf32> to vector<1x128xf32>
    %200 = arith.addf %198, %199 : vector<1x128xf32>
    %201 = arith.negf %200 : vector<1x128xf32>
    %202 = math.exp %201 : vector<1x128xf32>
    %cst_42 = arith.constant 1.000000e+00 : f32
    %203 = vector.broadcast %cst_42 : f32 to vector<1x128xf32>
    %204 = arith.addf %203, %202 : vector<1x128xf32>
    %205 = arith.divf %203, %204 : vector<1x128xf32>
    %206 = vector.extract_strided_slice %188 {offsets = [0, 256], sizes = [1, 128], strides = [1, 1]} : vector<1x384xf32> to vector<1x128xf32>
    %207 = vector.extract_strided_slice %189 {offsets = [0, 256], sizes = [1, 128], strides = [1, 1]} : vector<1x384xf32> to vector<1x128xf32>
    %208 = arith.addf %207, %12 : vector<1x128xf32>
    %209 = arith.mulf %197, %208 : vector<1x128xf32>
    %210 = arith.addf %206, %209 : vector<1x128xf32>
    %211 = math.tanh %210 : vector<1x128xf32>
    %cst_43 = arith.constant 1.000000e+00 : f32
    %212 = vector.broadcast %cst_43 : f32 to vector<1x128xf32>
    %213 = arith.subf %212, %205 : vector<1x128xf32>
    %214 = arith.mulf %213, %211 : vector<1x128xf32>
    %215 = arith.mulf %205, %187 : vector<1x128xf32>
    %216 = arith.addf %214, %215 : vector<1x128xf32>
    %217 = vector.extract_strided_slice %10 {offsets = [7, 0], sizes = [1, 384], strides = [1, 1]} : vector<8x384xf32> to vector<1x384xf32>
    %cst_44 = arith.constant dense<0.000000e+00> : vector<1x384xf32>
    %218 = tpu.matmul %216, %11, %cst_44 {dimension_numbers = #tpu.dot_dimension_numbers<[1], [0], [0], [1], [0, 0, 1, 1], [], []>} : vector<1x128xf32>, vector<128x384xf32>, vector<1x384xf32> -> vector<1x384xf32>
    %219 = vector.extract_strided_slice %217 {offsets = [0, 0], sizes = [1, 128], strides = [1, 1]} : vector<1x384xf32> to vector<1x128xf32>
    %220 = vector.extract_strided_slice %218 {offsets = [0, 0], sizes = [1, 128], strides = [1, 1]} : vector<1x384xf32> to vector<1x128xf32>
    %221 = arith.addf %219, %220 : vector<1x128xf32>
    %222 = arith.negf %221 : vector<1x128xf32>
    %223 = math.exp %222 : vector<1x128xf32>
    %cst_45 = arith.constant 1.000000e+00 : f32
    %224 = vector.broadcast %cst_45 : f32 to vector<1x128xf32>
    %225 = arith.addf %224, %223 : vector<1x128xf32>
    %226 = arith.divf %224, %225 : vector<1x128xf32>
    %227 = vector.extract_strided_slice %217 {offsets = [0, 128], sizes = [1, 128], strides = [1, 1]} : vector<1x384xf32> to vector<1x128xf32>
    %228 = vector.extract_strided_slice %218 {offsets = [0, 128], sizes = [1, 128], strides = [1, 1]} : vector<1x384xf32> to vector<1x128xf32>
    %229 = arith.addf %227, %228 : vector<1x128xf32>
    %230 = arith.negf %229 : vector<1x128xf32>
    %231 = math.exp %230 : vector<1x128xf32>
    %cst_46 = arith.constant 1.000000e+00 : f32
    %232 = vector.broadcast %cst_46 : f32 to vector<1x128xf32>
    %233 = arith.addf %232, %231 : vector<1x128xf32>
    %234 = arith.divf %232, %233 : vector<1x128xf32>
    %235 = vector.extract_strided_slice %217 {offsets = [0, 256], sizes = [1, 128], strides = [1, 1]} : vector<1x384xf32> to vector<1x128xf32>
    %236 = vector.extract_strided_slice %218 {offsets = [0, 256], sizes = [1, 128], strides = [1, 1]} : vector<1x384xf32> to vector<1x128xf32>
    %237 = arith.addf %236, %12 : vector<1x128xf32>
    %238 = arith.mulf %226, %237 : vector<1x128xf32>
    %239 = arith.addf %235, %238 : vector<1x128xf32>
    %240 = math.tanh %239 : vector<1x128xf32>
    %cst_47 = arith.constant 1.000000e+00 : f32
    %241 = vector.broadcast %cst_47 : f32 to vector<1x128xf32>
    %242 = arith.subf %241, %234 : vector<1x128xf32>
    %243 = arith.mulf %242, %240 : vector<1x128xf32>
    %244 = arith.mulf %234, %216 : vector<1x128xf32>
    %245 = arith.addf %243, %244 : vector<1x128xf32>
    %c0_48 = arith.constant 0 : index
    %c0_49 = arith.constant 0 : index
    %246 = vector.load %arg15[%c0_48, %c0_49] : memref<2x128xf32, #tpu.memory_space<vmem>>, vector<1x128xf32>
    tpu.vector_store %arg15[%c0_48, %c0_49], %245 {strides = array<i32>} : memref<2x128xf32, #tpu.memory_space<vmem>>, vector<1x128xf32>,
    %247 = tpu.concatenate %42, %71, %100, %129, %158, %187, %216, %245 in 0 : vector<1x128xf32>, vector<1x128xf32>, vector<1x128xf32>, vector<1x128xf32>, vector<1x128xf32>, vector<1x128xf32>, vector<1x128xf32>, vector<1x128xf32> -> vector<8x128xf32>
    %c0_50 = arith.constant 0 : index
    %c0_51 = arith.constant 0 : index
    %248 = vector.load %arg7[%c0_50, %c0_51] : memref<128x384xf32, #tpu.memory_space<vmem>>, vector<128x384xf32>
    %cst_52 = arith.constant dense<0.000000e+00> : vector<8x384xf32>
    %249 = tpu.matmul %247, %248, %cst_52 {dimension_numbers = #tpu.dot_dimension_numbers<[1], [0], [0], [1], [0, 0, 1, 1], [], []>} : vector<8x128xf32>, vector<128x384xf32>, vector<8x384xf32> -> vector<8x384xf32>
    %c0_53 = arith.constant 0 : index
    %c0_54 = arith.constant 0 : index
    %250 = vector.load %arg9[%c0_53, %c0_54] : memref<1x384xf32, #tpu.memory_space<vmem>>, vector<1x384xf32>
    %251 = vector.broadcast %250 : vector<1x384xf32> to vector<8x384xf32>
    %252 = arith.addf %249, %251 : vector<8x384xf32>
    %c0_55 = arith.constant 0 : index
    %c0_56 = arith.constant 0 : index
    %253 = vector.load %arg8[%c0_55, %c0_56] : memref<128x384xf32, #tpu.memory_space<vmem>>, vector<128x384xf32>
    %c0_57 = arith.constant 0 : index
    %c0_58 = arith.constant 0 : index
    %254 = vector.load %arg10[%c0_57, %c0_58] : memref<1x128xf32, #tpu.memory_space<vmem>>, vector<1x128xf32>
    %c1 = arith.constant 1 : index
    %c0_59 = arith.constant 0 : index
    %255 = vector.load %arg13[%c1, %c0_59] : memref<2x128xf32, #tpu.memory_space<vmem>>, vector<1x128xf32>
    %256 = vector.extract_strided_slice %252 {offsets = [0, 0], sizes = [1, 384], strides = [1, 1]} : vector<8x384xf32> to vector<1x384xf32>
    %cst_60 = arith.constant dense<0.000000e+00> : vector<1x384xf32>
    %257 = tpu.matmul %255, %253, %cst_60 {dimension_numbers = #tpu.dot_dimension_numbers<[1], [0], [0], [1], [0, 0, 1, 1], [], []>} : vector<1x128xf32>, vector<128x384xf32>, vector<1x384xf32> -> vector<1x384xf32>
    %258 = vector.extract_strided_slice %256 {offsets = [0, 0], sizes = [1, 128], strides = [1, 1]} : vector<1x384xf32> to vector<1x128xf32>
    %259 = vector.extract_strided_slice %257 {offsets = [0, 0], sizes = [1, 128], strides = [1, 1]} : vector<1x384xf32> to vector<1x128xf32>
    %260 = arith.addf %258, %259 : vector<1x128xf32>
    %261 = arith.negf %260 : vector<1x128xf32>
    %262 = math.exp %261 : vector<1x128xf32>
    %cst_61 = arith.constant 1.000000e+00 : f32
    %263 = vector.broadcast %cst_61 : f32 to vector<1x128xf32>
    %264 = arith.addf %263, %262 : vector<1x128xf32>
    %265 = arith.divf %263, %264 : vector<1x128xf32>
    %266 = vector.extract_strided_slice %256 {offsets = [0, 128], sizes = [1, 128], strides = [1, 1]} : vector<1x384xf32> to vector<1x128xf32>
    %267 = vector.extract_strided_slice %257 {offsets = [0, 128], sizes = [1, 128], strides = [1, 1]} : vector<1x384xf32> to vector<1x128xf32>
    %268 = arith.addf %266, %267 : vector<1x128xf32>
    %269 = arith.negf %268 : vector<1x128xf32>
    %270 = math.exp %269 : vector<1x128xf32>
    %cst_62 = arith.constant 1.000000e+00 : f32
    %271 = vector.broadcast %cst_62 : f32 to vector<1x128xf32>
    %272 = arith.addf %271, %270 : vector<1x128xf32>
    %273 = arith.divf %271, %272 : vector<1x128xf32>
    %274 = vector.extract_strided_slice %256 {offsets = [0, 256], sizes = [1, 128], strides = [1, 1]} : vector<1x384xf32> to vector<1x128xf32>
    %275 = vector.extract_strided_slice %257 {offsets = [0, 256], sizes = [1, 128], strides = [1, 1]} : vector<1x384xf32> to vector<1x128xf32>
    %276 = arith.addf %275, %254 : vector<1x128xf32>
    %277 = arith.mulf %265, %276 : vector<1x128xf32>
    %278 = arith.addf %274, %277 : vector<1x128xf32>
    %279 = math.tanh %278 : vector<1x128xf32>
    %cst_63 = arith.constant 1.000000e+00 : f32
    %280 = vector.broadcast %cst_63 : f32 to vector<1x128xf32>
    %281 = arith.subf %280, %273 : vector<1x128xf32>
    %282 = arith.mulf %281, %279 : vector<1x128xf32>
    %283 = arith.mulf %273, %255 : vector<1x128xf32>
    %284 = arith.addf %282, %283 : vector<1x128xf32>
    %285 = vector.extract_strided_slice %252 {offsets = [1, 0], sizes = [1, 384], strides = [1, 1]} : vector<8x384xf32> to vector<1x384xf32>
    %cst_64 = arith.constant dense<0.000000e+00> : vector<1x384xf32>
    %286 = tpu.matmul %284, %253, %cst_64 {dimension_numbers = #tpu.dot_dimension_numbers<[1], [0], [0], [1], [0, 0, 1, 1], [], []>} : vector<1x128xf32>, vector<128x384xf32>, vector<1x384xf32> -> vector<1x384xf32>
    %287 = vector.extract_strided_slice %285 {offsets = [0, 0], sizes = [1, 128], strides = [1, 1]} : vector<1x384xf32> to vector<1x128xf32>
    %288 = vector.extract_strided_slice %286 {offsets = [0, 0], sizes = [1, 128], strides = [1, 1]} : vector<1x384xf32> to vector<1x128xf32>
    %289 = arith.addf %287, %288 : vector<1x128xf32>
    %290 = arith.negf %289 : vector<1x128xf32>
    %291 = math.exp %290 : vector<1x128xf32>
    %cst_65 = arith.constant 1.000000e+00 : f32
    %292 = vector.broadcast %cst_65 : f32 to vector<1x128xf32>
    %293 = arith.addf %292, %291 : vector<1x128xf32>
    %294 = arith.divf %292, %293 : vector<1x128xf32>
    %295 = vector.extract_strided_slice %285 {offsets = [0, 128], sizes = [1, 128], strides = [1, 1]} : vector<1x384xf32> to vector<1x128xf32>
    %296 = vector.extract_strided_slice %286 {offsets = [0, 128], sizes = [1, 128], strides = [1, 1]} : vector<1x384xf32> to vector<1x128xf32>
    %297 = arith.addf %295, %296 : vector<1x128xf32>
    %298 = arith.negf %297 : vector<1x128xf32>
    %299 = math.exp %298 : vector<1x128xf32>
    %cst_66 = arith.constant 1.000000e+00 : f32
    %300 = vector.broadcast %cst_66 : f32 to vector<1x128xf32>
    %301 = arith.addf %300, %299 : vector<1x128xf32>
    %302 = arith.divf %300, %301 : vector<1x128xf32>
    %303 = vector.extract_strided_slice %285 {offsets = [0, 256], sizes = [1, 128], strides = [1, 1]} : vector<1x384xf32> to vector<1x128xf32>
    %304 = vector.extract_strided_slice %286 {offsets = [0, 256], sizes = [1, 128], strides = [1, 1]} : vector<1x384xf32> to vector<1x128xf32>
    %305 = arith.addf %304, %254 : vector<1x128xf32>
    %306 = arith.mulf %294, %305 : vector<1x128xf32>
    %307 = arith.addf %303, %306 : vector<1x128xf32>
    %308 = math.tanh %307 : vector<1x128xf32>
    %cst_67 = arith.constant 1.000000e+00 : f32
    %309 = vector.broadcast %cst_67 : f32 to vector<1x128xf32>
    %310 = arith.subf %309, %302 : vector<1x128xf32>
    %311 = arith.mulf %310, %308 : vector<1x128xf32>
    %312 = arith.mulf %302, %284 : vector<1x128xf32>
    %313 = arith.addf %311, %312 : vector<1x128xf32>
    %314 = vector.extract_strided_slice %252 {offsets = [2, 0], sizes = [1, 384], strides = [1, 1]} : vector<8x384xf32> to vector<1x384xf32>
    %cst_68 = arith.constant dense<0.000000e+00> : vector<1x384xf32>
    %315 = tpu.matmul %313, %253, %cst_68 {dimension_numbers = #tpu.dot_dimension_numbers<[1], [0], [0], [1], [0, 0, 1, 1], [], []>} : vector<1x128xf32>, vector<128x384xf32>, vector<1x384xf32> -> vector<1x384xf32>
    %316 = vector.extract_strided_slice %314 {offsets = [0, 0], sizes = [1, 128], strides = [1, 1]} : vector<1x384xf32> to vector<1x128xf32>
    %317 = vector.extract_strided_slice %315 {offsets = [0, 0], sizes = [1, 128], strides = [1, 1]} : vector<1x384xf32> to vector<1x128xf32>
    %318 = arith.addf %316, %317 : vector<1x128xf32>
    %319 = arith.negf %318 : vector<1x128xf32>
    %320 = math.exp %319 : vector<1x128xf32>
    %cst_69 = arith.constant 1.000000e+00 : f32
    %321 = vector.broadcast %cst_69 : f32 to vector<1x128xf32>
    %322 = arith.addf %321, %320 : vector<1x128xf32>
    %323 = arith.divf %321, %322 : vector<1x128xf32>
    %324 = vector.extract_strided_slice %314 {offsets = [0, 128], sizes = [1, 128], strides = [1, 1]} : vector<1x384xf32> to vector<1x128xf32>
    %325 = vector.extract_strided_slice %315 {offsets = [0, 128], sizes = [1, 128], strides = [1, 1]} : vector<1x384xf32> to vector<1x128xf32>
    %326 = arith.addf %324, %325 : vector<1x128xf32>
    %327 = arith.negf %326 : vector<1x128xf32>
    %328 = math.exp %327 : vector<1x128xf32>
    %cst_70 = arith.constant 1.000000e+00 : f32
    %329 = vector.broadcast %cst_70 : f32 to vector<1x128xf32>
    %330 = arith.addf %329, %328 : vector<1x128xf32>
    %331 = arith.divf %329, %330 : vector<1x128xf32>
    %332 = vector.extract_strided_slice %314 {offsets = [0, 256], sizes = [1, 128], strides = [1, 1]} : vector<1x384xf32> to vector<1x128xf32>
    %333 = vector.extract_strided_slice %315 {offsets = [0, 256], sizes = [1, 128], strides = [1, 1]} : vector<1x384xf32> to vector<1x128xf32>
    %334 = arith.addf %333, %254 : vector<1x128xf32>
    %335 = arith.mulf %323, %334 : vector<1x128xf32>
    %336 = arith.addf %332, %335 : vector<1x128xf32>
    %337 = math.tanh %336 : vector<1x128xf32>
    %cst_71 = arith.constant 1.000000e+00 : f32
    %338 = vector.broadcast %cst_71 : f32 to vector<1x128xf32>
    %339 = arith.subf %338, %331 : vector<1x128xf32>
    %340 = arith.mulf %339, %337 : vector<1x128xf32>
    %341 = arith.mulf %331, %313 : vector<1x128xf32>
    %342 = arith.addf %340, %341 : vector<1x128xf32>
    %343 = vector.extract_strided_slice %252 {offsets = [3, 0], sizes = [1, 384], strides = [1, 1]} : vector<8x384xf32> to vector<1x384xf32>
    %cst_72 = arith.constant dense<0.000000e+00> : vector<1x384xf32>
    %344 = tpu.matmul %342, %253, %cst_72 {dimension_numbers = #tpu.dot_dimension_numbers<[1], [0], [0], [1], [0, 0, 1, 1], [], []>} : vector<1x128xf32>, vector<128x384xf32>, vector<1x384xf32> -> vector<1x384xf32>
    %345 = vector.extract_strided_slice %343 {offsets = [0, 0], sizes = [1, 128], strides = [1, 1]} : vector<1x384xf32> to vector<1x128xf32>
    %346 = vector.extract_strided_slice %344 {offsets = [0, 0], sizes = [1, 128], strides = [1, 1]} : vector<1x384xf32> to vector<1x128xf32>
    %347 = arith.addf %345, %346 : vector<1x128xf32>
    %348 = arith.negf %347 : vector<1x128xf32>
    %349 = math.exp %348 : vector<1x128xf32>
    %cst_73 = arith.constant 1.000000e+00 : f32
    %350 = vector.broadcast %cst_73 : f32 to vector<1x128xf32>
    %351 = arith.addf %350, %349 : vector<1x128xf32>
    %352 = arith.divf %350, %351 : vector<1x128xf32>
    %353 = vector.extract_strided_slice %343 {offsets = [0, 128], sizes = [1, 128], strides = [1, 1]} : vector<1x384xf32> to vector<1x128xf32>
    %354 = vector.extract_strided_slice %344 {offsets = [0, 128], sizes = [1, 128], strides = [1, 1]} : vector<1x384xf32> to vector<1x128xf32>
    %355 = arith.addf %353, %354 : vector<1x128xf32>
    %356 = arith.negf %355 : vector<1x128xf32>
    %357 = math.exp %356 : vector<1x128xf32>
    %cst_74 = arith.constant 1.000000e+00 : f32
    %358 = vector.broadcast %cst_74 : f32 to vector<1x128xf32>
    %359 = arith.addf %358, %357 : vector<1x128xf32>
    %360 = arith.divf %358, %359 : vector<1x128xf32>
    %361 = vector.extract_strided_slice %343 {offsets = [0, 256], sizes = [1, 128], strides = [1, 1]} : vector<1x384xf32> to vector<1x128xf32>
    %362 = vector.extract_strided_slice %344 {offsets = [0, 256], sizes = [1, 128], strides = [1, 1]} : vector<1x384xf32> to vector<1x128xf32>
    %363 = arith.addf %362, %254 : vector<1x128xf32>
    %364 = arith.mulf %352, %363 : vector<1x128xf32>
    %365 = arith.addf %361, %364 : vector<1x128xf32>
    %366 = math.tanh %365 : vector<1x128xf32>
    %cst_75 = arith.constant 1.000000e+00 : f32
    %367 = vector.broadcast %cst_75 : f32 to vector<1x128xf32>
    %368 = arith.subf %367, %360 : vector<1x128xf32>
    %369 = arith.mulf %368, %366 : vector<1x128xf32>
    %370 = arith.mulf %360, %342 : vector<1x128xf32>
    %371 = arith.addf %369, %370 : vector<1x128xf32>
    %372 = vector.extract_strided_slice %252 {offsets = [4, 0], sizes = [1, 384], strides = [1, 1]} : vector<8x384xf32> to vector<1x384xf32>
    %cst_76 = arith.constant dense<0.000000e+00> : vector<1x384xf32>
    %373 = tpu.matmul %371, %253, %cst_76 {dimension_numbers = #tpu.dot_dimension_numbers<[1], [0], [0], [1], [0, 0, 1, 1], [], []>} : vector<1x128xf32>, vector<128x384xf32>, vector<1x384xf32> -> vector<1x384xf32>
    %374 = vector.extract_strided_slice %372 {offsets = [0, 0], sizes = [1, 128], strides = [1, 1]} : vector<1x384xf32> to vector<1x128xf32>
    %375 = vector.extract_strided_slice %373 {offsets = [0, 0], sizes = [1, 128], strides = [1, 1]} : vector<1x384xf32> to vector<1x128xf32>
    %376 = arith.addf %374, %375 : vector<1x128xf32>
    %377 = arith.negf %376 : vector<1x128xf32>
    %378 = math.exp %377 : vector<1x128xf32>
    %cst_77 = arith.constant 1.000000e+00 : f32
    %379 = vector.broadcast %cst_77 : f32 to vector<1x128xf32>
    %380 = arith.addf %379, %378 : vector<1x128xf32>
    %381 = arith.divf %379, %380 : vector<1x128xf32>
    %382 = vector.extract_strided_slice %372 {offsets = [0, 128], sizes = [1, 128], strides = [1, 1]} : vector<1x384xf32> to vector<1x128xf32>
    %383 = vector.extract_strided_slice %373 {offsets = [0, 128], sizes = [1, 128], strides = [1, 1]} : vector<1x384xf32> to vector<1x128xf32>
    %384 = arith.addf %382, %383 : vector<1x128xf32>
    %385 = arith.negf %384 : vector<1x128xf32>
    %386 = math.exp %385 : vector<1x128xf32>
    %cst_78 = arith.constant 1.000000e+00 : f32
    %387 = vector.broadcast %cst_78 : f32 to vector<1x128xf32>
    %388 = arith.addf %387, %386 : vector<1x128xf32>
    %389 = arith.divf %387, %388 : vector<1x128xf32>
    %390 = vector.extract_strided_slice %372 {offsets = [0, 256], sizes = [1, 128], strides = [1, 1]} : vector<1x384xf32> to vector<1x128xf32>
    %391 = vector.extract_strided_slice %373 {offsets = [0, 256], sizes = [1, 128], strides = [1, 1]} : vector<1x384xf32> to vector<1x128xf32>
    %392 = arith.addf %391, %254 : vector<1x128xf32>
    %393 = arith.mulf %381, %392 : vector<1x128xf32>
    %394 = arith.addf %390, %393 : vector<1x128xf32>
    %395 = math.tanh %394 : vector<1x128xf32>
    %cst_79 = arith.constant 1.000000e+00 : f32
    %396 = vector.broadcast %cst_79 : f32 to vector<1x128xf32>
    %397 = arith.subf %396, %389 : vector<1x128xf32>
    %398 = arith.mulf %397, %395 : vector<1x128xf32>
    %399 = arith.mulf %389, %371 : vector<1x128xf32>
    %400 = arith.addf %398, %399 : vector<1x128xf32>
    %401 = vector.extract_strided_slice %252 {offsets = [5, 0], sizes = [1, 384], strides = [1, 1]} : vector<8x384xf32> to vector<1x384xf32>
    %cst_80 = arith.constant dense<0.000000e+00> : vector<1x384xf32>
    %402 = tpu.matmul %400, %253, %cst_80 {dimension_numbers = #tpu.dot_dimension_numbers<[1], [0], [0], [1], [0, 0, 1, 1], [], []>} : vector<1x128xf32>, vector<128x384xf32>, vector<1x384xf32> -> vector<1x384xf32>
    %403 = vector.extract_strided_slice %401 {offsets = [0, 0], sizes = [1, 128], strides = [1, 1]} : vector<1x384xf32> to vector<1x128xf32>
    %404 = vector.extract_strided_slice %402 {offsets = [0, 0], sizes = [1, 128], strides = [1, 1]} : vector<1x384xf32> to vector<1x128xf32>
    %405 = arith.addf %403, %404 : vector<1x128xf32>
    %406 = arith.negf %405 : vector<1x128xf32>
    %407 = math.exp %406 : vector<1x128xf32>
    %cst_81 = arith.constant 1.000000e+00 : f32
    %408 = vector.broadcast %cst_81 : f32 to vector<1x128xf32>
    %409 = arith.addf %408, %407 : vector<1x128xf32>
    %410 = arith.divf %408, %409 : vector<1x128xf32>
    %411 = vector.extract_strided_slice %401 {offsets = [0, 128], sizes = [1, 128], strides = [1, 1]} : vector<1x384xf32> to vector<1x128xf32>
    %412 = vector.extract_strided_slice %402 {offsets = [0, 128], sizes = [1, 128], strides = [1, 1]} : vector<1x384xf32> to vector<1x128xf32>
    %413 = arith.addf %411, %412 : vector<1x128xf32>
    %414 = arith.negf %413 : vector<1x128xf32>
    %415 = math.exp %414 : vector<1x128xf32>
    %cst_82 = arith.constant 1.000000e+00 : f32
    %416 = vector.broadcast %cst_82 : f32 to vector<1x128xf32>
    %417 = arith.addf %416, %415 : vector<1x128xf32>
    %418 = arith.divf %416, %417 : vector<1x128xf32>
    %419 = vector.extract_strided_slice %401 {offsets = [0, 256], sizes = [1, 128], strides = [1, 1]} : vector<1x384xf32> to vector<1x128xf32>
    %420 = vector.extract_strided_slice %402 {offsets = [0, 256], sizes = [1, 128], strides = [1, 1]} : vector<1x384xf32> to vector<1x128xf32>
    %421 = arith.addf %420, %254 : vector<1x128xf32>
    %422 = arith.mulf %410, %421 : vector<1x128xf32>
    %423 = arith.addf %419, %422 : vector<1x128xf32>
    %424 = math.tanh %423 : vector<1x128xf32>
    %cst_83 = arith.constant 1.000000e+00 : f32
    %425 = vector.broadcast %cst_83 : f32 to vector<1x128xf32>
    %426 = arith.subf %425, %418 : vector<1x128xf32>
    %427 = arith.mulf %426, %424 : vector<1x128xf32>
    %428 = arith.mulf %418, %400 : vector<1x128xf32>
    %429 = arith.addf %427, %428 : vector<1x128xf32>
    %430 = vector.extract_strided_slice %252 {offsets = [6, 0], sizes = [1, 384], strides = [1, 1]} : vector<8x384xf32> to vector<1x384xf32>
    %cst_84 = arith.constant dense<0.000000e+00> : vector<1x384xf32>
    %431 = tpu.matmul %429, %253, %cst_84 {dimension_numbers = #tpu.dot_dimension_numbers<[1], [0], [0], [1], [0, 0, 1, 1], [], []>} : vector<1x128xf32>, vector<128x384xf32>, vector<1x384xf32> -> vector<1x384xf32>
    %432 = vector.extract_strided_slice %430 {offsets = [0, 0], sizes = [1, 128], strides = [1, 1]} : vector<1x384xf32> to vector<1x128xf32>
    %433 = vector.extract_strided_slice %431 {offsets = [0, 0], sizes = [1, 128], strides = [1, 1]} : vector<1x384xf32> to vector<1x128xf32>
    %434 = arith.addf %432, %433 : vector<1x128xf32>
    %435 = arith.negf %434 : vector<1x128xf32>
    %436 = math.exp %435 : vector<1x128xf32>
    %cst_85 = arith.constant 1.000000e+00 : f32
    %437 = vector.broadcast %cst_85 : f32 to vector<1x128xf32>
    %438 = arith.addf %437, %436 : vector<1x128xf32>
    %439 = arith.divf %437, %438 : vector<1x128xf32>
    %440 = vector.extract_strided_slice %430 {offsets = [0, 128], sizes = [1, 128], strides = [1, 1]} : vector<1x384xf32> to vector<1x128xf32>
    %441 = vector.extract_strided_slice %431 {offsets = [0, 128], sizes = [1, 128], strides = [1, 1]} : vector<1x384xf32> to vector<1x128xf32>
    %442 = arith.addf %440, %441 : vector<1x128xf32>
    %443 = arith.negf %442 : vector<1x128xf32>
    %444 = math.exp %443 : vector<1x128xf32>
    %cst_86 = arith.constant 1.000000e+00 : f32
    %445 = vector.broadcast %cst_86 : f32 to vector<1x128xf32>
    %446 = arith.addf %445, %444 : vector<1x128xf32>
    %447 = arith.divf %445, %446 : vector<1x128xf32>
    %448 = vector.extract_strided_slice %430 {offsets = [0, 256], sizes = [1, 128], strides = [1, 1]} : vector<1x384xf32> to vector<1x128xf32>
    %449 = vector.extract_strided_slice %431 {offsets = [0, 256], sizes = [1, 128], strides = [1, 1]} : vector<1x384xf32> to vector<1x128xf32>
    %450 = arith.addf %449, %254 : vector<1x128xf32>
    %451 = arith.mulf %439, %450 : vector<1x128xf32>
    %452 = arith.addf %448, %451 : vector<1x128xf32>
    %453 = math.tanh %452 : vector<1x128xf32>
    %cst_87 = arith.constant 1.000000e+00 : f32
    %454 = vector.broadcast %cst_87 : f32 to vector<1x128xf32>
    %455 = arith.subf %454, %447 : vector<1x128xf32>
    %456 = arith.mulf %455, %453 : vector<1x128xf32>
    %457 = arith.mulf %447, %429 : vector<1x128xf32>
    %458 = arith.addf %456, %457 : vector<1x128xf32>
    %459 = vector.extract_strided_slice %252 {offsets = [7, 0], sizes = [1, 384], strides = [1, 1]} : vector<8x384xf32> to vector<1x384xf32>
    %cst_88 = arith.constant dense<0.000000e+00> : vector<1x384xf32>
    %460 = tpu.matmul %458, %253, %cst_88 {dimension_numbers = #tpu.dot_dimension_numbers<[1], [0], [0], [1], [0, 0, 1, 1], [], []>} : vector<1x128xf32>, vector<128x384xf32>, vector<1x384xf32> -> vector<1x384xf32>
    %461 = vector.extract_strided_slice %459 {offsets = [0, 0], sizes = [1, 128], strides = [1, 1]} : vector<1x384xf32> to vector<1x128xf32>
    %462 = vector.extract_strided_slice %460 {offsets = [0, 0], sizes = [1, 128], strides = [1, 1]} : vector<1x384xf32> to vector<1x128xf32>
    %463 = arith.addf %461, %462 : vector<1x128xf32>
    %464 = arith.negf %463 : vector<1x128xf32>
    %465 = math.exp %464 : vector<1x128xf32>
    %cst_89 = arith.constant 1.000000e+00 : f32
    %466 = vector.broadcast %cst_89 : f32 to vector<1x128xf32>
    %467 = arith.addf %466, %465 : vector<1x128xf32>
    %468 = arith.divf %466, %467 : vector<1x128xf32>
    %469 = vector.extract_strided_slice %459 {offsets = [0, 128], sizes = [1, 128], strides = [1, 1]} : vector<1x384xf32> to vector<1x128xf32>
    %470 = vector.extract_strided_slice %460 {offsets = [0, 128], sizes = [1, 128], strides = [1, 1]} : vector<1x384xf32> to vector<1x128xf32>
    %471 = arith.addf %469, %470 : vector<1x128xf32>
    %472 = arith.negf %471 : vector<1x128xf32>
    %473 = math.exp %472 : vector<1x128xf32>
    %cst_90 = arith.constant 1.000000e+00 : f32
    %474 = vector.broadcast %cst_90 : f32 to vector<1x128xf32>
    %475 = arith.addf %474, %473 : vector<1x128xf32>
    %476 = arith.divf %474, %475 : vector<1x128xf32>
    %477 = vector.extract_strided_slice %459 {offsets = [0, 256], sizes = [1, 128], strides = [1, 1]} : vector<1x384xf32> to vector<1x128xf32>
    %478 = vector.extract_strided_slice %460 {offsets = [0, 256], sizes = [1, 128], strides = [1, 1]} : vector<1x384xf32> to vector<1x128xf32>
    %479 = arith.addf %478, %254 : vector<1x128xf32>
    %480 = arith.mulf %468, %479 : vector<1x128xf32>
    %481 = arith.addf %477, %480 : vector<1x128xf32>
    %482 = math.tanh %481 : vector<1x128xf32>
    %cst_91 = arith.constant 1.000000e+00 : f32
    %483 = vector.broadcast %cst_91 : f32 to vector<1x128xf32>
    %484 = arith.subf %483, %476 : vector<1x128xf32>
    %485 = arith.mulf %484, %482 : vector<1x128xf32>
    %486 = arith.mulf %476, %458 : vector<1x128xf32>
    %487 = arith.addf %485, %486 : vector<1x128xf32>
    %c1_92 = arith.constant 1 : index
    %c0_93 = arith.constant 0 : index
    %488 = vector.load %arg15[%c1_92, %c0_93] : memref<2x128xf32, #tpu.memory_space<vmem>>, vector<1x128xf32>
    tpu.vector_store %arg15[%c1_92, %c0_93], %487 {strides = array<i32>} : memref<2x128xf32, #tpu.memory_space<vmem>>, vector<1x128xf32>,
    %489 = tpu.concatenate %284, %313, %342, %371, %400, %429, %458, %487 in 0 : vector<1x128xf32>, vector<1x128xf32>, vector<1x128xf32>, vector<1x128xf32>, vector<1x128xf32>, vector<1x128xf32>, vector<1x128xf32>, vector<1x128xf32> -> vector<8x128xf32>
    %cst_94 = arith.constant 0.000000e+00 : f32
    %490 = vector.broadcast %cst_94 : f32 to vector<8x128xf32>
    %491 = arith.maximumf %489, %490 : vector<8x128xf32>
    %c0_95 = arith.constant 0 : index
    %c0_96 = arith.constant 0 : index
    %492 = vector.load %arg11[%c0_95, %c0_96] : memref<128x128xf32, #tpu.memory_space<vmem>>, vector<128x128xf32>
    %cst_97 = arith.constant dense<0.000000e+00> : vector<8x128xf32>
    %493 = tpu.matmul %491, %492, %cst_97 {dimension_numbers = #tpu.dot_dimension_numbers<[1], [0], [0], [1], [0, 0, 1, 1], [], []>} : vector<8x128xf32>, vector<128x128xf32>, vector<8x128xf32> -> vector<8x128xf32>
    %c0_98 = arith.constant 0 : index
    %c0_99 = arith.constant 0 : index
    %494 = vector.load %arg12[%c0_98, %c0_99] : memref<1x128xf32, #tpu.memory_space<vmem>>, vector<1x128xf32>
    %495 = vector.broadcast %494 : vector<1x128xf32> to vector<8x128xf32>
    %496 = arith.addf %493, %495 : vector<8x128xf32>
    %c0_100 = arith.constant 0 : index
    %c0_101 = arith.constant 0 : index
    %497 = vector.load %arg14[%c0_100, %c0_101] : memref<8x128xf32, #tpu.memory_space<vmem>>, vector<8x128xf32>
    tpu.vector_store %arg14[%c0_100, %c0_101], %496 {strides = array<i32>} : memref<8x128xf32, #tpu.memory_space<vmem>>, vector<8x128xf32>,
    return
  }
}

</mosaic_0001>

<bundles_post_ra>
// kernel: tpu_custom_call.1
= control target key start
LH: loop header
LB: loop body
LE: loop exit
PB: predicated region body
PF: predicated region fallthrough
CT: control target
= control target key end

     0   :  { %21 = vsyncpa [#allocation3], 0  ;;  %s7111_s0 = inlined_call_operand.hbm [shape: f32[8,32], index: 0, kind: input, shape index: {}]   ;;  %s7112_s1 = inlined_call_operand.hbm [shape: f32[32,128], index: 1, kind: input, shape index: {}]   ;;  %s7113_s2 = inlined_call_operand.vmem [shape: f32[1,128], index: 2, kind: input, shape index: {}]   ;;  %s7114_s3 = inlined_call_operand.hbm [shape: f32[128,384], index: 3, kind: input, shape index: {}]   ;;  %s7115_s4 = inlined_call_operand.hbm [shape: f32[128,384], index: 4, kind: input, shape index: {}]   ;;  %s7116_s5 = inlined_call_operand.vmem [shape: f32[1,384], index: 5, kind: input, shape index: {}]   ;;  %s7117_s6 = inlined_call_operand.vmem [shape: f32[1,128], index: 6, kind: input, shape index: {}]   ;;  %s7118_s7 = inlined_call_operand.hbm [shape: f32[128,384], index: 7, kind: input, shape index: {}]   ;;  %s7119_s8 = inlined_call_operand.hbm [shape: f32[128,384], index: 8, kind: input, shape index: {}]   ;;  %s7120_s9 = inlined_call_operand.vmem [shape: f32[1,384], index: 9, kind: input, shape index: {}]   ;;  %s7121_s10 = inlined_call_operand.vmem [shape: f32[1,128], index: 10, kind: input, shape index: {}]   ;;  %s7122_s11 = inlined_call_operand.hbm [shape: f32[128,128], index: 11, kind: input, shape index: {}]   ;;  %s7123_s12 = inlined_call_operand.vmem [shape: f32[1,128], index: 12, kind: input, shape index: {}]   ;;  %s7124_s13 = inlined_call_operand.vmem [shape: f32[2,128], index: 13, kind: input, shape index: {}]   ;;  %s7125_s14 = inlined_call_operand.hbm [shape: f32[8,128], index: 14, kind: output, shape index: {0}]   ;;  %s7126_s15 = inlined_call_operand.hbm [shape: f32[2,128], index: 15, kind: output, shape index: {1}]  }
   0x1   :  { %22 = vsyncpa [#allocation6], 0 }
   0x2   :  { %23 = vsyncpa [#allocation9], 0 }
   0x3   :  { %24 = vsyncpa [#allocation12], 0 }
   0x4   :  { %25 = vsyncpa [#allocation4], 0 }
   0x5   :  { %26 = vsyncpa [#allocation16], 0  ;;  %s5196_s18 = smov [#allocation5]  }
   0x6   :  { %s42_s19 = sshll.u32 %s5196_s18, 4  ;;  %s43_s19 = int_to_ptr.vmem [resolvable:$true] %s42_s19 }
   0x7   :  { %s5012_s20 = scalar_lea.vmem %s43_s19, 512  ;;  %p5017_p1 = scmp.lt.s32.totalorder %s43_s19, %s43_s19 }
   0x8   :  { %p5013_p0 = scmp.ne.s32.totalorder %s43_s19, %s5012_s20  ;;  %p5018_p2 = scmp.lt.s32.totalorder %s5012_s20, %s5012_s20 }
   0xa   :  { %p5019_p3 = por %p5018_p2, %p5017_p1 }
   0xc   :  { %p5020_p4 = pnand %p5019_p3, %p5013_p0 }
   0xe   :  { %5023 = shalt.err (!%p5020_p4)
}
   0xf   :  { %s5197_s21 = smov 128   ;;  %s5198_s22 = smov 8  }
  0x10   :  { %48 = dma.hbm_to_vmem [thread:$0]  %s7112_s1, 512, %s43_s19, [#allocation6], %s5197_s21, %s5197_s21, %s5198_s22  }
  0x11   :  { %s5199_s25 = smov [#allocation8]   ;;  %s5200_s27 = smov [#allocation11]  }
  0x12   :  { %s68_s26 = sshll.u32 %s5199_s25, 4  ;;  %s96_s28 = sshll.u32 %s5200_s27, 4  ;;  %s69_s26 = int_to_ptr.vmem [resolvable:$true] %s68_s26  ;;  %s97_s28 = int_to_ptr.vmem [resolvable:$true] %s96_s28 }
  0x13   :  { %s5032_s29 = scalar_lea.vmem %s69_s26, 6144  ;;  %p5037_p6 = scmp.lt.s32.totalorder %s69_s26, %s69_s26 }
  0x14   :  { %p5033_p5 = scmp.ne.s32.totalorder %s69_s26, %s5032_s29  ;;  %p5038_p7 = scmp.lt.s32.totalorder %s5032_s29, %s5032_s29 }
  0x16   :  { %p5039_p8 = por %p5038_p7, %p5037_p6 }
  0x18   :  { %p5040_p9 = pnand %p5039_p8, %p5033_p5 }
  0x1a   :  { %5043 = shalt.err (!%p5040_p9)
}
  0x1b   :  { %s5201_s30 = smov 384   ;;  %s5202_s16 = smov 24  }
  0x1c   :  { %74 = dma.hbm_to_vmem [thread:$0]  %s7115_s4, 6144, %s69_s26, [#allocation9], %s5201_s30, %s5201_s30, %s5202_s16  }
  0x1d   :  { %s5052_s1 = scalar_lea.vmem %s97_s28, 6144  ;;  %p5057_p11 = scmp.lt.s32.totalorder %s97_s28, %s97_s28 }
  0x1e   :  { %p5053_p10 = scmp.ne.s32.totalorder %s97_s28, %s5052_s1  ;;  %p5058_p12 = scmp.lt.s32.totalorder %s5052_s1, %s5052_s1 }
  0x20   :  { %p5059_p13 = por %p5058_p12, %p5057_p11 }
  0x22   :  { %p5060_p0 = pnand %p5059_p13, %p5053_p10 }
  0x24   :  { %5063 = shalt.err (!%p5060_p0)
}
  0x25   :  { %102 = dma.hbm_to_vmem [thread:$0]  %s7119_s8, 6144, %s97_s28, [#allocation12], %s5201_s30, %s5201_s30, %s5202_s16  }
  0x26   :  { %s5203_s23 = smov [#allocation2]   ;;  %s5204_s25 = smov [#allocation7]  }
  0x27   :  { %s33_s24 = sshll.u32 %s5203_s23, 4  ;;  %s56_s4 = sshll.u32 %s5204_s25, 4  ;;  %s34_s24 = int_to_ptr.vmem [resolvable:$true] %s33_s24  ;;  %s57_s4 = int_to_ptr.vmem [resolvable:$true] %s56_s4 }
  0x28   :  { %s5072_s26 = scalar_lea.vmem %s34_s24, 128  ;;  %p5077_p2 = scmp.lt.s32.totalorder %s34_s24, %s34_s24 }
  0x29   :  { %p5073_p1 = scmp.ne.s32.totalorder %s34_s24, %s5072_s26  ;;  %p5078_p3 = scmp.lt.s32.totalorder %s5072_s26, %s5072_s26 }
  0x2b   :  { %p5079_p4 = por %p5078_p3, %p5077_p2 }
  0x2d   :  { %p5080_p5 = pnand %p5079_p4, %p5073_p1 }
  0x2f   :  { %5083 = shalt.err (!%p5080_p5)
}
  0x30   :  { %36 = dma.hbm_to_vmem [thread:$0]  %s7111_s0, 128, %s34_s24, [#allocation3]  }
  0x31   :  { %s5092_s17 = scalar_lea.vmem %s57_s4, 6144  ;;  %p5097_p7 = scmp.lt.s32.totalorder %s57_s4, %s57_s4 }
  0x32   :  { %p5093_p6 = scmp.ne.s32.totalorder %s57_s4, %s5092_s17  ;;  %p5098_p8 = scmp.lt.s32.totalorder %s5092_s17, %s5092_s17 }
  0x34   :  { %p5099_p9 = por %p5098_p8, %p5097_p7 }
  0x36   :  { %p5100_p10 = pnand %p5099_p9, %p5093_p6 }
  0x38   :  { %5103 = shalt.err (!%p5100_p10)
}
  0x39   :  { %62 = dma.hbm_to_vmem [thread:$0]  %s7114_s3, 6144, %s57_s4, [#allocation6], %s5201_s30, %s5201_s30, %s5202_s16  }
  0x3a   :  { %s5205_s18 = smov [#allocation10]   ;;  %s5206_s19 = smov [#allocation13]  }
  0x3b   :  { %s84_s1 = sshll.u32 %s5205_s18, 4  ;;  %s112_s0 = sshll.u32 %s5206_s19, 4  ;;  %s85_s1 = int_to_ptr.vmem [resolvable:$true] %s84_s1  ;;  %s113_s0 = int_to_ptr.vmem [resolvable:$true] %s112_s0 }
  0x3c   :  { %s5112_s20 = scalar_lea.vmem %s85_s1, 6144  ;;  %p5117_p12 = scmp.lt.s32.totalorder %s85_s1, %s85_s1 }
  0x3d   :  { %p5113_p11 = scmp.ne.s32.totalorder %s85_s1, %s5112_s20  ;;  %p5118_p13 = scmp.lt.s32.totalorder %s5112_s20, %s5112_s20 }
  0x3f   :  { %p5119_p0 = por %p5118_p13, %p5117_p12 }
  0x41   :  { %p5120_p1 = pnand %p5119_p0, %p5113_p11 }
  0x43   :  { %5123 = shalt.err (!%p5120_p1)
}
  0x44   :  { %90 = dma.hbm_to_vmem [thread:$0]  %s7118_s7, 6144, %s85_s1, [#allocation9], %s5201_s30, %s5201_s30, %s5202_s16  }
  0x45   :  { %s5132_s3 = scalar_lea.vmem %s113_s0, 2048  ;;  %p5137_p3 = scmp.lt.s32.totalorder %s113_s0, %s113_s0 }
  0x46   :  { %p5133_p2 = scmp.ne.s32.totalorder %s113_s0, %s5132_s3  ;;  %p5138_p4 = scmp.lt.s32.totalorder %s5132_s3, %s5132_s3 }
  0x48   :  { %p5139_p5 = por %p5138_p4, %p5137_p3 }
  0x4a   :  { %p5140_p6 = pnand %p5139_p5, %p5133_p2 }
  0x4c   :  { %5143 = shalt.err (!%p5140_p6)
}
  0x4d   :  { %118 = dma.hbm_to_vmem [thread:$0]  %s7122_s11, 2048, %s113_s0, [#allocation12], %s5197_s21, %s5197_s21, %s5198_s22  }
  0x4e   :  { %5184 = dma.done.wait [#allocation3], 128  }
  0x4f   :  { %5185 = vsyncadd [#allocation3], 4294967168 }
  0x50   :  { %5186 = dma.done.wait [#allocation6], 6656  }
  0x51   :  { %5187 = vsyncadd [#allocation6], 4294960640 }
  0x52   :  { %5188 = dma.done.wait [#allocation9], 12288  }
  0x53   :  { %5189 = vsyncadd [#allocation9], 4294955008 }
  0x54   :  { %5190 = dma.done.wait [#allocation12], 8192  }
  0x55   :  { %5191 = vsyncadd [#allocation12], 4294959104  ;;  %v7127_v0 = vmov 0.0   ;;  %vm5208_vm0 = vmmov 0   ;;  %v148_v1 = vld [vmem:[#allocation5 + $0x18] sm:$0xff]  ;;  %v147_v2 = vld [vmem:[#allocation5 + $0x10] sm:$0xff] }
  0x56   :  { %4055 = vmatprep.subr.mxu0 %v7127_v0  ;;  %4063 = vmatprep.mubr.msk.f32.mxu0 %vm5208_vm0, %v7127_v0  ;;  %v276_v3 = vld [vmem:[#allocation7 + $0x170] sm:$0xff]  ;;  %v146_v4 = vld [vmem:[#allocation5 + $0x8] sm:$0xff]  ;;  %v273_v6 = vld [vmem:[#allocation7 + $0x158] sm:$0xff]  ;;  %vm156_vm1 = vcmask 261120   ;;  %vm1887_vm2 = vcmask 1040384   ;;  %vm1889_vm3 = vcmask 1041408  }
  0x57   :  { %359 = vmatprep.mubr.f32.mxu1 %v7127_v0  ;;  %4056 = vmatpush3.msra.mxu0 %v148_v1  ;;  %v275_v5 = vld [vmem:[#allocation7 + $0x168] sm:$0xff]  ;;  %v272_v7 = vld [vmem:[#allocation7 + $0x150] sm:$0xff]  ;;  %v270_v8 = vld [vmem:[#allocation7 + $0x140] sm:$0xff]  ;;  %vm1891_vm4 = vcmask 1042432   ;;  %vm1893_vm5 = vcmask 1043456   ;;  %vm1895_vm6 = vcmask 1044480  }
  0x58   :  { %4057 = vmatprep.subr.mxu0 %v7127_v0  ;;  %295 = vmatprep.subr.mxu1 %v276_v3  ;;  %v145_v9 = vld [vmem:[#allocation5] sm:$0xff]  ;;  %v269_v10 = vld [vmem:[#allocation7 + $0x138] sm:$0xff]  ;;  %v267_v13 = vld [vmem:[#allocation7 + $0x128] sm:$0xff]  ;;  %vm1897_vm7 = vcmask 1045504   ;;  %vm1899_vm8 = vcmask 1046528  }
  0x59   :  { %4058 = vmatpush3.msra.mxu0 %v147_v2  ;;  %296 = vmatpush1.msra.mxu1 %v275_v5  ;;  %v144_v11 = vld [vmem:[#allocation2] sm:$0xff]  ;;  %v266_v14 = vld [vmem:[#allocation7 + $0x120] sm:$0xff]  ;;  %v264_v16 = vld [vmem:[#allocation7 + $0x110] sm:$0xff] }
  0x5a   :  { %4059 = vmatprep.subr.mxu0 %v7127_v0  ;;  %297 = vmatprep.subr.mxu1 %v273_v6  ;;  %v277_v12 = vld [vmem:[#allocation7 + $0x178] sm:$0xff]  ;;  %v274_v15 = vld [vmem:[#allocation7 + $0x160] sm:$0xff]  ;;  %v263_v17 = vld [vmem:[#allocation7 + $0x108] sm:$0xff] }
  0x5b   :  { %4060 = vmatpush3.msra.mxu0 %v146_v4  ;;  %298 = vmatpush1.msra.mxu1 %v272_v7  ;;  %v271_v18 = vld [vmem:[#allocation7 + $0x148] sm:$0xff]  ;;  %v261_v19 = vld [vmem:[#allocation7 + $0xf8] sm:$0xff]  ;;  %v260_v20 = vld [vmem:[#allocation7 + $0xf0] sm:$0xff] }
  0x5c   :  { %4061 = vmatprep.subr.mxu0 %v7127_v0  ;;  %299 = vmatprep.subr.mxu1 %v270_v8  ;;  %v268_v21 = vld [vmem:[#allocation7 + $0x130] sm:$0xff]  ;;  %v258_v22 = vld [vmem:[#allocation7 + $0xe0] sm:$0xff]  ;;  %v257_v23 = vld [vmem:[#allocation7 + $0xd8] sm:$0xff] }
  0x5d   :  { %4062 = vmatpush3.msra.mxu0 %v145_v9  ;;  %300 = vmatpush1.msra.mxu1 %v269_v10  ;;  %v265_v24 = vld [vmem:[#allocation7 + $0x118] sm:$0xff]  ;;  %v255_v25 = vld [vmem:[#allocation7 + $0xc8] sm:$0xff]  ;;  %v254_v26 = vld [vmem:[#allocation7 + $0xc0] sm:$0xff] }
  0x5e   :  { %4064 = vmatmul.mubr.msk.f32.vlgmr.msra.gmra.mxu0 %vm156_vm1, %v144_v11  ;;  %4066 = vmatprep.subr.mxu0 %v7127_v0  ;;  %v262_v27 = vld [vmem:[#allocation7 + $0x100] sm:$0xff]  ;;  %v252_v28 = vld [vmem:[#allocation7 + $0xb0] sm:$0xff]  ;;  %v251_v29 = vld [vmem:[#allocation7 + $0xa8] sm:$0xff] }
  0x5f   :  { %4067 = vmatpush3.msra.mxu0 %v277_v12  ;;  %301 = vmatprep.subr.mxu1 %v267_v13  ;;  %v259_v30 = vld [vmem:[#allocation7 + $0xe8] sm:$0xff]  ;;  %v249_v31 = vld [vmem:[#allocation7 + $0x98] sm:$0xff]  ;;  %v248_v32 = vld [vmem:[#allocation7 + $0x90] sm:$0xff] }
  0x60   :  { %4068 = vmatprep.subr.mxu0 %v7127_v0  ;;  %302 = vmatpush1.msra.mxu1 %v266_v14  ;;  %v256_v33 = vld [vmem:[#allocation7 + $0xd0] sm:$0xff]  ;;  %v246_v34 = vld [vmem:[#allocation7 + $0x80] sm:$0xff]  ;;  %v245_v35 = vld [vmem:[#allocation7 + $0x78] sm:$0xff] }
  0x61   :  { %4069 = vmatpush3.msra.mxu0 %v274_v15  ;;  %303 = vmatprep.subr.mxu1 %v264_v16  ;;  %v253_v36 = vld [vmem:[#allocation7 + $0xb8] sm:$0xff]  ;;  %v243_v37 = vld [vmem:[#allocation7 + $0x68] sm:$0xff]  ;;  %v242_v38 = vld [vmem:[#allocation7 + $0x60] sm:$0xff] }
  0x62   :  { %4070 = vmatprep.subr.mxu0 %v7127_v0  ;;  %304 = vmatpush1.msra.mxu1 %v263_v17  ;;  %v250_v39 = vld [vmem:[#allocation7 + $0xa0] sm:$0xff]  ;;  %v240_v40 = vld [vmem:[#allocation7 + $0x50] sm:$0xff]  ;;  %v239_v41 = vld [vmem:[#allocation7 + $0x48] sm:$0xff] }
  0x63   :  { %4071 = vmatpush3.msra.mxu0 %v271_v18  ;;  %305 = vmatprep.subr.mxu1 %v261_v19  ;;  %v247_v42 = vld [vmem:[#allocation7 + $0x88] sm:$0xff]  ;;  %v237_v43 = vld [vmem:[#allocation7 + $0x38] sm:$0xff]  ;;  %v236_v44 = vld [vmem:[#allocation7 + $0x30] sm:$0xff] }
  0x64   :  { %4072 = vmatprep.subr.mxu0 %v7127_v0  ;;  %306 = vmatpush1.msra.mxu1 %v260_v20  ;;  %v244_v45 = vld [vmem:[#allocation7 + $0x70] sm:$0xff]  ;;  %v234_v46 = vld [vmem:[#allocation7 + $0x20] sm:$0xff]  ;;  %v233_v47 = vld [vmem:[#allocation7 + $0x18] sm:$0xff] }
  0x65   :  { %4073 = vmatpush3.msra.mxu0 %v268_v21  ;;  %307 = vmatprep.subr.mxu1 %v258_v22  ;;  %v241_v48 = vld [vmem:[#allocation7 + $0x58] sm:$0xff]  ;;  %v238_v49 = vld [vmem:[#allocation7 + $0x40] sm:$0xff]  ;;  %v231_v50 = vld [vmem:[#allocation7 + $0x8] sm:$0xff] }
  0x66   :  { %4074 = vmatprep.subr.mxu0 %v7127_v0  ;;  %308 = vmatpush1.msra.mxu1 %v257_v23  ;;  %v235_v51 = vld [vmem:[#allocation7 + $0x28] sm:$0xff]  ;;  %v230_v52 = vld [vmem:[#allocation7] sm:$0xff]  ;;  %v232_v53 = vld [vmem:[#allocation7 + $0x10] sm:$0xff] }
  0x67   :  { %4075 = vmatpush3.msra.mxu0 %v265_v24  ;;  %309 = vmatprep.subr.mxu1 %v255_v25  ;;  %v5355_v54 = vld [vmem:[#allocation8 + $0x170] sm:$0xff]  ;;  %v3692_v55 = vld [vmem:[%s7113_s2] ss:$0 sm:$0xff]  ;;  %v5362_v58 = vld [vmem:[#allocation8 + $0x168] sm:$0xff] }
  0x68   :  { %4076 = vmatprep.subr.mxu0 %v7127_v0  ;;  %310 = vmatpush1.msra.mxu1 %v254_v26  ;;  %7188 = vst [vmem:[#allocation23_spill] sm:$0xff] %v5355_v54  ;;  %v5364_v60 = vld [vmem:[#allocation8 + $0x158] sm:$0xff]  ;;  %v5368_v62 = vld [vmem:[#allocation8 + $0x150] sm:$0xff]  ;;  %v5371_v63 = vld [vmem:[#allocation8 + $0x140] sm:$0xff] }
  0x69   :  { %4077 = vmatpush3.msra.mxu0 %v262_v27  ;;  %311 = vmatprep.subr.mxu1 %v252_v28  ;;  %v5366_v61 = vld [vmem:[#allocation8 + $0x178] sm:$0xff]  ;;  %v5374_v1 = vld [vmem:[#allocation8 + $0x160] sm:$0xff]  ;;  %v5381_v3 = vld [vmem:[#allocation8 + $0x128] sm:$0xff] }
  0x6a   :  { %4078 = vmatprep.subr.mxu0 %v7127_v0  ;;  %312 = vmatpush1.msra.mxu1 %v251_v29  ;;  %v5377_v2 = vld [vmem:[#allocation8 + $0x138] sm:$0xff]  ;;  %v5384_v4 = vld [vmem:[#allocation8 + $0x148] sm:$0xff]  ;;  %v5387_v5 = vld [vmem:[#allocation8 + $0x120] sm:$0xff] }
  0x6b   :  { %4079 = vmatpush3.msra.mxu0 %v259_v30  ;;  %313 = vmatprep.subr.mxu1 %v249_v31  ;;  %v5391_v6 = vld [vmem:[#allocation8 + $0x110] sm:$0xff]  ;;  %v5397_v8 = vld [vmem:[#allocation8 + $0x108] sm:$0xff]  ;;  %v5401_v9 = vld [vmem:[#allocation8 + $0xf8] sm:$0xff] }
  0x6c   :  { %4080 = vmatprep.subr.mxu0 %v7127_v0  ;;  %314 = vmatpush1.msra.mxu1 %v248_v32  ;;  %v5394_v7 = vld [vmem:[#allocation8 + $0x130] sm:$0xff]  ;;  %v5404_v10 = vld [vmem:[#allocation8 + $0x118] sm:$0xff]  ;;  %v5411_v12 = vld [vmem:[#allocation8 + $0xe0] sm:$0xff] }
  0x6d   :  { %4081 = vmatpush3.msra.mxu0 %v256_v33  ;;  %315 = vmatprep.subr.mxu1 %v246_v34  ;;  %v5407_v11 = vld [vmem:[#allocation8 + $0xf0] sm:$0xff]  ;;  %v5414_v13 = vld [vmem:[#allocation8 + $0x100] sm:$0xff]  ;;  %v5417_v14 = vld [vmem:[#allocation8 + $0xd8] sm:$0xff] }
  0x6e   :  { %4082 = vmatprep.subr.mxu0 %v7127_v0  ;;  %316 = vmatpush1.msra.mxu1 %v245_v35  ;;  %v5421_v15 = vld [vmem:[#allocation8 + $0xc8] sm:$0xff]  ;;  %v5427_v17 = vld [vmem:[#allocation8 + $0xc0] sm:$0xff]  ;;  %v5431_v18 = vld [vmem:[#allocation8 + $0xb0] sm:$0xff] }
  0x6f   :  { %4083 = vmatpush3.msra.mxu0 %v253_v36  ;;  %317 = vmatprep.subr.mxu1 %v243_v37  ;;  %v5424_v16 = vld [vmem:[#allocation8 + $0xe8] sm:$0xff]  ;;  %v5434_v19 = vld [vmem:[#allocation8 + $0xd0] sm:$0xff]  ;;  %v5441_v21 = vld [vmem:[#allocation8 + $0x98] sm:$0xff] }
  0x70   :  { %4084 = vmatprep.subr.mxu0 %v7127_v0  ;;  %318 = vmatpush1.msra.mxu1 %v242_v38  ;;  %v5437_v20 = vld [vmem:[#allocation8 + $0xa8] sm:$0xff]  ;;  %v5444_v22 = vld [vmem:[#allocation8 + $0xb8] sm:$0xff]  ;;  %v5447_v23 = vld [vmem:[#allocation8 + $0x90] sm:$0xff] }
  0x71   :  { %4085 = vmatpush3.msra.mxu0 %v250_v39  ;;  %319 = vmatprep.subr.mxu1 %v240_v40  ;;  %v5451_v24 = vld [vmem:[#allocation8 + $0x80] sm:$0xff]  ;;  %v5457_v26 = vld [vmem:[#allocation8 + $0x78] sm:$0xff]  ;;  %v5461_v27 = vld [vmem:[#allocation8 + $0x68] sm:$0xff] }
  0x72   :  { %4086 = vmatprep.subr.mxu0 %v7127_v0  ;;  %320 = vmatpush1.msra.mxu1 %v239_v41  ;;  %v5454_v25 = vld [vmem:[#allocation8 + $0xa0] sm:$0xff]  ;;  %v5464_v28 = vld [vmem:[#allocation8 + $0x88] sm:$0xff]  ;;  %v5471_v30 = vld [vmem:[#allocation8 + $0x50] sm:$0xff] }
  0x73   :  { %4087 = vmatpush3.msra.mxu0 %v247_v42  ;;  %321 = vmatprep.subr.mxu1 %v237_v43  ;;  %v5467_v29 = vld [vmem:[#allocation8 + $0x60] sm:$0xff]  ;;  %v5474_v31 = vld [vmem:[#allocation8 + $0x70] sm:$0xff]  ;;  %v5477_v32 = vld [vmem:[#allocation8 + $0x48] sm:$0xff] }
  0x74   :  { %4088 = vmatprep.subr.mxu0 %v7127_v0  ;;  %322 = vmatpush1.msra.mxu1 %v236_v44  ;;  %v5481_v33 = vld [vmem:[#allocation8 + $0x38] sm:$0xff]  ;;  %v5487_v35 = vld [vmem:[#allocation8 + $0x30] sm:$0xff]  ;;  %v5491_v36 = vld [vmem:[#allocation8 + $0x20] sm:$0xff] }
  0x75   :  { %4089 = vmatpush3.msra.mxu0 %v244_v45  ;;  %323 = vmatprep.subr.mxu1 %v234_v46  ;;  %v5484_v34 = vld [vmem:[#allocation8 + $0x58] sm:$0xff]  ;;  %7189 = vst [vmem:[#allocation24_spill] sm:$0xff] %v5491_v36  ;;  %v5494_v37 = vld [vmem:[#allocation8 + $0x40] sm:$0xff]  ;;  %v5501_v39 = vld [vmem:[#allocation8 + $0x8] sm:$0xff]  ;;  %v280_v46 = vlaneseq }
  0x76   :  { %4090 = vmatprep.subr.mxu0 %v7127_v0  ;;  %324 = vmatpush1.msra.mxu1 %v233_v47  ;;  %7190 = vst [vmem:[#allocation25_spill] sm:$0xff] %v5494_v37  ;;  %v5497_v38 = vld [vmem:[#allocation8 + $0x18] sm:$0xff]  ;;  %7192 = vst [vmem:[#allocation27_spill] sm:$0xff] %v5501_v39  ;;  %v5504_v40 = vld [vmem:[#allocation8 + $0x28] sm:$0xff] }
  0x77   :  { %4091 = vmatpush3.msra.mxu0 %v241_v48  ;;  %4098 = vmatprep.mubr.msk.f32.mxu0 %vm5208_vm0, %v7127_v0  ;;  %7191 = vst [vmem:[#allocation26_spill] sm:$0xff] %v5497_v38  ;;  %7193 = vst [vmem:[#allocation28_spill] sm:$0xff] %v5504_v40  ;;  %v5507_v41 = vld [vmem:[#allocation8] sm:$0xff]  ;;  %v5514_v42 = vld [vmem:[%s7124_s13] sm:$0x1]  ;;  %v5597_v47 = vshrl.u32 %v280_v46, 7 }
  0x78   :  { %4092 = vmatprep.subr.mxu0 %v7127_v0  ;;  %325 = vmatprep.subr.mxu1 %v231_v50  ;;  %7194 = vst [vmem:[#allocation29_spill] sm:$0xff] %v5507_v41  ;;  %v5517_v43 = vld [vmem:[#allocation8 + $0x10] sm:$0xff] }
  0x79   :  { %4093 = vmatpush3.msra.mxu0 %v238_v49  ;;  %326 = vmatpush1.msra.mxu1 %v230_v52  ;;  %7195 = vst [vmem:[#allocation30_spill] sm:$0xff] %v5517_v43  ;;  %7196 = vst [vmem:[#allocation31_spill] sm:$0xff] %v5597_v47  ;;  %v7133_v48 = vsub.s32 0, %v5597_v47  ;;  %v278_v49 = vld [vmem:[%s7116_s5] sm:$0x7]  ;;  %v7140_v52 = vsub.s32 1, %v5597_v47 }
  0x7a   :  { %4094 = vmatprep.subr.mxu0 %v7127_v0  ;;  %486 = vmatprep.subr.mxu1 %v5355_v54 }
  0x7b   :  { %4095 = vmatpush3.msra.mxu0 %v235_v51  ;;  %v283_v51 = vrot.slane %v278_v49, %v7133_v48 }
  0x7c   :  { %4096 = vmatprep.subr.mxu0 %v7127_v0 }
  0x7d   :  { %4097 = vmatpush3.msra.mxu0 %v232_v53 }
  0x7e   :  { %4101 = vmatprep.subr.mxu0 %v7127_v0 }
 0x11e   :  { %v226_v56 = vpop.f32.mrf.mxu0 }
 0x11f   :  { %v227_v57 = vadd.f32 %v3692_v55, %v226_v56 }
 0x120   :  { %v4065_v59 = vpop.f32.mrf.mxu0 }
 0x121   :  { %360 = vmatmul.mubr.f32.vlgmr.msra.gmra.mxu1 %v227_v57  ;;  %4099 = vmatmul.mubr.f32.vlgmr.msra.gmra.mxu0 %v227_v57  ;;  %v287_v57 = vrot.slane %v278_v49, %v7140_v52 }
 0x122   :  { %487 = vmatpush1.msra.mxu1 %v5362_v58  ;;  %550 = vmatprep.mubr.f32.mxu1 %v7127_v0 }
 0x123   :  { %488 = vmatprep.subr.mxu1 %v5364_v60  ;;  %4102 = vmatpush3.msra.mxu0 %v5366_v61 }
 0x124   :  { %489 = vmatpush1.msra.mxu1 %v5368_v62  ;;  %4103 = vmatprep.subr.mxu0 %v7127_v0 }
 0x125   :  { %490 = vmatprep.subr.mxu1 %v5371_v63  ;;  %4104 = vmatpush3.msra.mxu0 %v5374_v1 }
 0x126   :  { %491 = vmatpush1.msra.mxu1 %v5377_v2  ;;  %4105 = vmatprep.subr.mxu0 %v7127_v0 }
 0x127   :  { %492 = vmatprep.subr.mxu1 %v5381_v3  ;;  %4106 = vmatpush3.msra.mxu0 %v5384_v4 }
 0x128   :  { %493 = vmatpush1.msra.mxu1 %v5387_v5  ;;  %4107 = vmatprep.subr.mxu0 %v7127_v0 }
 0x129   :  { %494 = vmatprep.subr.mxu1 %v5391_v6  ;;  %4108 = vmatpush3.msra.mxu0 %v5394_v7 }
 0x12a   :  { %495 = vmatpush1.msra.mxu1 %v5397_v8  ;;  %4109 = vmatprep.subr.mxu0 %v7127_v0 }
 0x12b   :  { %496 = vmatprep.subr.mxu1 %v5401_v9  ;;  %4110 = vmatpush3.msra.mxu0 %v5404_v10 }
 0x12c   :  { %497 = vmatpush1.msra.mxu1 %v5407_v11  ;;  %4111 = vmatprep.subr.mxu0 %v7127_v0 }
 0x12d   :  { %498 = vmatprep.subr.mxu1 %v5411_v12  ;;  %4112 = vmatpush3.msra.mxu0 %v5414_v13 }
 0x12e   :  { %499 = vmatpush1.msra.mxu1 %v5417_v14  ;;  %4113 = vmatprep.subr.mxu0 %v7127_v0 }
 0x12f   :  { %500 = vmatprep.subr.mxu1 %v5421_v15  ;;  %4114 = vmatpush3.msra.mxu0 %v5424_v16 }
 0x130   :  { %501 = vmatpush1.msra.mxu1 %v5427_v17  ;;  %4115 = vmatprep.subr.mxu0 %v7127_v0 }
 0x131   :  { %502 = vmatprep.subr.mxu1 %v5431_v18  ;;  %4116 = vmatpush3.msra.mxu0 %v5434_v19 }
 0x132   :  { %503 = vmatpush1.msra.mxu1 %v5437_v20  ;;  %4117 = vmatprep.subr.mxu0 %v7127_v0 }
 0x133   :  { %504 = vmatprep.subr.mxu1 %v5441_v21  ;;  %4118 = vmatpush3.msra.mxu0 %v5444_v22 }
 0x134   :  { %505 = vmatpush1.msra.mxu1 %v5447_v23  ;;  %4119 = vmatprep.subr.mxu0 %v7127_v0 }
 0x135   :  { %506 = vmatprep.subr.mxu1 %v5451_v24  ;;  %4120 = vmatpush3.msra.mxu0 %v5454_v25 }
 0x136   :  { %507 = vmatpush1.msra.mxu1 %v5457_v26  ;;  %4121 = vmatprep.subr.mxu0 %v7127_v0 }
 0x137   :  { %508 = vmatprep.subr.mxu1 %v5461_v27  ;;  %4122 = vmatpush3.msra.mxu0 %v5464_v28 }
 0x138   :  { %509 = vmatpush1.msra.mxu1 %v5467_v29  ;;  %4123 = vmatprep.subr.mxu0 %v7127_v0 }
 0x139   :  { %510 = vmatprep.subr.mxu1 %v5471_v30  ;;  %4124 = vmatpush3.msra.mxu0 %v5474_v31 }
 0x13a   :  { %511 = vmatpush1.msra.mxu1 %v5477_v32  ;;  %4125 = vmatprep.subr.mxu0 %v7127_v0 }
 0x13b   :  { %512 = vmatprep.subr.mxu1 %v5481_v33  ;;  %4126 = vmatpush3.msra.mxu0 %v5484_v34 }
 0x13c   :  { %513 = vmatpush1.msra.mxu1 %v5487_v35  ;;  %4127 = vmatprep.subr.mxu0 %v7127_v0 }
 0x13d   :  { %514 = vmatprep.subr.mxu1 %v5491_v36  ;;  %4128 = vmatpush3.msra.mxu0 %v5494_v37 }
 0x13e   :  { %515 = vmatpush1.msra.mxu1 %v5497_v38  ;;  %4129 = vmatprep.subr.mxu0 %v7127_v0 }
 0x13f   :  { %516 = vmatprep.subr.mxu1 %v5501_v39  ;;  %4130 = vmatpush3.msra.mxu0 %v5504_v40 }
 0x140   :  { %517 = vmatpush1.msra.mxu1 %v5507_v41  ;;  %4131 = vmatprep.subr.mxu0 %v7127_v0 }
 0x141   :  { %551 = vmatmul.mubr.f32.vlgmr.msra.gmra.mxu1 %v5514_v42  ;;  %4132 = vmatpush3.msra.mxu0 %v5517_v43 }
 0x142   :  { %4133 = vmatprep.mubr.msk.f32.mxu0 %vm5208_vm0, %v7127_v0  ;;  %649 = vmatprep.subr.mxu1 %v5355_v54 }
 0x143   :  { %4134 = vmatmul.mubr.f32.vlgmr.msra.gmra.mxu0 %v5514_v42  ;;  %4136 = vmatprep.subr.mxu0 %v7127_v0 }
 0x144   :  { %650 = vmatpush1.msra.mxu1 %v5362_v58  ;;  %4137 = vmatpush3.msra.mxu0 %v5366_v61 }
 0x145   :  { %651 = vmatprep.subr.mxu1 %v5364_v60  ;;  %4138 = vmatprep.subr.mxu0 %v7127_v0 }
 0x146   :  { %652 = vmatpush1.msra.mxu1 %v5368_v62  ;;  %4139 = vmatpush3.msra.mxu0 %v5374_v1 }
 0x147   :  { %653 = vmatprep.subr.mxu1 %v5371_v63  ;;  %4140 = vmatprep.subr.mxu0 %v7127_v0 }
 0x148   :  { %654 = vmatpush1.msra.mxu1 %v5377_v2  ;;  %4141 = vmatpush3.msra.mxu0 %v5384_v4 }
 0x149   :  { %655 = vmatprep.subr.mxu1 %v5381_v3  ;;  %4142 = vmatprep.subr.mxu0 %v7127_v0 }
 0x14a   :  { %656 = vmatpush1.msra.mxu1 %v5387_v5  ;;  %4143 = vmatpush3.msra.mxu0 %v5394_v7 }
 0x14b   :  { %657 = vmatprep.subr.mxu1 %v5391_v6  ;;  %4144 = vmatprep.subr.mxu0 %v7127_v0 }
 0x14c   :  { %658 = vmatpush1.msra.mxu1 %v5397_v8  ;;  %4145 = vmatpush3.msra.mxu0 %v5404_v10 }
 0x14d   :  { %659 = vmatprep.subr.mxu1 %v5401_v9  ;;  %4146 = vmatprep.subr.mxu0 %v7127_v0 }
 0x14e   :  { %660 = vmatpush1.msra.mxu1 %v5407_v11  ;;  %4147 = vmatpush3.msra.mxu0 %v5414_v13 }
 0x14f   :  { %661 = vmatprep.subr.mxu1 %v5411_v12  ;;  %4148 = vmatprep.subr.mxu0 %v7127_v0 }
 0x150   :  { %662 = vmatpush1.msra.mxu1 %v5417_v14  ;;  %4149 = vmatpush3.msra.mxu0 %v5424_v16 }
 0x151   :  { %663 = vmatprep.subr.mxu1 %v5421_v15  ;;  %4150 = vmatprep.subr.mxu0 %v7127_v0 }
 0x152   :  { %664 = vmatpush1.msra.mxu1 %v5427_v17  ;;  %4151 = vmatpush3.msra.mxu0 %v5434_v19 }
 0x153   :  { %665 = vmatprep.subr.mxu1 %v5431_v18  ;;  %4152 = vmatprep.subr.mxu0 %v7127_v0 }
 0x154   :  { %666 = vmatpush1.msra.mxu1 %v5437_v20  ;;  %4153 = vmatpush3.msra.mxu0 %v5444_v22 }
 0x155   :  { %667 = vmatprep.subr.mxu1 %v5441_v21  ;;  %4154 = vmatprep.subr.mxu0 %v7127_v0 }
 0x156   :  { %668 = vmatpush1.msra.mxu1 %v5447_v23  ;;  %4155 = vmatpush3.msra.mxu0 %v5454_v25 }
 0x157   :  { %669 = vmatprep.subr.mxu1 %v5451_v24  ;;  %4156 = vmatprep.subr.mxu0 %v7127_v0 }
 0x158   :  { %670 = vmatpush1.msra.mxu1 %v5457_v26  ;;  %4157 = vmatpush3.msra.mxu0 %v5464_v28 }
 0x159   :  { %671 = vmatprep.subr.mxu1 %v5461_v27  ;;  %4158 = vmatprep.subr.mxu0 %v7127_v0 }
 0x15a   :  { %672 = vmatpush1.msra.mxu1 %v5467_v29  ;;  %4159 = vmatpush3.msra.mxu0 %v5474_v31 }
 0x15b   :  { %673 = vmatprep.subr.mxu1 %v5471_v30  ;;  %4160 = vmatprep.subr.mxu0 %v7127_v0 }
 0x15c   :  { %674 = vmatpush1.msra.mxu1 %v5477_v32  ;;  %4161 = vmatpush3.msra.mxu0 %v5484_v34 }
 0x15d   :  { %675 = vmatprep.subr.mxu1 %v5481_v33  ;;  %4162 = vmatprep.subr.mxu0 %v7127_v0 }
 0x15e   :  { %676 = vmatpush1.msra.mxu1 %v5487_v35  ;;  %4163 = vmatpush3.msra.mxu0 %v5494_v37 }
 0x15f   :  { %677 = vmatprep.subr.mxu1 %v5491_v36  ;;  %4164 = vmatprep.subr.mxu0 %v7127_v0 }
 0x160   :  { %678 = vmatpush1.msra.mxu1 %v5497_v38  ;;  %4165 = vmatpush3.msra.mxu0 %v5504_v40 }
 0x161   :  { %679 = vmatprep.subr.mxu1 %v5501_v39  ;;  %4166 = vmatprep.subr.mxu0 %v7127_v0 }
 0x162   :  { %680 = vmatpush1.msra.mxu1 %v5507_v41  ;;  %713 = vmatprep.mubr.f32.mxu1 %v7127_v0 }
 0x163   :  { %4167 = vmatpush3.msra.mxu0 %v5517_v43  ;;  %4168 = vmatprep.mubr.msk.f32.mxu0 %vm5208_vm0, %v7127_v0 }
 0x164   :  { %827 = vmatprep.subr.mxu1 %v5355_v54  ;;  %4171 = vmatprep.subr.mxu0 %v7127_v0 }
 0x1e1   :  { %v432_v44 = vpop.f32.mrf.mxu0  ;;  %v361_v50 = vpop.f32.mrf.mxu1 }
 0x1e2   :  { %v5606_v55 = vadd.f32 %v361_v50, %v283_v51  ;;  %v7145_v51 = vsub.s32 2, %v5597_v47 }
 0x1e3   :  { %v4100_v45 = vpop.f32.mrf.mxu0  ;;  %v363_v53 = vpop.f32.mrf.mxu1 }
 0x1e4   :  { %7197 = vst [vmem:[#allocation32_spill] sm:$0xff] %v5606_v55  ;;  %v5611_v43 = vadd.f32 %v363_v53, %v287_v57 }
 0x1e6   :  { %7198 = vst [vmem:[#allocation33_spill] sm:$0xff] %v5611_v43 }
 0x201   :  { %v552_v56 = vpop.f32.mrf.mxu1 }
 0x202   :  { %v627_v59 = vadd.f32 %v552_v56, %v5606_v55  ;;  %v5618_v56 = vld [vmem:[%s7117_s6] sm:$0x1] }
 0x203   :  { %v623_v45 = vpop.f32.mrf.mxu0  ;;  %v554_v0 = vpop.f32.mrf.mxu1 }
 0x204   :  { %v3694_v46 = vmul.f32 -1.442695, %v627_v59  ;;  %v634_v48 = vadd.f32 %v554_v0, %v5611_v43  ;;  %v641_v57 = vadd.f32 %v623_v45, %v5618_v56 }
 0x205   :  { %v4135_v54 = vpop.f32.mrf.mxu0 }
 0x206   :  { %4746 = vpow2.f32 %v3694_v46  ;;  %v3695_v41 = vmul.f32 -1.442695, %v634_v48  ;;  %v291_v54 = vrot.slane %v278_v49, %v7145_v51  ;;  %v7203_v49 = vld [vmem:[#allocation30_spill] sm:$0xff] }
 0x208   :  { %4748 = vpow2.f32 %v3695_v41  ;;  %v5623_v48 = vadd.f32 %v432_v44, %v291_v54  ;;  %v7202_v44 = vld [vmem:[#allocation29_spill] sm:$0xff] }
 0x213   :  { %v4747_v39 = vpop.eup %4746 }
 0x214   :  { %v631_v50 = vadd.f32 1.0, %v4747_v39 }
 0x215   :  { %v4749_v40 = vpop.eup %4748 }
 0x216   :  { %4750 = vrcp.f32 %v631_v50  ;;  %v638_v53 = vadd.f32 1.0, %v4749_v40  ;;  %v7199_v40 = vmov 0.0  }
 0x218   :  { %4752 = vrcp.f32 %v638_v53 }
 0x223   :  { %v4751_v0 = vpop.eup %4750 }
 0x224   :  { %v642_v39 = vmul.f32 %v4751_v0, %v641_v57 }
 0x225   :  { %v4753_v59 = vpop.eup %4752 }
 0x226   :  { %v643_v41 = vadd.f32 %v642_v39, %v5623_v48  ;;  %v645_v46 = vsub.f32 1.0, %v4753_v59  ;;  %v647_v43 = vmul.f32 %v4753_v59, %v5514_v42  ;;  %v7200_v42 = vld [vmem:[#allocation28_spill] sm:$0xff] }
 0x227   :  { %v7205_v39 = vld [vmem:[#allocation32_spill] sm:$0xff] }
 0x228   :  { %4754 = vtanh.f32 %v643_v41 }
 0x235   :  { %v4755_v50 = vpop.eup %4754 }
 0x236   :  { %v646_v52 = vmul.f32 %v4755_v50, %v645_v46  ;;  %v7206_v50 = vld [vmem:[#allocation33_spill] sm:$0xff] }
 0x238   :  { %v5627_v55 = vadd.f32 %v647_v43, %v646_v52  ;;  %v7201_v43 = vld [vmem:[#allocation27_spill] sm:$0xff] }
 0x239   :  { %v7204_v52 = vld [vmem:[#allocation23_spill] sm:$0xff] }
 0x23a   :  { %714 = vmatmul.mubr.f32.vlgmr.msra.gmra.mxu1 %v5627_v55  ;;  %4169 = vmatmul.mubr.f32.vlgmr.msra.gmra.mxu0 %v5627_v55 }
 0x23b   :  { %828 = vmatpush1.msra.mxu1 %v5362_v58  ;;  %4172 = vmatpush3.msra.mxu0 %v5366_v61 }
 0x23c   :  { %829 = vmatprep.subr.mxu1 %v5364_v60  ;;  %4173 = vmatprep.subr.mxu0 %v7199_v40 }
 0x23d   :  { %830 = vmatpush1.msra.mxu1 %v5368_v62  ;;  %4174 = vmatpush3.msra.mxu0 %v5374_v1 }
 0x23e   :  { %831 = vmatprep.subr.mxu1 %v5371_v63  ;;  %4175 = vmatprep.subr.mxu0 %v7199_v40 }
 0x23f   :  { %832 = vmatpush1.msra.mxu1 %v5377_v2  ;;  %4176 = vmatpush3.msra.mxu0 %v5384_v4 }
 0x240   :  { %833 = vmatprep.subr.mxu1 %v5381_v3  ;;  %4177 = vmatprep.subr.mxu0 %v7199_v40 }
 0x241   :  { %834 = vmatpush1.msra.mxu1 %v5387_v5  ;;  %4178 = vmatpush3.msra.mxu0 %v5394_v7 }
 0x242   :  { %835 = vmatprep.subr.mxu1 %v5391_v6  ;;  %4179 = vmatprep.subr.mxu0 %v7199_v40 }
 0x243   :  { %836 = vmatpush1.msra.mxu1 %v5397_v8  ;;  %4180 = vmatpush3.msra.mxu0 %v5404_v10 }
 0x244   :  { %837 = vmatprep.subr.mxu1 %v5401_v9  ;;  %4181 = vmatprep.subr.mxu0 %v7199_v40 }
 0x245   :  { %838 = vmatpush1.msra.mxu1 %v5407_v11  ;;  %4182 = vmatpush3.msra.mxu0 %v5414_v13 }
 0x246   :  { %839 = vmatprep.subr.mxu1 %v5411_v12  ;;  %4183 = vmatprep.subr.mxu0 %v7199_v40 }
 0x247   :  { %840 = vmatpush1.msra.mxu1 %v5417_v14  ;;  %4184 = vmatpush3.msra.mxu0 %v5424_v16 }
 0x248   :  { %841 = vmatprep.subr.mxu1 %v5421_v15  ;;  %4185 = vmatprep.subr.mxu0 %v7199_v40 }
 0x249   :  { %842 = vmatpush1.msra.mxu1 %v5427_v17  ;;  %4186 = vmatpush3.msra.mxu0 %v5434_v19 }
 0x24a   :  { %843 = vmatprep.subr.mxu1 %v5431_v18  ;;  %4187 = vmatprep.subr.mxu0 %v7199_v40 }
 0x24b   :  { %844 = vmatpush1.msra.mxu1 %v5437_v20  ;;  %4188 = vmatpush3.msra.mxu0 %v5444_v22 }
 0x24c   :  { %845 = vmatprep.subr.mxu1 %v5441_v21  ;;  %4189 = vmatprep.subr.mxu0 %v7199_v40 }
 0x24d   :  { %846 = vmatpush1.msra.mxu1 %v5447_v23  ;;  %4190 = vmatpush3.msra.mxu0 %v5454_v25 }
 0x24e   :  { %847 = vmatprep.subr.mxu1 %v5451_v24  ;;  %4191 = vmatprep.subr.mxu0 %v7199_v40 }
 0x24f   :  { %848 = vmatpush1.msra.mxu1 %v5457_v26  ;;  %4192 = vmatpush3.msra.mxu0 %v5464_v28 }
 0x250   :  { %849 = vmatprep.subr.mxu1 %v5461_v27  ;;  %4193 = vmatprep.subr.mxu0 %v7199_v40 }
 0x251   :  { %850 = vmatpush1.msra.mxu1 %v5467_v29  ;;  %4194 = vmatpush3.msra.mxu0 %v5474_v31 }
 0x252   :  { %851 = vmatprep.subr.mxu1 %v5471_v30  ;;  %4195 = vmatprep.subr.mxu0 %v7199_v40 }
 0x253   :  { %852 = vmatpush1.msra.mxu1 %v5477_v32  ;;  %4196 = vmatpush3.msra.mxu0 %v5484_v34 }
 0x254   :  { %853 = vmatprep.subr.mxu1 %v5481_v33  ;;  %4197 = vmatprep.subr.mxu0 %v7199_v40 }
 0x255   :  { %854 = vmatpush1.msra.mxu1 %v5487_v35  ;;  %4198 = vmatpush3.msra.mxu0 %v5494_v37 }
 0x256   :  { %855 = vmatprep.subr.mxu1 %v5491_v36  ;;  %4199 = vmatprep.subr.mxu0 %v7199_v40 }
 0x257   :  { %856 = vmatpush1.msra.mxu1 %v5497_v38  ;;  %4200 = vmatpush3.msra.mxu0 %v7200_v42 }
 0x258   :  { %857 = vmatprep.subr.mxu1 %v7201_v43  ;;  %4201 = vmatprep.subr.mxu0 %v7199_v40 }
 0x259   :  { %858 = vmatpush1.msra.mxu1 %v7202_v44  ;;  %891 = vmatprep.mubr.f32.mxu1 %v7199_v40 }
 0x25a   :  { %4202 = vmatpush3.msra.mxu0 %v7203_v49  ;;  %4203 = vmatprep.mubr.msk.f32.mxu0 %vm5208_vm0, %v7199_v40 }
 0x25b   :  { %1004 = vmatprep.subr.mxu1 %v7204_v52  ;;  %4206 = vmatprep.subr.mxu0 %v7199_v40 }
 0x2fa   :  { %v715_v45 = vpop.f32.mrf.mxu1  ;;  %v786_v54 = vpop.f32.mrf.mxu0 }
 0x2fb   :  { %v791_v53 = vrot.slane %v715_v45, 7  ;;  %v810_v43 = vadd.f32 %v786_v54, %v5618_v56  ;;  %v7212_v54 = vld [vmem:[#allocation30_spill] sm:$0xff] }
 0x2fc   :  { %v717_v57 = vpop.f32.mrf.mxu1  ;;  %v4170_v0 = vpop.f32.mrf.mxu0 }
 0x2fd   :  { %v793_v41 = vadd.f32 %v791_v53, %v7205_v39  ;;  %v801_v46 = vrot.slane %v717_v57, 7  ;;  %v812_v38 = vrot.slane %v810_v43, 7  ;;  %v820_v0 = vrot.slane %v5627_v55, 7  ;;  %v7210_v43 = vld [vmem:[#allocation27_spill] sm:$0xff] }
 0x2ff   :  { %v3696_v59 = vmul.f32 -1.442695, %v793_v41  ;;  %v803_v51 = vadd.f32 %v801_v46, %v7206_v50  ;;  %v7213_v46 = vld [vmem:[#allocation23_spill] sm:$0xff] }
 0x301   :  { %4756 = vpow2.f32 %v3696_v59  ;;  %v3697_v47 = vmul.f32 -1.442695, %v803_v51 }
 0x303   :  { %4758 = vpow2.f32 %v3697_v47 }
 0x30e   :  { %v4757_v49 = vpop.eup %4756 }
 0x30f   :  { %v797_v44 = vadd.f32 1.0, %v4757_v49 }
 0x310   :  { %v4759_v52 = vpop.eup %4758 }
 0x311   :  { %4760 = vrcp.f32 %v797_v44  ;;  %v807_v42 = vadd.f32 1.0, %v4759_v52  ;;  %v7211_v52 = vld [vmem:[#allocation29_spill] sm:$0xff] }
 0x313   :  { %4762 = vrcp.f32 %v807_v42  ;;  %v7209_v42 = vld [vmem:[#allocation28_spill] sm:$0xff] }
 0x31e   :  { %v4761_v45 = vpop.eup %4760 }
 0x31f   :  { %v814_v36 = vmul.f32 %v4761_v45, %v812_v38  ;;  %v7208_v38 = vld [vmem:[#allocation26_spill] sm:$0xff] }
 0x320   :  { %v4763_v57 = vpop.eup %4762 }
 0x321   :  { %v815_v53 = vadd.f32 %v814_v36, %v5623_v48  ;;  %v817_v41 = vsub.f32 1.0, %v4763_v57  ;;  %v822_v59 = vmul.f32 %v4763_v57, %v820_v0  ;;  %v7207_v36 = vld [vmem:[#allocation24_spill] sm:$0xff] }
 0x323   :  { %4764 = vtanh.f32 %v815_v53 }
 0x330   :  { %v4765_v51 = vpop.eup %4764 }
 0x331   :  { %v818_v47 = vmul.f32 %v4765_v51, %v817_v41 }
 0x333   :  { %v5703_v49 = vadd.f32 %v822_v59, %v818_v47 }
 0x335   :  { %v825_v44 = vrot.slane %v5703_v49, 1 }
 0x337   :  { %892 = vmatmul.mubr.f32.vlgmr.msra.gmra.mxu1 %v825_v44  ;;  %4204 = vmatmul.mubr.f32.vlgmr.msra.gmra.mxu0 %v825_v44 }
 0x338   :  { %1005 = vmatpush1.msra.mxu1 %v5362_v58  ;;  %4207 = vmatpush3.msra.mxu0 %v5366_v61 }
 0x339   :  { %1006 = vmatprep.subr.mxu1 %v5364_v60  ;;  %4208 = vmatprep.subr.mxu0 %v7199_v40 }
 0x33a   :  { %1007 = vmatpush1.msra.mxu1 %v5368_v62  ;;  %4209 = vmatpush3.msra.mxu0 %v5374_v1 }
 0x33b   :  { %1008 = vmatprep.subr.mxu1 %v5371_v63  ;;  %4210 = vmatprep.subr.mxu0 %v7199_v40 }
 0x33c   :  { %1009 = vmatpush1.msra.mxu1 %v5377_v2  ;;  %4211 = vmatpush3.msra.mxu0 %v5384_v4 }
 0x33d   :  { %1010 = vmatprep.subr.mxu1 %v5381_v3  ;;  %4212 = vmatprep.subr.mxu0 %v7199_v40 }
 0x33e   :  { %1011 = vmatpush1.msra.mxu1 %v5387_v5  ;;  %4213 = vmatpush3.msra.mxu0 %v5394_v7 }
 0x33f   :  { %1012 = vmatprep.subr.mxu1 %v5391_v6  ;;  %4214 = vmatprep.subr.mxu0 %v7199_v40 }
 0x340   :  { %1013 = vmatpush1.msra.mxu1 %v5397_v8  ;;  %4215 = vmatpush3.msra.mxu0 %v5404_v10 }
 0x341   :  { %1014 = vmatprep.subr.mxu1 %v5401_v9  ;;  %4216 = vmatprep.subr.mxu0 %v7199_v40 }
 0x342   :  { %1015 = vmatpush1.msra.mxu1 %v5407_v11  ;;  %4217 = vmatpush3.msra.mxu0 %v5414_v13 }
 0x343   :  { %1016 = vmatprep.subr.mxu1 %v5411_v12  ;;  %4218 = vmatprep.subr.mxu0 %v7199_v40 }
 0x344   :  { %1017 = vmatpush1.msra.mxu1 %v5417_v14  ;;  %4219 = vmatpush3.msra.mxu0 %v5424_v16 }
 0x345   :  { %1018 = vmatprep.subr.mxu1 %v5421_v15  ;;  %4220 = vmatprep.subr.mxu0 %v7199_v40 }
 0x346   :  { %1019 = vmatpush1.msra.mxu1 %v5427_v17  ;;  %4221 = vmatpush3.msra.mxu0 %v5434_v19 }
 0x347   :  { %1020 = vmatprep.subr.mxu1 %v5431_v18  ;;  %4222 = vmatprep.subr.mxu0 %v7199_v40 }
 0x348   :  { %1021 = vmatpush1.msra.mxu1 %v5437_v20  ;;  %4223 = vmatpush3.msra.mxu0 %v5444_v22 }
 0x349   :  { %1022 = vmatprep.subr.mxu1 %v5441_v21  ;;  %4224 = vmatprep.subr.mxu0 %v7199_v40 }
 0x34a   :  { %1023 = vmatpush1.msra.mxu1 %v5447_v23  ;;  %4225 = vmatpush3.msra.mxu0 %v5454_v25 }
 0x34b   :  { %1024 = vmatprep.subr.mxu1 %v5451_v24  ;;  %4226 = vmatprep.subr.mxu0 %v7199_v40 }
 0x34c   :  { %1025 = vmatpush1.msra.mxu1 %v5457_v26  ;;  %4227 = vmatpush3.msra.mxu0 %v5464_v28 }
 0x34d   :  { %1026 = vmatprep.subr.mxu1 %v5461_v27  ;;  %4228 = vmatprep.subr.mxu0 %v7199_v40 }
 0x34e   :  { %1027 = vmatpush1.msra.mxu1 %v5467_v29  ;;  %4229 = vmatpush3.msra.mxu0 %v5474_v31 }
 0x34f   :  { %1028 = vmatprep.subr.mxu1 %v5471_v30  ;;  %4230 = vmatprep.subr.mxu0 %v7199_v40 }
 0x350   :  { %1029 = vmatpush1.msra.mxu1 %v5477_v32  ;;  %4231 = vmatpush3.msra.mxu0 %v5484_v34 }
 0x351   :  { %1030 = vmatprep.subr.mxu1 %v5481_v33  ;;  %4232 = vmatprep.subr.mxu0 %v7199_v40 }
 0x352   :  { %1031 = vmatpush1.msra.mxu1 %v5487_v35  ;;  %4233 = vmatpush3.msra.mxu0 %v5494_v37 }
 0x353   :  { %1032 = vmatprep.subr.mxu1 %v7207_v36  ;;  %4234 = vmatprep.subr.mxu0 %v7199_v40 }
 0x354   :  { %1033 = vmatpush1.msra.mxu1 %v7208_v38  ;;  %4235 = vmatpush3.msra.mxu0 %v7209_v42 }
 0x355   :  { %1034 = vmatprep.subr.mxu1 %v7210_v43  ;;  %4236 = vmatprep.subr.mxu0 %v7199_v40 }
 0x356   :  { %1035 = vmatpush1.msra.mxu1 %v7211_v52  ;;  %1068 = vmatprep.mubr.f32.mxu1 %v7199_v40 }
 0x357   :  { %4237 = vmatpush3.msra.mxu0 %v7212_v54  ;;  %4238 = vmatprep.mubr.msk.f32.mxu0 %vm5208_vm0, %v7199_v40 }
 0x358   :  { %1181 = vmatprep.subr.mxu1 %v7213_v46  ;;  %4241 = vmatprep.subr.mxu0 %v7199_v40 }
 0x3f7   :  { %v893_v45 = vpop.f32.mrf.mxu1  ;;  %v964_v53 = vpop.f32.mrf.mxu0 }
 0x3f8   :  { %v969_v57 = vrot.slane %v893_v45, 6  ;;  %v988_v42 = vadd.f32 %v964_v53, %v5618_v56 }
 0x3f9   :  { %v895_v0 = vpop.f32.mrf.mxu1  ;;  %v4205_v41 = vpop.f32.mrf.mxu0 }
 0x3fa   :  { %v971_v51 = vadd.f32 %v969_v57, %v7205_v39  ;;  %v979_v59 = vrot.slane %v895_v0, 6  ;;  %v990_v36 = vrot.slane %v988_v42, 6  ;;  %v1888_v42 = vsel %vm1887_vm2, %v5627_v55, %v5703_v49 }
 0x3fc   :  { %v3698_v47 = vmul.f32 -1.442695, %v971_v51  ;;  %v981_v44 = vadd.f32 %v979_v59, %v7206_v50  ;;  %v997_v51 = vrot.slane %v5703_v49, 7 }
 0x3fe   :  { %4766 = vpow2.f32 %v3698_v47  ;;  %v3699_v54 = vmul.f32 -1.442695, %v981_v44 }
 0x400   :  { %4768 = vpow2.f32 %v3699_v54 }
 0x40b   :  { %v4767_v52 = vpop.eup %4766 }
 0x40c   :  { %v975_v43 = vadd.f32 1.0, %v4767_v52 }
 0x40d   :  { %v4769_v46 = vpop.eup %4768 }
 0x40e   :  { %4770 = vrcp.f32 %v975_v43  ;;  %v985_v38 = vadd.f32 1.0, %v4769_v46 }
 0x410   :  { %4772 = vrcp.f32 %v985_v38 }
 0x41b   :  { %v4771_v45 = vpop.eup %4770 }
 0x41c   :  { %v992_v37 = vmul.f32 %v4771_v45, %v990_v36 }
 0x41d   :  { %v4773_v0 = vpop.eup %4772 }
 0x41e   :  { %v993_v57 = vadd.f32 %v992_v37, %v5623_v48  ;;  %v995_v41 = vsub.f32 1.0, %v4773_v0  ;;  %v999_v52 = vmul.f32 %v4773_v0, %v997_v51  ;;  %v5868_v0 = vld [vmem:[#allocation8 + $0x168] sm:$0xff]  ;;  %v5874_v51 = vld [vmem:[#allocation8 + $0x158] sm:$0xff] }
 0x420   :  { %4774 = vtanh.f32 %v993_v57 }
 0x42d   :  { %v4775_v47 = vpop.eup %4774 }
 0x42e   :  { %v996_v54 = vmul.f32 %v4775_v47, %v995_v41  ;;  %v5871_v41 = vld [vmem:[#allocation8 + $0x178] sm:$0xff]  ;;  %v5878_v47 = vld [vmem:[#allocation8 + $0x150] sm:$0xff] }
 0x430   :  { %v5778_v43 = vadd.f32 %v999_v52, %v996_v54  ;;  %v5881_v54 = vld [vmem:[#allocation8 + $0x160] sm:$0xff] }
 0x431   :  { %v5884_v52 = vld [vmem:[#allocation8 + $0x140] sm:$0xff] }
 0x432   :  { %v1002_v36 = vrot.slane %v5778_v43, 2  ;;  %v5786_v37 = vsel %vm1889_vm3, %v1888_v42, %v5778_v43  ;;  %v1174_v38 = vrot.slane %v5778_v43, 7  ;;  %v5888_v43 = vld [vmem:[#allocation8 + $0x138] sm:$0xff]  ;;  %v5891_v42 = vld [vmem:[#allocation8 + $0x148] sm:$0xff] }
 0x434   :  { %1069 = vmatmul.mubr.f32.vlgmr.msra.gmra.mxu1 %v1002_v36  ;;  %4239 = vmatmul.mubr.f32.vlgmr.msra.gmra.mxu0 %v1002_v36  ;;  %v5894_v36 = vld [vmem:[#allocation8 + $0x128] sm:$0xff] }
 0x435   :  { %1182 = vmatpush1.msra.mxu1 %v5362_v58  ;;  %4242 = vmatpush3.msra.mxu0 %v5366_v61  ;;  %v7214_v58 = vld [vmem:[#allocation25_spill] sm:$0xff]  ;;  %v7216_v61 = vld [vmem:[#allocation26_spill] sm:$0xff] }
 0x436   :  { %1183 = vmatprep.subr.mxu1 %v5364_v60  ;;  %4243 = vmatprep.subr.mxu0 %v7199_v40  ;;  %v7215_v60 = vld [vmem:[#allocation24_spill] sm:$0xff] }
 0x437   :  { %1184 = vmatpush1.msra.mxu1 %v5368_v62  ;;  %4244 = vmatpush3.msra.mxu0 %v5374_v1  ;;  %v7217_v62 = vld [vmem:[#allocation28_spill] sm:$0xff]  ;;  %v7219_v1 = vld [vmem:[#allocation29_spill] sm:$0xff] }
 0x438   :  { %1185 = vmatprep.subr.mxu1 %v5371_v63  ;;  %4245 = vmatprep.subr.mxu0 %v7199_v40  ;;  %v7218_v63 = vld [vmem:[#allocation27_spill] sm:$0xff] }
 0x439   :  { %1186 = vmatpush1.msra.mxu1 %v5377_v2  ;;  %4246 = vmatpush3.msra.mxu0 %v5384_v4  ;;  %v7220_v2 = vld [vmem:[#allocation30_spill] sm:$0xff] }
 0x43a   :  { %1187 = vmatprep.subr.mxu1 %v5381_v3  ;;  %4247 = vmatprep.subr.mxu0 %v7199_v40  ;;  %v7221_v3 = vld [vmem:[#allocation23_spill] sm:$0xff] }
 0x43b   :  { %1188 = vmatpush1.msra.mxu1 %v5387_v5  ;;  %4248 = vmatpush3.msra.mxu0 %v5394_v7 }
 0x43c   :  { %1189 = vmatprep.subr.mxu1 %v5391_v6  ;;  %4249 = vmatprep.subr.mxu0 %v7199_v40 }
 0x43d   :  { %1190 = vmatpush1.msra.mxu1 %v5397_v8  ;;  %4250 = vmatpush3.msra.mxu0 %v5404_v10 }
 0x43e   :  { %1191 = vmatprep.subr.mxu1 %v5401_v9  ;;  %4251 = vmatprep.subr.mxu0 %v7199_v40 }
 0x43f   :  { %1192 = vmatpush1.msra.mxu1 %v5407_v11  ;;  %4252 = vmatpush3.msra.mxu0 %v5414_v13 }
 0x440   :  { %1193 = vmatprep.subr.mxu1 %v5411_v12  ;;  %4253 = vmatprep.subr.mxu0 %v7199_v40 }
 0x441   :  { %1194 = vmatpush1.msra.mxu1 %v5417_v14  ;;  %4254 = vmatpush3.msra.mxu0 %v5424_v16 }
 0x442   :  { %1195 = vmatprep.subr.mxu1 %v5421_v15  ;;  %4255 = vmatprep.subr.mxu0 %v7199_v40 }
 0x443   :  { %1196 = vmatpush1.msra.mxu1 %v5427_v17  ;;  %4256 = vmatpush3.msra.mxu0 %v5434_v19 }
 0x444   :  { %1197 = vmatprep.subr.mxu1 %v5431_v18  ;;  %4257 = vmatprep.subr.mxu0 %v7199_v40 }
 0x445   :  { %1198 = vmatpush1.msra.mxu1 %v5437_v20  ;;  %4258 = vmatpush3.msra.mxu0 %v5444_v22 }
 0x446   :  { %1199 = vmatprep.subr.mxu1 %v5441_v21  ;;  %4259 = vmatprep.subr.mxu0 %v7199_v40 }
 0x447   :  { %1200 = vmatpush1.msra.mxu1 %v5447_v23  ;;  %4260 = vmatpush3.msra.mxu0 %v5454_v25 }
 0x448   :  { %1201 = vmatprep.subr.mxu1 %v5451_v24  ;;  %4261 = vmatprep.subr.mxu0 %v7199_v40 }
 0x449   :  { %1202 = vmatpush1.msra.mxu1 %v5457_v26  ;;  %4262 = vmatpush3.msra.mxu0 %v5464_v28 }
 0x44a   :  { %1203 = vmatprep.subr.mxu1 %v5461_v27  ;;  %4263 = vmatprep.subr.mxu0 %v7199_v40 }
 0x44b   :  { %1204 = vmatpush1.msra.mxu1 %v5467_v29  ;;  %4264 = vmatpush3.msra.mxu0 %v5474_v31 }
 0x44c   :  { %1205 = vmatprep.subr.mxu1 %v5471_v30  ;;  %4265 = vmatprep.subr.mxu0 %v7199_v40 }
 0x44d   :  { %1206 = vmatpush1.msra.mxu1 %v5477_v32  ;;  %4266 = vmatpush3.msra.mxu0 %v5484_v34 }
 0x44e   :  { %1207 = vmatprep.subr.mxu1 %v5481_v33  ;;  %4267 = vmatprep.subr.mxu0 %v7199_v40 }
 0x44f   :  { %1208 = vmatpush1.msra.mxu1 %v5487_v35  ;;  %4268 = vmatpush3.msra.mxu0 %v7214_v58 }
 0x450   :  { %1209 = vmatprep.subr.mxu1 %v7215_v60  ;;  %4269 = vmatprep.subr.mxu0 %v7199_v40 }
 0x451   :  { %1210 = vmatpush1.msra.mxu1 %v7216_v61  ;;  %4270 = vmatpush3.msra.mxu0 %v7217_v62 }
 0x452   :  { %1211 = vmatprep.subr.mxu1 %v7218_v63  ;;  %4271 = vmatprep.subr.mxu0 %v7199_v40 }
 0x453   :  { %1212 = vmatpush1.msra.mxu1 %v7219_v1  ;;  %1245 = vmatprep.mubr.f32.mxu1 %v7199_v40 }
 0x454   :  { %4272 = vmatpush3.msra.mxu0 %v7220_v2  ;;  %4273 = vmatprep.mubr.msk.f32.mxu0 %vm5208_vm0, %v7199_v40 }
 0x455   :  { %1358 = vmatprep.subr.mxu1 %v7221_v3  ;;  %4276 = vmatprep.subr.mxu0 %v7199_v40  ;;  %v5901_v3 = vld [vmem:[#allocation8 + $0x130] sm:$0xff] }
 0x4f4   :  { %v1070_v4 = vpop.f32.mrf.mxu1  ;;  %v1141_v5 = vpop.f32.mrf.mxu0 }
 0x4f5   :  { %v1146_v6 = vrot.slane %v1070_v4, 5  ;;  %v1165_v17 = vadd.f32 %v1141_v5, %v5618_v56  ;;  %v5904_v4 = vld [vmem:[#allocation8 + $0x110] sm:$0xff]  ;;  %v5908_v5 = vld [vmem:[#allocation8 + $0x108] sm:$0xff] }
 0x4f6   :  { %v1072_v7 = vpop.f32.mrf.mxu1  ;;  %v4240_v8 = vpop.f32.mrf.mxu0 }
 0x4f7   :  { %v1148_v9 = vadd.f32 %v1146_v6, %v7205_v39  ;;  %v1156_v11 = vrot.slane %v1072_v7, 5  ;;  %v1167_v19 = vrot.slane %v1165_v17, 5  ;;  %v5911_v6 = vld [vmem:[#allocation8 + $0x118] sm:$0xff]  ;;  %v5918_v8 = vld [vmem:[#allocation8 + $0xf0] sm:$0xff]  ;;  %v5948_v17 = vld [vmem:[#allocation8 + $0xa8] sm:$0xff] }
 0x4f8   :  { %v5914_v7 = vld [vmem:[#allocation8 + $0xf8] sm:$0xff] }
 0x4f9   :  { %v3700_v10 = vmul.f32 -1.442695, %v1148_v9  ;;  %v1158_v12 = vadd.f32 %v1156_v11, %v7206_v50  ;;  %v5921_v9 = vld [vmem:[#allocation8 + $0x100] sm:$0xff]  ;;  %v5928_v11 = vld [vmem:[#allocation8 + $0xd8] sm:$0xff] }
 0x4fb   :  { %4776 = vpow2.f32 %v3700_v10  ;;  %v3701_v13 = vmul.f32 -1.442695, %v1158_v12  ;;  %v5924_v10 = vld [vmem:[#allocation8 + $0xe0] sm:$0xff]  ;;  %v5931_v12 = vld [vmem:[#allocation8 + $0xe8] sm:$0xff] }
 0x4fd   :  { %4778 = vpow2.f32 %v3701_v13  ;;  %v5934_v13 = vld [vmem:[#allocation8 + $0xc8] sm:$0xff] }
 0x508   :  { %v4777_v14 = vpop.eup %4776 }
 0x509   :  { %v1152_v15 = vadd.f32 1.0, %v4777_v14  ;;  %v5938_v14 = vld [vmem:[#allocation8 + $0xc0] sm:$0xff] }
 0x50a   :  { %v4779_v16 = vpop.eup %4778 }
 0x50b   :  { %4780 = vrcp.f32 %v1152_v15  ;;  %v1162_v18 = vadd.f32 1.0, %v4779_v16  ;;  %v5941_v15 = vld [vmem:[#allocation8 + $0xd0] sm:$0xff] }
 0x50c   :  { %v5944_v16 = vld [vmem:[#allocation8 + $0xb0] sm:$0xff] }
 0x50d   :  { %4782 = vrcp.f32 %v1162_v18  ;;  %v5952_v18 = vld [vmem:[#allocation8 + $0x98] sm:$0xff] }
 0x518   :  { %v4781_v20 = vpop.eup %4780 }
 0x519   :  { %v1169_v21 = vmul.f32 %v4781_v20, %v1167_v19  ;;  %v5956_v19 = vld [vmem:[#allocation8 + $0x90] sm:$0xff] }
 0x51a   :  { %v4783_v55 = vpop.eup %4782 }
 0x51b   :  { %v1170_v23 = vadd.f32 %v1169_v21, %v5623_v48  ;;  %v1172_v49 = vsub.f32 1.0, %v4783_v55  ;;  %v1176_v59 = vmul.f32 %v4783_v55, %v1174_v38 }
 0x51d   :  { %4784 = vtanh.f32 %v1170_v23 }
 0x52a   :  { %v4785_v46 = vpop.eup %4784 }
 0x52b   :  { %v1173_v53 = vmul.f32 %v4785_v46, %v1172_v49 }
 0x52d   :  { %v5860_v44 = vadd.f32 %v1176_v59, %v1173_v53 }
 0x52f   :  { %v1179_v45 = vrot.slane %v5860_v44, 3  ;;  %v5866_v57 = vsel %vm1891_vm4, %v5786_v37, %v5860_v44  ;;  %v5898_v37 = vld [vmem:[#allocation8 + $0x120] sm:$0xff]  ;;  %v1351_v23 = vrot.slane %v5860_v44, 7  ;;  %v6037_v44 = vld [vmem:[#allocation8 + $0xb8] sm:$0xff] }
 0x531   :  { %1246 = vmatmul.mubr.f32.vlgmr.msra.gmra.mxu1 %v1179_v45  ;;  %4274 = vmatmul.mubr.f32.vlgmr.msra.gmra.mxu0 %v1179_v45  ;;  %v6043_v45 = vld [vmem:[#allocation8 + $0xa0] sm:$0xff] }
 0x532   :  { %1359 = vmatpush1.msra.mxu1 %v5868_v0  ;;  %4277 = vmatpush3.msra.mxu0 %v5871_v41 }
 0x533   :  { %1360 = vmatprep.subr.mxu1 %v5874_v51  ;;  %4278 = vmatprep.subr.mxu0 %v7199_v40 }
 0x534   :  { %1361 = vmatpush1.msra.mxu1 %v5878_v47  ;;  %4279 = vmatpush3.msra.mxu0 %v5881_v54 }
 0x535   :  { %1362 = vmatprep.subr.mxu1 %v5884_v52  ;;  %4280 = vmatprep.subr.mxu0 %v7199_v40 }
 0x536   :  { %1363 = vmatpush1.msra.mxu1 %v5888_v43  ;;  %4281 = vmatpush3.msra.mxu0 %v5891_v42 }
 0x537   :  { %1364 = vmatprep.subr.mxu1 %v5894_v36  ;;  %4282 = vmatprep.subr.mxu0 %v7199_v40 }
 0x538   :  { %1365 = vmatpush1.msra.mxu1 %v5898_v37  ;;  %4283 = vmatpush3.msra.mxu0 %v5901_v3 }
 0x539   :  { %1366 = vmatprep.subr.mxu1 %v5904_v4  ;;  %4284 = vmatprep.subr.mxu0 %v7199_v40 }
 0x53a   :  { %1367 = vmatpush1.msra.mxu1 %v5908_v5  ;;  %4285 = vmatpush3.msra.mxu0 %v5911_v6 }
 0x53b   :  { %1368 = vmatprep.subr.mxu1 %v5914_v7  ;;  %4286 = vmatprep.subr.mxu0 %v7199_v40 }
 0x53c   :  { %1369 = vmatpush1.msra.mxu1 %v5918_v8  ;;  %4287 = vmatpush3.msra.mxu0 %v5921_v9 }
 0x53d   :  { %1370 = vmatprep.subr.mxu1 %v5924_v10  ;;  %4288 = vmatprep.subr.mxu0 %v7199_v40 }
 0x53e   :  { %1371 = vmatpush1.msra.mxu1 %v5928_v11  ;;  %4289 = vmatpush3.msra.mxu0 %v5931_v12 }
 0x53f   :  { %1372 = vmatprep.subr.mxu1 %v5934_v13  ;;  %4290 = vmatprep.subr.mxu0 %v7199_v40 }
 0x540   :  { %1373 = vmatpush1.msra.mxu1 %v5938_v14  ;;  %4291 = vmatpush3.msra.mxu0 %v5941_v15 }
 0x541   :  { %1374 = vmatprep.subr.mxu1 %v5944_v16  ;;  %4292 = vmatprep.subr.mxu0 %v7199_v40 }
 0x542   :  { %1375 = vmatpush1.msra.mxu1 %v5948_v17  ;;  %4293 = vmatpush3.msra.mxu0 %v5444_v22  ;;  %v5987_v22 = vld [vmem:[#allocation8 + $0x170] sm:$0xff] }
 0x543   :  { %1376 = vmatprep.subr.mxu1 %v5952_v18  ;;  %4294 = vmatprep.subr.mxu0 %v7199_v40 }
 0x544   :  { %1377 = vmatpush1.msra.mxu1 %v5956_v19  ;;  %4295 = vmatpush3.msra.mxu0 %v5454_v25 }
 0x545   :  { %1378 = vmatprep.subr.mxu1 %v5451_v24  ;;  %4296 = vmatprep.subr.mxu0 %v7199_v40 }
 0x546   :  { %1379 = vmatpush1.msra.mxu1 %v5457_v26  ;;  %4297 = vmatpush3.msra.mxu0 %v5464_v28 }
 0x547   :  { %1380 = vmatprep.subr.mxu1 %v5461_v27  ;;  %4298 = vmatprep.subr.mxu0 %v7199_v40 }
 0x548   :  { %1381 = vmatpush1.msra.mxu1 %v5467_v29  ;;  %4299 = vmatpush3.msra.mxu0 %v5474_v31 }
 0x549   :  { %1382 = vmatprep.subr.mxu1 %v5471_v30  ;;  %4300 = vmatprep.subr.mxu0 %v7199_v40 }
 0x54a   :  { %1383 = vmatpush1.msra.mxu1 %v5477_v32  ;;  %4301 = vmatpush3.msra.mxu0 %v5484_v34 }
 0x54b   :  { %1384 = vmatprep.subr.mxu1 %v5481_v33  ;;  %4302 = vmatprep.subr.mxu0 %v7199_v40 }
 0x54c   :  { %1385 = vmatpush1.msra.mxu1 %v5487_v35  ;;  %4303 = vmatpush3.msra.mxu0 %v7214_v58 }
 0x54d   :  { %1386 = vmatprep.subr.mxu1 %v7215_v60  ;;  %4304 = vmatprep.subr.mxu0 %v7199_v40 }
 0x54e   :  { %1387 = vmatpush1.msra.mxu1 %v7216_v61  ;;  %4305 = vmatpush3.msra.mxu0 %v7217_v62 }
 0x54f   :  { %1388 = vmatprep.subr.mxu1 %v7218_v63  ;;  %4306 = vmatprep.subr.mxu0 %v7199_v40 }
 0x550   :  { %1389 = vmatpush1.msra.mxu1 %v7219_v1  ;;  %1422 = vmatprep.mubr.f32.mxu1 %v7199_v40 }
 0x551   :  { %4307 = vmatpush3.msra.mxu0 %v7220_v2  ;;  %4308 = vmatprep.mubr.msk.f32.mxu0 %vm5208_vm0, %v7199_v40 }
 0x552   :  { %1535 = vmatprep.subr.mxu1 %v5987_v22  ;;  %4311 = vmatprep.subr.mxu0 %v7199_v40 }
 0x5f1   :  { %v1247_v24 = vpop.f32.mrf.mxu1  ;;  %v1318_v25 = vpop.f32.mrf.mxu0 }
 0x5f2   :  { %v1323_v26 = vrot.slane %v1247_v24, 4  ;;  %v1342_v60 = vadd.f32 %v1318_v25, %v5618_v56  ;;  %v6050_v24 = vld [vmem:[#allocation8 + $0x78] sm:$0xff]  ;;  %v6053_v25 = vld [vmem:[#allocation8 + $0x88] sm:$0xff] }
 0x5f3   :  { %v1249_v27 = vpop.f32.mrf.mxu1  ;;  %v4275_v28 = vpop.f32.mrf.mxu0 }
 0x5f4   :  { %v1325_v29 = vadd.f32 %v1323_v26, %v7205_v39  ;;  %v1333_v31 = vrot.slane %v1249_v27, 4  ;;  %v1344_v62 = vrot.slane %v1342_v60, 4  ;;  %v6056_v26 = vld [vmem:[#allocation8 + $0x68] sm:$0xff]  ;;  %v6060_v27 = vld [vmem:[#allocation8 + $0x60] sm:$0xff]  ;;  %v6063_v28 = vld [vmem:[#allocation8 + $0x70] sm:$0xff] }
 0x5f5   :  { %v6093_v60 = vld [vmem:[#allocation8 + $0x28] sm:$0xff] }
 0x5f6   :  { %v3702_v30 = vmul.f32 -1.442695, %v1325_v29  ;;  %v1335_v32 = vadd.f32 %v1333_v31, %v7206_v50  ;;  %v6066_v29 = vld [vmem:[#allocation8 + $0x50] sm:$0xff]  ;;  %v6073_v31 = vld [vmem:[#allocation8 + $0x58] sm:$0xff]  ;;  %7225 = vst [vmem:[#allocation24_spill] sm:$0xff] %v6093_v60 }
 0x5f8   :  { %4786 = vpow2.f32 %v3702_v30  ;;  %v3703_v33 = vmul.f32 -1.442695, %v1335_v32  ;;  %v6070_v30 = vld [vmem:[#allocation8 + $0x48] sm:$0xff]  ;;  %v6076_v32 = vld [vmem:[#allocation8 + $0x38] sm:$0xff] }
 0x5fa   :  { %4788 = vpow2.f32 %v3703_v33  ;;  %v6080_v33 = vld [vmem:[#allocation8 + $0x30] sm:$0xff] }
 0x605   :  { %v4787_v34 = vpop.eup %4786 }
 0x606   :  { %v1329_v35 = vadd.f32 1.0, %v4787_v34  ;;  %v6083_v34 = vld [vmem:[#allocation8 + $0x40] sm:$0xff] }
 0x607   :  { %v4789_v58 = vpop.eup %4788  ;;  %7222 = vst [vmem:[#allocation32_spill] sm:$0xff] %v6083_v34 }
 0x608   :  { %4790 = vrcp.f32 %v1329_v35  ;;  %v1339_v61 = vadd.f32 1.0, %v4789_v58  ;;  %v6086_v35 = vld [vmem:[#allocation8 + $0x20] sm:$0xff]  ;;  %v6090_v58 = vld [vmem:[#allocation8 + $0x18] sm:$0xff] }
 0x609   :  { %7223 = vst [vmem:[#allocation33_spill] sm:$0xff] %v6086_v35  ;;  %7224 = vst [vmem:[#allocation25_spill] sm:$0xff] %v6090_v58 }
 0x60a   :  { %4792 = vrcp.f32 %v1339_v61  ;;  %v6096_v61 = vld [vmem:[#allocation8 + $0x8] sm:$0xff] }
 0x60b   :  { %7226 = vst [vmem:[#allocation26_spill] sm:$0xff] %v6096_v61 }
 0x615   :  { %v4791_v63 = vpop.eup %4790 }
 0x616   :  { %v1346_v1 = vmul.f32 %v4791_v63, %v1344_v62  ;;  %v6100_v62 = vld [vmem:[#allocation8] sm:$0xff]  ;;  %v6104_v63 = vld [vmem:[#allocation8 + $0x10] sm:$0xff] }
 0x617   :  { %v4793_v20 = vpop.eup %4792  ;;  %7227 = vst [vmem:[#allocation28_spill] sm:$0xff] %v6100_v62  ;;  %7228 = vst [vmem:[#allocation27_spill] sm:$0xff] %v6104_v63 }
 0x618   :  { %v1347_v2 = vadd.f32 %v1346_v1, %v5623_v48  ;;  %v1349_v21 = vsub.f32 1.0, %v4793_v20  ;;  %v1353_v38 = vmul.f32 %v4793_v20, %v1351_v23 }
 0x61a   :  { %4794 = vtanh.f32 %v1347_v2 }
 0x627   :  { %v4795_v55 = vpop.eup %4794 }
 0x628   :  { %v1350_v49 = vmul.f32 %v4795_v55, %v1349_v21 }
 0x62a   :  { %v5996_v46 = vadd.f32 %v1353_v38, %v1350_v49 }
 0x62c   :  { %v1356_v53 = vrot.slane %v5996_v46, 4  ;;  %v6002_v59 = vsel %vm1893_vm5, %v5866_v57, %v5996_v46  ;;  %v6046_v57 = vld [vmem:[#allocation8 + $0x80] sm:$0xff] }
 0x62e   :  { %1423 = vmatmul.mubr.f32.vlgmr.msra.gmra.mxu1 %v1356_v53  ;;  %4309 = vmatmul.mubr.f32.vlgmr.msra.gmra.mxu0 %v1356_v53 }
 0x62f   :  { %1536 = vmatpush1.msra.mxu1 %v5868_v0  ;;  %4312 = vmatpush3.msra.mxu0 %v5871_v41 }
 0x630   :  { %1537 = vmatprep.subr.mxu1 %v5874_v51  ;;  %4313 = vmatprep.subr.mxu0 %v7199_v40 }
 0x631   :  { %1538 = vmatpush1.msra.mxu1 %v5878_v47  ;;  %4314 = vmatpush3.msra.mxu0 %v5881_v54 }
 0x632   :  { %1539 = vmatprep.subr.mxu1 %v5884_v52  ;;  %4315 = vmatprep.subr.mxu0 %v7199_v40 }
 0x633   :  { %1540 = vmatpush1.msra.mxu1 %v5888_v43  ;;  %4316 = vmatpush3.msra.mxu0 %v5891_v42 }
 0x634   :  { %1541 = vmatprep.subr.mxu1 %v5894_v36  ;;  %4317 = vmatprep.subr.mxu0 %v7199_v40 }
 0x635   :  { %1542 = vmatpush1.msra.mxu1 %v5898_v37  ;;  %4318 = vmatpush3.msra.mxu0 %v5901_v3 }
 0x636   :  { %1543 = vmatprep.subr.mxu1 %v5904_v4  ;;  %4319 = vmatprep.subr.mxu0 %v7199_v40 }
 0x637   :  { %1544 = vmatpush1.msra.mxu1 %v5908_v5  ;;  %4320 = vmatpush3.msra.mxu0 %v5911_v6 }
 0x638   :  { %1545 = vmatprep.subr.mxu1 %v5914_v7  ;;  %4321 = vmatprep.subr.mxu0 %v7199_v40 }
 0x639   :  { %1546 = vmatpush1.msra.mxu1 %v5918_v8  ;;  %4322 = vmatpush3.msra.mxu0 %v5921_v9 }
 0x63a   :  { %1547 = vmatprep.subr.mxu1 %v5924_v10  ;;  %4323 = vmatprep.subr.mxu0 %v7199_v40 }
 0x63b   :  { %1548 = vmatpush1.msra.mxu1 %v5928_v11  ;;  %4324 = vmatpush3.msra.mxu0 %v5931_v12 }
 0x63c   :  { %1549 = vmatprep.subr.mxu1 %v5934_v13  ;;  %4325 = vmatprep.subr.mxu0 %v7199_v40 }
 0x63d   :  { %1550 = vmatpush1.msra.mxu1 %v5938_v14  ;;  %4326 = vmatpush3.msra.mxu0 %v5941_v15 }
 0x63e   :  { %1551 = vmatprep.subr.mxu1 %v5944_v16  ;;  %4327 = vmatprep.subr.mxu0 %v7199_v40 }
 0x63f   :  { %1552 = vmatpush1.msra.mxu1 %v5948_v17  ;;  %4328 = vmatpush3.msra.mxu0 %v6037_v44 }
 0x640   :  { %1553 = vmatprep.subr.mxu1 %v5952_v18  ;;  %4329 = vmatprep.subr.mxu0 %v7199_v40 }
 0x641   :  { %1554 = vmatpush1.msra.mxu1 %v5956_v19  ;;  %4330 = vmatpush3.msra.mxu0 %v6043_v45 }
 0x642   :  { %1555 = vmatprep.subr.mxu1 %v6046_v57  ;;  %4331 = vmatprep.subr.mxu0 %v7199_v40 }
 0x643   :  { %1556 = vmatpush1.msra.mxu1 %v6050_v24  ;;  %4332 = vmatpush3.msra.mxu0 %v6053_v25 }
 0x644   :  { %1557 = vmatprep.subr.mxu1 %v6056_v26  ;;  %4333 = vmatprep.subr.mxu0 %v7199_v40 }
 0x645   :  { %1558 = vmatpush1.msra.mxu1 %v6060_v27  ;;  %4334 = vmatpush3.msra.mxu0 %v6063_v28 }
 0x646   :  { %1559 = vmatprep.subr.mxu1 %v6066_v29  ;;  %4335 = vmatprep.subr.mxu0 %v7199_v40 }
 0x647   :  { %1560 = vmatpush1.msra.mxu1 %v6070_v30  ;;  %4336 = vmatpush3.msra.mxu0 %v6073_v31 }
 0x648   :  { %1561 = vmatprep.subr.mxu1 %v6076_v32  ;;  %4337 = vmatprep.subr.mxu0 %v7199_v40 }
 0x649   :  { %1562 = vmatpush1.msra.mxu1 %v6080_v33  ;;  %4338 = vmatpush3.msra.mxu0 %v6083_v34 }
 0x64a   :  { %1563 = vmatprep.subr.mxu1 %v6086_v35  ;;  %4339 = vmatprep.subr.mxu0 %v7199_v40 }
 0x64b   :  { %1564 = vmatpush1.msra.mxu1 %v6090_v58  ;;  %4340 = vmatpush3.msra.mxu0 %v6093_v60 }
 0x64c   :  { %1565 = vmatprep.subr.mxu1 %v6096_v61  ;;  %4341 = vmatprep.subr.mxu0 %v7199_v40 }
 0x64d   :  { %1566 = vmatpush1.msra.mxu1 %v6100_v62  ;;  %1599 = vmatprep.mubr.f32.mxu1 %v7199_v40 }
 0x64e   :  { %4342 = vmatpush3.msra.mxu0 %v6104_v63  ;;  %4343 = vmatprep.mubr.msk.f32.mxu0 %vm5208_vm0, %v7199_v40 }
 0x64f   :  { %1712 = vmatprep.subr.mxu1 %v5987_v22  ;;  %4346 = vmatprep.subr.mxu0 %v7199_v40 }
 0x6ee   :  { %v1424_v1 = vpop.f32.mrf.mxu1  ;;  %v1495_v2 = vpop.f32.mrf.mxu0 }
 0x6ef   :  { %v1500_v20 = vrot.slane %v1424_v1, 3  ;;  %v1519_v60 = vadd.f32 %v1495_v2, %v5618_v56  ;;  %v1937_v2 = vld [vmem:[#allocation10 + $0x120] sm:$0xff] }
 0x6f0   :  { %v1426_v21 = vpop.f32.mrf.mxu1  ;;  %v4310_v23 = vpop.f32.mrf.mxu0 }
 0x6f1   :  { %v1502_v55 = vadd.f32 %v1500_v20, %v7205_v39  ;;  %v1510_v38 = vrot.slane %v1426_v21, 3  ;;  %v1521_v35 = vrot.slane %v1519_v60, 3  ;;  %v1938_v60 = vld [vmem:[#allocation10 + $0x128] sm:$0xff] }
 0x6f3   :  { %v3704_v49 = vmul.f32 -1.442695, %v1502_v55  ;;  %v1512_v53 = vadd.f32 %v1510_v38, %v7206_v50  ;;  %v1528_v55 = vrot.slane %v5996_v46, 7 }
 0x6f5   :  { %4796 = vpow2.f32 %v3704_v49  ;;  %v3705_v63 = vmul.f32 -1.442695, %v1512_v53  ;;  %v1935_v53 = vld [vmem:[#allocation10 + $0x110] sm:$0xff] }
 0x6f7   :  { %4798 = vpow2.f32 %v3705_v63 }
 0x702   :  { %v4797_v62 = vpop.eup %4796 }
 0x703   :  { %v1506_v61 = vadd.f32 1.0, %v4797_v62  ;;  %v1942_v62 = vld [vmem:[#allocation10 + $0x148] sm:$0xff] }
 0x704   :  { %v4799_v22 = vpop.eup %4798 }
 0x705   :  { %4800 = vrcp.f32 %v1506_v61  ;;  %v1516_v58 = vadd.f32 1.0, %v4799_v22  ;;  %v1939_v22 = vld [vmem:[#allocation10 + $0x130] sm:$0xff] }
 0x707   :  { %4802 = vrcp.f32 %v1516_v58  ;;  %v1940_v58 = vld [vmem:[#allocation10 + $0x138] sm:$0xff] }
 0x712   :  { %v4801_v1 = vpop.eup %4800 }
 0x713   :  { %v1523_v34 = vmul.f32 %v4801_v1, %v1521_v35  ;;  %v1934_v1 = vld [vmem:[#allocation10 + $0x108] sm:$0xff] }
 0x714   :  { %v4803_v21 = vpop.eup %4802 }
 0x715   :  { %v1524_v20 = vadd.f32 %v1523_v34, %v5623_v48  ;;  %v1526_v23 = vsub.f32 1.0, %v4803_v21  ;;  %v1530_v38 = vmul.f32 %v4803_v21, %v1528_v55  ;;  %v1945_v34 = vld [vmem:[#allocation10 + $0x160] sm:$0xff]  ;;  %v1936_v21 = vld [vmem:[#allocation10 + $0x118] sm:$0xff] }
 0x716   :  { %v1929_v55 = vld [vmem:[#allocation10 + $0xe0] sm:$0xff] }
 0x717   :  { %4804 = vtanh.f32 %v1524_v20  ;;  %v1932_v20 = vld [vmem:[#allocation10 + $0xf8] sm:$0xff] }
 0x724   :  { %v4805_v49 = vpop.eup %4804 }
 0x725   :  { %v1527_v63 = vmul.f32 %v4805_v49, %v1526_v23  ;;  %v1931_v23 = vld [vmem:[#allocation10 + $0xf0] sm:$0xff]  ;;  %v1933_v49 = vld [vmem:[#allocation10 + $0x100] sm:$0xff] }
 0x727   :  { %v6116_v61 = vadd.f32 %v1530_v38, %v1527_v63  ;;  %v1928_v63 = vld [vmem:[#allocation10 + $0xd8] sm:$0xff]  ;;  %v1926_v38 = vld [vmem:[#allocation10 + $0xc8] sm:$0xff] }
 0x729   :  { %v1533_v56 = vrot.slane %v6116_v61, 5  ;;  %v6122_v35 = vsel %vm1895_vm6, %v6002_v59, %v6116_v61 }
 0x72b   :  { %1600 = vmatmul.mubr.f32.vlgmr.msra.gmra.mxu1 %v1533_v56  ;;  %4344 = vmatmul.mubr.f32.vlgmr.msra.gmra.mxu0 %v1533_v56  ;;  %v1925_v56 = vld [vmem:[#allocation10 + $0xc0] sm:$0xff] }
 0x72c   :  { %1713 = vmatpush1.msra.mxu1 %v5868_v0  ;;  %4347 = vmatpush3.msra.mxu0 %v5871_v41  ;;  %v7229_v0 = vld [vmem:[#allocation32_spill] sm:$0xff]  ;;  %v7230_v41 = vld [vmem:[#allocation33_spill] sm:$0xff] }
 0x72d   :  { %1714 = vmatprep.subr.mxu1 %v5874_v51  ;;  %4348 = vmatprep.subr.mxu0 %v7199_v40  ;;  %v7231_v51 = vld [vmem:[#allocation25_spill] sm:$0xff] }
 0x72e   :  { %1715 = vmatpush1.msra.mxu1 %v5878_v47  ;;  %4349 = vmatpush3.msra.mxu0 %v5881_v54  ;;  %v7232_v47 = vld [vmem:[#allocation24_spill] sm:$0xff]  ;;  %v7233_v54 = vld [vmem:[#allocation26_spill] sm:$0xff] }
 0x72f   :  { %1716 = vmatprep.subr.mxu1 %v5884_v52  ;;  %4350 = vmatprep.subr.mxu0 %v7199_v40  ;;  %v7234_v52 = vld [vmem:[#allocation28_spill] sm:$0xff] }
 0x730   :  { %1717 = vmatpush1.msra.mxu1 %v5888_v43  ;;  %4351 = vmatpush3.msra.mxu0 %v5891_v42  ;;  %v7235_v43 = vld [vmem:[#allocation27_spill] sm:$0xff] }
 0x731   :  { %1718 = vmatprep.subr.mxu1 %v5894_v36  ;;  %4352 = vmatprep.subr.mxu0 %v7199_v40 }
 0x732   :  { %1719 = vmatpush1.msra.mxu1 %v5898_v37  ;;  %4353 = vmatpush3.msra.mxu0 %v5901_v3 }
 0x733   :  { %1720 = vmatprep.subr.mxu1 %v5904_v4  ;;  %4354 = vmatprep.subr.mxu0 %v7199_v40 }
 0x734   :  { %1721 = vmatpush1.msra.mxu1 %v5908_v5  ;;  %4355 = vmatpush3.msra.mxu0 %v5911_v6 }
 0x735   :  { %1722 = vmatprep.subr.mxu1 %v5914_v7  ;;  %4356 = vmatprep.subr.mxu0 %v7199_v40 }
 0x736   :  { %1723 = vmatpush1.msra.mxu1 %v5918_v8  ;;  %4357 = vmatpush3.msra.mxu0 %v5921_v9 }
 0x737   :  { %1724 = vmatprep.subr.mxu1 %v5924_v10  ;;  %4358 = vmatprep.subr.mxu0 %v7199_v40 }
 0x738   :  { %1725 = vmatpush1.msra.mxu1 %v5928_v11  ;;  %4359 = vmatpush3.msra.mxu0 %v5931_v12 }
 0x739   :  { %1726 = vmatprep.subr.mxu1 %v5934_v13  ;;  %4360 = vmatprep.subr.mxu0 %v7199_v40  ;;  %v6195_v13 = vld [vmem:[%s7117_s6] sm:$0x1] }
 0x73a   :  { %1727 = vmatpush1.msra.mxu1 %v5938_v14  ;;  %4361 = vmatpush3.msra.mxu0 %v5941_v15 }
 0x73b   :  { %1728 = vmatprep.subr.mxu1 %v5944_v16  ;;  %4362 = vmatprep.subr.mxu0 %v7199_v40 }
 0x73c   :  { %1729 = vmatpush1.msra.mxu1 %v5948_v17  ;;  %4363 = vmatpush3.msra.mxu0 %v6037_v44  ;;  %v1705_v44 = vrot.slane %v6116_v61, 7  ;;  %v1930_v61 = vld [vmem:[#allocation10 + $0xe8] sm:$0xff] }
 0x73d   :  { %1730 = vmatprep.subr.mxu1 %v5952_v18  ;;  %4364 = vmatprep.subr.mxu0 %v7199_v40 }
 0x73e   :  { %1731 = vmatpush1.msra.mxu1 %v5956_v19  ;;  %4365 = vmatpush3.msra.mxu0 %v6043_v45 }
 0x73f   :  { %1732 = vmatprep.subr.mxu1 %v6046_v57  ;;  %4366 = vmatprep.subr.mxu0 %v7199_v40 }
 0x740   :  { %1733 = vmatpush1.msra.mxu1 %v6050_v24  ;;  %4367 = vmatpush3.msra.mxu0 %v6053_v25 }
 0x741   :  { %1734 = vmatprep.subr.mxu1 %v6056_v26  ;;  %4368 = vmatprep.subr.mxu0 %v7199_v40 }
 0x742   :  { %1735 = vmatpush1.msra.mxu1 %v6060_v27  ;;  %4369 = vmatpush3.msra.mxu0 %v6063_v28  ;;  %v1947_v28 = vld [vmem:[#allocation10 + $0x170] sm:$0xff] }
 0x743   :  { %1736 = vmatprep.subr.mxu1 %v6066_v29  ;;  %4370 = vmatprep.subr.mxu0 %v7199_v40  ;;  %v1946_v29 = vld [vmem:[#allocation10 + $0x168] sm:$0xff] }
 0x744   :  { %1737 = vmatpush1.msra.mxu1 %v6070_v30  ;;  %4371 = vmatpush3.msra.mxu0 %v6073_v31  ;;  %v1944_v30 = vld [vmem:[#allocation10 + $0x158] sm:$0xff] }
 0x745   :  { %1738 = vmatprep.subr.mxu1 %v6076_v32  ;;  %4372 = vmatprep.subr.mxu0 %v7199_v40  ;;  %v1948_v31 = vld [vmem:[#allocation10 + $0x178] sm:$0xff]  ;;  %v1943_v32 = vld [vmem:[#allocation10 + $0x150] sm:$0xff] }
 0x746   :  { %1739 = vmatpush1.msra.mxu1 %v6080_v33  ;;  %4373 = vmatpush3.msra.mxu0 %v7229_v0  ;;  %v1941_v33 = vld [vmem:[#allocation10 + $0x140] sm:$0xff]  ;;  %v1927_v0 = vld [vmem:[#allocation10 + $0xd0] sm:$0xff] }
 0x747   :  { %1740 = vmatprep.subr.mxu1 %v7230_v41  ;;  %4374 = vmatprep.subr.mxu0 %v7199_v40  ;;  %v1922_v41 = vld [vmem:[#allocation10 + $0xa8] sm:$0xff] }
 0x748   :  { %1741 = vmatpush1.msra.mxu1 %v7231_v51  ;;  %4375 = vmatpush3.msra.mxu0 %v7232_v47  ;;  %v1920_v51 = vld [vmem:[#allocation10 + $0x98] sm:$0xff] }
 0x749   :  { %1742 = vmatprep.subr.mxu1 %v7233_v54  ;;  %4376 = vmatprep.subr.mxu0 %v7199_v40  ;;  %v1924_v47 = vld [vmem:[#allocation10 + $0xb8] sm:$0xff]  ;;  %v1919_v54 = vld [vmem:[#allocation10 + $0x90] sm:$0xff] }
 0x74a   :  { %1743 = vmatpush1.msra.mxu1 %v7234_v52  ;;  %1776 = vmatprep.mubr.f32.mxu1 %v7199_v40  ;;  %v1917_v52 = vld [vmem:[#allocation10 + $0x80] sm:$0xff] }
 0x74b   :  { %4377 = vmatpush3.msra.mxu0 %v7235_v43  ;;  %4378 = vmatprep.mubr.msk.f32.mxu0 %vm5208_vm0, %v7199_v40  ;;  %v1921_v43 = vld [vmem:[#allocation10 + $0xa0] sm:$0xff] }
 0x74c   :  { %4381 = vmatprep.subr.mxu0 %v7199_v40  ;;  %1966 = vmatprep.subr.mxu1 %v1947_v28 }
 0x7eb   :  { %v1601_v42 = vpop.f32.mrf.mxu1  ;;  %v1672_v36 = vpop.f32.mrf.mxu0 }
 0x7ec   :  { %v1677_v37 = vrot.slane %v1601_v42, 2  ;;  %v1696_v14 = vadd.f32 %v6195_v13, %v1672_v36  ;;  %v1916_v42 = vld [vmem:[#allocation10 + $0x78] sm:$0xff]  ;;  %v1914_v36 = vld [vmem:[#allocation10 + $0x68] sm:$0xff] }
 0x7ed   :  { %v1603_v3 = vpop.f32.mrf.mxu1  ;;  %v4345_v4 = vpop.f32.mrf.mxu0 }
 0x7ee   :  { %v1679_v5 = vadd.f32 %v1677_v37, %v7205_v39  ;;  %v1687_v7 = vrot.slane %v1603_v3, 2  ;;  %v1698_v16 = vrot.slane %v1696_v14, 2  ;;  %v1918_v37 = vld [vmem:[#allocation10 + $0x88] sm:$0xff]  ;;  %v1913_v3 = vld [vmem:[#allocation10 + $0x60] sm:$0xff]  ;;  %v1911_v4 = vld [vmem:[#allocation10 + $0x50] sm:$0xff] }
 0x7ef   :  { %v1902_v14 = vld [vmem:[#allocation10 + $0x8] sm:$0xff] }
 0x7f0   :  { %v3706_v6 = vmul.f32 -1.442695, %v1679_v5  ;;  %v1689_v8 = vadd.f32 %v1687_v7, %v7206_v50  ;;  %v1915_v5 = vld [vmem:[#allocation10 + $0x70] sm:$0xff]  ;;  %v1908_v7 = vld [vmem:[#allocation10 + $0x38] sm:$0xff] }
 0x7f2   :  { %4806 = vpow2.f32 %v3706_v6  ;;  %v3707_v9 = vmul.f32 -1.442695, %v1689_v8  ;;  %v1910_v6 = vld [vmem:[#allocation10 + $0x48] sm:$0xff]  ;;  %v1912_v8 = vld [vmem:[#allocation10 + $0x58] sm:$0xff] }
 0x7f4   :  { %4808 = vpow2.f32 %v3707_v9  ;;  %v1907_v9 = vld [vmem:[#allocation10 + $0x30] sm:$0xff] }
 0x7ff   :  { %v4807_v10 = vpop.eup %4806 }
 0x800   :  { %v1683_v11 = vadd.f32 1.0, %v4807_v10  ;;  %v1905_v10 = vld [vmem:[#allocation10 + $0x20] sm:$0xff] }
 0x801   :  { %v4809_v12 = vpop.eup %4808 }
 0x802   :  { %4810 = vrcp.f32 %v1683_v11  ;;  %v1693_v15 = vadd.f32 1.0, %v4809_v12  ;;  %v1909_v11 = vld [vmem:[#allocation10 + $0x40] sm:$0xff]  ;;  %v1904_v12 = vld [vmem:[#allocation10 + $0x18] sm:$0xff] }
 0x804   :  { %4812 = vrcp.f32 %v1693_v15  ;;  %v1906_v15 = vld [vmem:[#allocation10 + $0x28] sm:$0xff] }
 0x80f   :  { %v4811_v17 = vpop.eup %4810 }
 0x810   :  { %v1700_v18 = vmul.f32 %v4811_v17, %v1698_v16  ;;  %v1901_v16 = vld [vmem:[#allocation10] sm:$0xff]  ;;  %v1903_v17 = vld [vmem:[#allocation10 + $0x10] sm:$0xff] }
 0x811   :  { %v4813_v46 = vpop.eup %4812 }
 0x812   :  { %v1701_v19 = vadd.f32 %v1700_v18, %v5623_v48  ;;  %v1703_v59 = vsub.f32 1.0, %v4813_v46  ;;  %v1707_v24 = vmul.f32 %v4813_v46, %v1705_v44  ;;  %v6225_v18 = vld [vmem:[#allocation11 + $0x170] sm:$0xff] }
 0x813   :  { %7236 = vst [vmem:[#allocation29_spill] sm:$0xff] %v6225_v18 }
 0x814   :  { %4814 = vtanh.f32 %v1701_v19 }
 0x821   :  { %v4815_v45 = vpop.eup %4814 }
 0x822   :  { %v1704_v57 = vmul.f32 %v4815_v45, %v1703_v59 }
 0x824   :  { %v6200_v25 = vadd.f32 %v1707_v24, %v1704_v57 }
 0x826   :  { %v1710_v26 = vrot.slane %v6200_v25, 6  ;;  %v6206_v27 = vsel %vm1897_vm7, %v6122_v35, %v6200_v25  ;;  %v1923_v35 = vld [vmem:[#allocation10 + $0xb0] sm:$0xff] }
 0x828   :  { %1777 = vmatmul.mubr.f32.vlgmr.msra.gmra.mxu1 %v1710_v26  ;;  %4379 = vmatmul.mubr.f32.vlgmr.msra.gmra.mxu0 %v1710_v26 }
 0x829   :  { %2030 = vmatprep.mubr.f32.mxu1 %v7199_v40  ;;  %4413 = vmatprep.mubr.msk.f32.mxu0 %vm5208_vm0, %v7199_v40 }
 0x82a   :  { %1967 = vmatpush1.msra.mxu1 %v1946_v29  ;;  %4382 = vmatpush3.msra.mxu0 %v1948_v31 }
 0x82b   :  { %1968 = vmatprep.subr.mxu1 %v1944_v30  ;;  %4383 = vmatprep.subr.mxu0 %v7199_v40 }
 0x82c   :  { %1969 = vmatpush1.msra.mxu1 %v1943_v32  ;;  %4384 = vmatpush3.msra.mxu0 %v1945_v34 }
 0x82d   :  { %1970 = vmatprep.subr.mxu1 %v1941_v33  ;;  %4385 = vmatprep.subr.mxu0 %v7199_v40 }
 0x82e   :  { %1971 = vmatpush1.msra.mxu1 %v1940_v58  ;;  %4386 = vmatpush3.msra.mxu0 %v1942_v62 }
 0x82f   :  { %1972 = vmatprep.subr.mxu1 %v1938_v60  ;;  %4387 = vmatprep.subr.mxu0 %v7199_v40 }
 0x830   :  { %1973 = vmatpush1.msra.mxu1 %v1937_v2  ;;  %4388 = vmatpush3.msra.mxu0 %v1939_v22 }
 0x831   :  { %1974 = vmatprep.subr.mxu1 %v1935_v53  ;;  %4389 = vmatprep.subr.mxu0 %v7199_v40 }
 0x832   :  { %1975 = vmatpush1.msra.mxu1 %v1934_v1  ;;  %4390 = vmatpush3.msra.mxu0 %v1936_v21 }
 0x833   :  { %1976 = vmatprep.subr.mxu1 %v1932_v20  ;;  %4391 = vmatprep.subr.mxu0 %v7199_v40 }
 0x834   :  { %1977 = vmatpush1.msra.mxu1 %v1931_v23  ;;  %4392 = vmatpush3.msra.mxu0 %v1933_v49  ;;  %v6235_v23 = vld [vmem:[#allocation11 + $0x168] sm:$0xff]  ;;  %v6241_v49 = vld [vmem:[#allocation11 + $0x178] sm:$0xff] }
 0x835   :  { %1978 = vmatprep.subr.mxu1 %v1929_v55  ;;  %4393 = vmatprep.subr.mxu0 %v7199_v40  ;;  %v6239_v55 = vld [vmem:[#allocation11 + $0x158] sm:$0xff] }
 0x836   :  { %1979 = vmatpush1.msra.mxu1 %v1928_v63  ;;  %4394 = vmatpush3.msra.mxu0 %v1930_v61  ;;  %v6249_v63 = vld [vmem:[#allocation11 + $0x160] sm:$0xff]  ;;  %v6259_v61 = vld [vmem:[#allocation11 + $0x148] sm:$0xff] }
 0x837   :  { %1980 = vmatprep.subr.mxu1 %v1926_v38  ;;  %4395 = vmatprep.subr.mxu0 %v7199_v40  ;;  %v6256_v38 = vld [vmem:[#allocation11 + $0x128] sm:$0xff] }
 0x838   :  { %1981 = vmatpush1.msra.mxu1 %v1925_v56  ;;  %4396 = vmatpush3.msra.mxu0 %v1927_v0  ;;  %v6262_v56 = vld [vmem:[#allocation11 + $0x120] sm:$0xff]  ;;  %v6269_v0 = vld [vmem:[#allocation11 + $0x130] sm:$0xff] }
 0x839   :  { %1982 = vmatprep.subr.mxu1 %v1923_v35  ;;  %4397 = vmatprep.subr.mxu0 %v7199_v40  ;;  %v6266_v35 = vld [vmem:[#allocation11 + $0x110] sm:$0xff] }
 0x83a   :  { %1983 = vmatpush1.msra.mxu1 %v1922_v41  ;;  %4398 = vmatpush3.msra.mxu0 %v1924_v47  ;;  %v6272_v41 = vld [vmem:[#allocation11 + $0x108] sm:$0xff]  ;;  %v6279_v47 = vld [vmem:[#allocation11 + $0x118] sm:$0xff] }
 0x83b   :  { %1984 = vmatprep.subr.mxu1 %v1920_v51  ;;  %4399 = vmatprep.subr.mxu0 %v7199_v40  ;;  %v6276_v51 = vld [vmem:[#allocation11 + $0xf8] sm:$0xff] }
 0x83c   :  { %1985 = vmatpush1.msra.mxu1 %v1919_v54  ;;  %4400 = vmatpush3.msra.mxu0 %v1921_v43  ;;  %v6282_v54 = vld [vmem:[#allocation11 + $0xf0] sm:$0xff]  ;;  %v6289_v43 = vld [vmem:[#allocation11 + $0x100] sm:$0xff] }
 0x83d   :  { %1986 = vmatprep.subr.mxu1 %v1917_v52  ;;  %4401 = vmatprep.subr.mxu0 %v7199_v40  ;;  %v6286_v52 = vld [vmem:[#allocation11 + $0xe0] sm:$0xff] }
 0x83e   :  { %1987 = vmatpush1.msra.mxu1 %v1916_v42  ;;  %4402 = vmatpush3.msra.mxu0 %v1918_v37  ;;  %v6292_v42 = vld [vmem:[#allocation11 + $0xd8] sm:$0xff]  ;;  %v6299_v37 = vld [vmem:[#allocation11 + $0xe8] sm:$0xff] }
 0x83f   :  { %1988 = vmatprep.subr.mxu1 %v1914_v36  ;;  %4403 = vmatprep.subr.mxu0 %v7199_v40  ;;  %v6296_v36 = vld [vmem:[#allocation11 + $0xc8] sm:$0xff] }
 0x840   :  { %1989 = vmatpush1.msra.mxu1 %v1913_v3  ;;  %4404 = vmatpush3.msra.mxu0 %v1915_v5  ;;  %v6302_v3 = vld [vmem:[#allocation11 + $0xc0] sm:$0xff]  ;;  %v6309_v5 = vld [vmem:[#allocation11 + $0xd0] sm:$0xff] }
 0x841   :  { %1990 = vmatprep.subr.mxu1 %v1911_v4  ;;  %4405 = vmatprep.subr.mxu0 %v7199_v40  ;;  %v6306_v4 = vld [vmem:[#allocation11 + $0xb0] sm:$0xff] }
 0x842   :  { %1991 = vmatpush1.msra.mxu1 %v1910_v6  ;;  %4406 = vmatpush3.msra.mxu0 %v1912_v8  ;;  %v6312_v6 = vld [vmem:[#allocation11 + $0xa8] sm:$0xff]  ;;  %v6319_v8 = vld [vmem:[#allocation11 + $0xb8] sm:$0xff] }
 0x843   :  { %1992 = vmatprep.subr.mxu1 %v1908_v7  ;;  %4407 = vmatprep.subr.mxu0 %v7199_v40  ;;  %v6316_v7 = vld [vmem:[#allocation11 + $0x98] sm:$0xff] }
 0x844   :  { %1993 = vmatpush1.msra.mxu1 %v1907_v9  ;;  %4408 = vmatpush3.msra.mxu0 %v1909_v11  ;;  %v6322_v9 = vld [vmem:[#allocation11 + $0x90] sm:$0xff]  ;;  %v6329_v11 = vld [vmem:[#allocation11 + $0xa0] sm:$0xff] }
 0x845   :  { %1994 = vmatprep.subr.mxu1 %v1905_v10  ;;  %4409 = vmatprep.subr.mxu0 %v7199_v40  ;;  %v6326_v10 = vld [vmem:[#allocation11 + $0x80] sm:$0xff] }
 0x846   :  { %1995 = vmatpush1.msra.mxu1 %v1904_v12  ;;  %4410 = vmatpush3.msra.mxu0 %v1906_v15  ;;  %v6332_v12 = vld [vmem:[#allocation11 + $0x78] sm:$0xff]  ;;  %v6339_v15 = vld [vmem:[#allocation11 + $0x88] sm:$0xff] }
 0x847   :  { %1996 = vmatprep.subr.mxu1 %v1902_v14  ;;  %4411 = vmatprep.subr.mxu0 %v7199_v40  ;;  %v6336_v14 = vld [vmem:[#allocation11 + $0x68] sm:$0xff] }
 0x848   :  { %1997 = vmatpush1.msra.mxu1 %v1901_v16  ;;  %4412 = vmatpush3.msra.mxu0 %v1903_v17  ;;  %v6342_v16 = vld [vmem:[#allocation11 + $0x60] sm:$0xff]  ;;  %v6346_v17 = vld [vmem:[#allocation11 + $0x50] sm:$0xff] }
 0x849   :  { %2157 = vmatprep.subr.mxu1 %v6225_v18  ;;  %4416 = vmatprep.subr.mxu0 %v7199_v40 }
 0x8e8   :  { %v1778_v19 = vpop.f32.mrf.mxu1  ;;  %v1849_v46 = vpop.f32.mrf.mxu0 }
 0x8e9   :  { %v1854_v59 = vrot.slane %v1778_v19, 1  ;;  %v1873_v33 = vadd.f32 %v6195_v13, %v1849_v46  ;;  %v6349_v19 = vld [vmem:[#allocation11 + $0x70] sm:$0xff]  ;;  %v6352_v46 = vld [vmem:[#allocation11 + $0x48] sm:$0xff] }
 0x8ea   :  { %v1780_v44 = vpop.f32.mrf.mxu1  ;;  %v4380_v45 = vpop.f32.mrf.mxu0 }
 0x8eb   :  { %v1856_v57 = vadd.f32 %v1854_v59, %v7205_v39  ;;  %v1864_v26 = vrot.slane %v1780_v44, 1  ;;  %v1875_v58 = vrot.slane %v1873_v33, 1  ;;  %v6356_v59 = vld [vmem:[#allocation11 + $0x38] sm:$0xff]  ;;  %v6362_v45 = vld [vmem:[#allocation11 + $0x30] sm:$0xff] }
 0x8ec   :  { %v6359_v44 = vld [vmem:[#allocation11 + $0x58] sm:$0xff] }
 0x8ed   :  { %v3708_v24 = vmul.f32 -1.442695, %v1856_v57  ;;  %v1866_v28 = vadd.f32 %v1864_v26, %v7206_v50  ;;  %v1882_v50 = vrot.slane %v6200_v25, 7  ;;  %v6246_v25 = vld [vmem:[#allocation11 + $0x140] sm:$0xff]  ;;  %v6372_v26 = vld [vmem:[#allocation11 + $0x18] sm:$0xff] }
 0x8ee   :  { %v6366_v57 = vld [vmem:[#allocation11 + $0x20] sm:$0xff]  ;;  %7239 = vst [vmem:[#allocation32_spill] sm:$0xff] %v6372_v26 }
 0x8ef   :  { %4816 = vpow2.f32 %v3708_v24  ;;  %v3709_v29 = vmul.f32 -1.442695, %v1866_v28  ;;  %7237 = vst [vmem:[#allocation30_spill] sm:$0xff] %v6366_v57  ;;  %v6369_v24 = vld [vmem:[#allocation11 + $0x40] sm:$0xff]  ;;  %v6376_v28 = vld [vmem:[#allocation11 + $0x8] sm:$0xff] }
 0x8f0   :  { %7238 = vst [vmem:[#allocation23_spill] sm:$0xff] %v6369_v24  ;;  %7240 = vst [vmem:[#allocation33_spill] sm:$0xff] %v6376_v28 }
 0x8f1   :  { %4818 = vpow2.f32 %v3709_v29  ;;  %v6379_v29 = vld [vmem:[#allocation11 + $0x28] sm:$0xff] }
 0x8f2   :  { %7241 = vst [vmem:[#allocation25_spill] sm:$0xff] %v6379_v29 }
 0x8fc   :  { %v4817_v30 = vpop.eup %4816 }
 0x8fd   :  { %v1860_v31 = vadd.f32 1.0, %v4817_v30  ;;  %v6382_v30 = vld [vmem:[#allocation11] sm:$0xff] }
 0x8fe   :  { %v4819_v32 = vpop.eup %4818  ;;  %7242 = vst [vmem:[#allocation24_spill] sm:$0xff] %v6382_v30 }
 0x8ff   :  { %4820 = vrcp.f32 %v1860_v31  ;;  %v1870_v34 = vadd.f32 1.0, %v4819_v32  ;;  %v6389_v31 = vld [vmem:[%s7124_s13 + $0x1] sm:$0x1]  ;;  %v6392_v32 = vld [vmem:[#allocation11 + $0x10] sm:$0xff] }
 0x900   :  { %7243 = vst [vmem:[#allocation26_spill] sm:$0xff] %v6392_v32 }
 0x901   :  { %4822 = vrcp.f32 %v1870_v34 }
 0x90c   :  { %v4821_v60 = vpop.eup %4820 }
 0x90d   :  { %v1877_v62 = vmul.f32 %v4821_v60, %v1875_v58  ;;  %v1949_v58 = vld [vmem:[%s7120_s9] sm:$0x7] }
 0x90e   :  { %v4823_v2 = vpop.eup %4822 }
 0x90f   :  { %v1878_v39 = vadd.f32 %v1877_v62, %v5623_v48  ;;  %v1880_v53 = vsub.f32 1.0, %v4823_v2  ;;  %v1884_v20 = vmul.f32 %v4823_v2, %v1882_v50  ;;  %v6243_v48 = vld [vmem:[#allocation11 + $0x150] sm:$0xff] }
 0x910   :  { %v7244_v62 = vld [vmem:[#allocation31_spill] sm:$0xff] }
 0x911   :  { %4824 = vtanh.f32 %v1878_v39  ;;  %v7245_v39 = vsub.s32 0, %v7244_v62 }
 0x913   :  { %v1954_v2 = vrot.slane %v1949_v58, %v7245_v39 }
 0x91e   :  { %v4825_v22 = vpop.eup %4824 }
 0x91f   :  { %v1881_v1 = vmul.f32 %v4825_v22, %v1880_v53 }
 0x921   :  { %v1885_v21 = vadd.f32 %v1884_v20, %v1881_v1  ;;  %v7247_v1 = vsub.s32 1, %v7244_v62 }
 0x923   :  { %v1900_v13 = vsel %vm1899_vm8, %v6206_v27, %v1885_v21  ;;  %1886 = vst [vmem:[#allocation15 - $0x7] sm:$0x80] %v1885_v21  ;;  %v6252_v27 = vld [vmem:[#allocation11 + $0x138] sm:$0xff]  ;;  %v1958_v20 = vrot.slane %v1949_v58, %v7247_v1 }
 0x924   :  { %2031 = vmatmul.mubr.f32.vlgmr.msra.gmra.mxu1 %v1900_v13  ;;  %4414 = vmatmul.mubr.f32.vlgmr.msra.gmra.mxu0 %v1900_v13  ;;  %v6488_v1 = vld [vmem:[%s7121_s10] sm:$0x1] }
 0x925   :  { %2158 = vmatpush1.msra.mxu1 %v6235_v23  ;;  %2221 = vmatprep.mubr.f32.mxu1 %v7199_v40 }
 0x926   :  { %2159 = vmatprep.subr.mxu1 %v6239_v55  ;;  %4417 = vmatpush3.msra.mxu0 %v6241_v49 }
 0x927   :  { %2160 = vmatpush1.msra.mxu1 %v6243_v48  ;;  %4418 = vmatprep.subr.mxu0 %v7199_v40 }
 0x928   :  { %2161 = vmatprep.subr.mxu1 %v6246_v25  ;;  %4419 = vmatpush3.msra.mxu0 %v6249_v63 }
 0x929   :  { %2162 = vmatpush1.msra.mxu1 %v6252_v27  ;;  %4420 = vmatprep.subr.mxu0 %v7199_v40 }
 0x92a   :  { %2163 = vmatprep.subr.mxu1 %v6256_v38  ;;  %4421 = vmatpush3.msra.mxu0 %v6259_v61 }
 0x92b   :  { %2164 = vmatpush1.msra.mxu1 %v6262_v56  ;;  %4422 = vmatprep.subr.mxu0 %v7199_v40 }
 0x92c   :  { %2165 = vmatprep.subr.mxu1 %v6266_v35  ;;  %4423 = vmatpush3.msra.mxu0 %v6269_v0 }
 0x92d   :  { %2166 = vmatpush1.msra.mxu1 %v6272_v41  ;;  %4424 = vmatprep.subr.mxu0 %v7199_v40 }
 0x92e   :  { %2167 = vmatprep.subr.mxu1 %v6276_v51  ;;  %4425 = vmatpush3.msra.mxu0 %v6279_v47 }
 0x92f   :  { %2168 = vmatpush1.msra.mxu1 %v6282_v54  ;;  %4426 = vmatprep.subr.mxu0 %v7199_v40 }
 0x930   :  { %2169 = vmatprep.subr.mxu1 %v6286_v52  ;;  %4427 = vmatpush3.msra.mxu0 %v6289_v43 }
 0x931   :  { %2170 = vmatpush1.msra.mxu1 %v6292_v42  ;;  %4428 = vmatprep.subr.mxu0 %v7199_v40 }
 0x932   :  { %2171 = vmatprep.subr.mxu1 %v6296_v36  ;;  %4429 = vmatpush3.msra.mxu0 %v6299_v37 }
 0x933   :  { %2172 = vmatpush1.msra.mxu1 %v6302_v3  ;;  %4430 = vmatprep.subr.mxu0 %v7199_v40 }
 0x934   :  { %2173 = vmatprep.subr.mxu1 %v6306_v4  ;;  %4431 = vmatpush3.msra.mxu0 %v6309_v5 }
 0x935   :  { %2174 = vmatpush1.msra.mxu1 %v6312_v6  ;;  %4432 = vmatprep.subr.mxu0 %v7199_v40 }
 0x936   :  { %2175 = vmatprep.subr.mxu1 %v6316_v7  ;;  %4433 = vmatpush3.msra.mxu0 %v6319_v8 }
 0x937   :  { %2176 = vmatpush1.msra.mxu1 %v6322_v9  ;;  %4434 = vmatprep.subr.mxu0 %v7199_v40 }
 0x938   :  { %2177 = vmatprep.subr.mxu1 %v6326_v10  ;;  %4435 = vmatpush3.msra.mxu0 %v6329_v11 }
 0x939   :  { %2178 = vmatpush1.msra.mxu1 %v6332_v12  ;;  %4436 = vmatprep.subr.mxu0 %v7199_v40 }
 0x93a   :  { %2179 = vmatprep.subr.mxu1 %v6336_v14  ;;  %4437 = vmatpush3.msra.mxu0 %v6339_v15 }
 0x93b   :  { %2180 = vmatpush1.msra.mxu1 %v6342_v16  ;;  %4438 = vmatprep.subr.mxu0 %v7199_v40 }
 0x93c   :  { %2181 = vmatprep.subr.mxu1 %v6346_v17  ;;  %4439 = vmatpush3.msra.mxu0 %v6349_v19 }
 0x93d   :  { %2182 = vmatpush1.msra.mxu1 %v6352_v46  ;;  %4440 = vmatprep.subr.mxu0 %v7199_v40 }
 0x93e   :  { %2183 = vmatprep.subr.mxu1 %v6356_v59  ;;  %4441 = vmatpush3.msra.mxu0 %v6359_v44 }
 0x93f   :  { %2184 = vmatpush1.msra.mxu1 %v6362_v45  ;;  %4442 = vmatprep.subr.mxu0 %v7199_v40 }
 0x940   :  { %2185 = vmatprep.subr.mxu1 %v6366_v57  ;;  %4443 = vmatpush3.msra.mxu0 %v6369_v24 }
 0x941   :  { %2186 = vmatpush1.msra.mxu1 %v6372_v26  ;;  %4444 = vmatprep.subr.mxu0 %v7199_v40 }
 0x942   :  { %2187 = vmatprep.subr.mxu1 %v6376_v28  ;;  %4445 = vmatpush3.msra.mxu0 %v6379_v29 }
 0x943   :  { %2188 = vmatpush1.msra.mxu1 %v6382_v30  ;;  %4446 = vmatprep.subr.mxu0 %v7199_v40 }
 0x944   :  { %2222 = vmatmul.mubr.f32.vlgmr.msra.gmra.mxu1 %v6389_v31  ;;  %4447 = vmatpush3.msra.mxu0 %v6392_v32 }
 0x945   :  { %4448 = vmatprep.mubr.msk.f32.mxu0 %vm5208_vm0, %v7199_v40  ;;  %2320 = vmatprep.subr.mxu1 %v6225_v18 }
 0x946   :  { %4449 = vmatmul.mubr.f32.vlgmr.msra.gmra.mxu0 %v6389_v31  ;;  %4451 = vmatprep.subr.mxu0 %v7199_v40 }
 0x947   :  { %2321 = vmatpush1.msra.mxu1 %v6235_v23  ;;  %4452 = vmatpush3.msra.mxu0 %v6241_v49 }
 0x948   :  { %2322 = vmatprep.subr.mxu1 %v6239_v55  ;;  %4453 = vmatprep.subr.mxu0 %v7199_v40 }
 0x949   :  { %2323 = vmatpush1.msra.mxu1 %v6243_v48  ;;  %4454 = vmatpush3.msra.mxu0 %v6249_v63 }
 0x94a   :  { %2324 = vmatprep.subr.mxu1 %v6246_v25  ;;  %4455 = vmatprep.subr.mxu0 %v7199_v40 }
 0x94b   :  { %2325 = vmatpush1.msra.mxu1 %v6252_v27  ;;  %4456 = vmatpush3.msra.mxu0 %v6259_v61 }
 0x94c   :  { %2326 = vmatprep.subr.mxu1 %v6256_v38  ;;  %4457 = vmatprep.subr.mxu0 %v7199_v40 }
 0x94d   :  { %2327 = vmatpush1.msra.mxu1 %v6262_v56  ;;  %4458 = vmatpush3.msra.mxu0 %v6269_v0 }
 0x94e   :  { %2328 = vmatprep.subr.mxu1 %v6266_v35  ;;  %4459 = vmatprep.subr.mxu0 %v7199_v40 }
 0x94f   :  { %2329 = vmatpush1.msra.mxu1 %v6272_v41  ;;  %4460 = vmatpush3.msra.mxu0 %v6279_v47 }
 0x950   :  { %2330 = vmatprep.subr.mxu1 %v6276_v51  ;;  %4461 = vmatprep.subr.mxu0 %v7199_v40 }
 0x951   :  { %2331 = vmatpush1.msra.mxu1 %v6282_v54  ;;  %4462 = vmatpush3.msra.mxu0 %v6289_v43 }
 0x952   :  { %2332 = vmatprep.subr.mxu1 %v6286_v52  ;;  %4463 = vmatprep.subr.mxu0 %v7199_v40 }
 0x953   :  { %2333 = vmatpush1.msra.mxu1 %v6292_v42  ;;  %4464 = vmatpush3.msra.mxu0 %v6299_v37 }
 0x954   :  { %2334 = vmatprep.subr.mxu1 %v6296_v36  ;;  %4465 = vmatprep.subr.mxu0 %v7199_v40 }
 0x955   :  { %2335 = vmatpush1.msra.mxu1 %v6302_v3  ;;  %4466 = vmatpush3.msra.mxu0 %v6309_v5 }
 0x956   :  { %2336 = vmatprep.subr.mxu1 %v6306_v4  ;;  %4467 = vmatprep.subr.mxu0 %v7199_v40 }
 0x957   :  { %2337 = vmatpush1.msra.mxu1 %v6312_v6  ;;  %4468 = vmatpush3.msra.mxu0 %v6319_v8 }
 0x958   :  { %2338 = vmatprep.subr.mxu1 %v6316_v7  ;;  %4469 = vmatprep.subr.mxu0 %v7199_v40 }
 0x959   :  { %2339 = vmatpush1.msra.mxu1 %v6322_v9  ;;  %4470 = vmatpush3.msra.mxu0 %v6329_v11 }
 0x95a   :  { %2340 = vmatprep.subr.mxu1 %v6326_v10  ;;  %4471 = vmatprep.subr.mxu0 %v7199_v40 }
 0x95b   :  { %2341 = vmatpush1.msra.mxu1 %v6332_v12  ;;  %4472 = vmatpush3.msra.mxu0 %v6339_v15 }
 0x95c   :  { %2342 = vmatprep.subr.mxu1 %v6336_v14  ;;  %4473 = vmatprep.subr.mxu0 %v7199_v40 }
 0x95d   :  { %2343 = vmatpush1.msra.mxu1 %v6342_v16  ;;  %4474 = vmatpush3.msra.mxu0 %v6349_v19 }
 0x95e   :  { %2344 = vmatprep.subr.mxu1 %v6346_v17  ;;  %4475 = vmatprep.subr.mxu0 %v7199_v40 }
 0x95f   :  { %2345 = vmatpush1.msra.mxu1 %v6352_v46  ;;  %4476 = vmatpush3.msra.mxu0 %v6359_v44 }
 0x960   :  { %2346 = vmatprep.subr.mxu1 %v6356_v59  ;;  %4477 = vmatprep.subr.mxu0 %v7199_v40 }
 0x961   :  { %2347 = vmatpush1.msra.mxu1 %v6362_v45  ;;  %4478 = vmatpush3.msra.mxu0 %v6369_v24 }
 0x962   :  { %2348 = vmatprep.subr.mxu1 %v6366_v57  ;;  %4479 = vmatprep.subr.mxu0 %v7199_v40 }
 0x963   :  { %2349 = vmatpush1.msra.mxu1 %v6372_v26  ;;  %4480 = vmatpush3.msra.mxu0 %v6379_v29 }
 0x964   :  { %2350 = vmatprep.subr.mxu1 %v6376_v28  ;;  %4481 = vmatprep.subr.mxu0 %v7199_v40 }
 0x965   :  { %2351 = vmatpush1.msra.mxu1 %v6382_v30  ;;  %2384 = vmatprep.mubr.f32.mxu1 %v7199_v40 }
 0x966   :  { %4482 = vmatpush3.msra.mxu0 %v6392_v32  ;;  %4483 = vmatprep.mubr.msk.f32.mxu0 %vm5208_vm0, %v7199_v40 }
 0x967   :  { %2498 = vmatprep.subr.mxu1 %v6225_v18  ;;  %4486 = vmatprep.subr.mxu0 %v7199_v40 }
 0x9e4   :  { %v2103_v33 = vpop.f32.mrf.mxu0  ;;  %v2032_v60 = vpop.f32.mrf.mxu1 }
 0x9e5   :  { %v6477_v50 = vadd.f32 %v2032_v60, %v1954_v2 }
 0x9e6   :  { %v4415_v34 = vpop.f32.mrf.mxu0  ;;  %v2034_v53 = vpop.f32.mrf.mxu1 }
 0x9e7   :  { %7246 = vst [vmem:[#allocation28_spill] sm:$0xff] %v6477_v50  ;;  %v6482_v30 = vadd.f32 %v2034_v53, %v1958_v20 }
 0x9e9   :  { %7248 = vst [vmem:[#allocation27_spill] sm:$0xff] %v6482_v30 }
 0xa04   :  { %v2223_v22 = vpop.f32.mrf.mxu1 }
 0xa05   :  { %v2298_v21 = vadd.f32 %v2223_v22, %v6477_v50  ;;  %v7249_v22 = vsub.s32 2, %v7244_v62  ;;  %v7254_v62 = vld [vmem:[#allocation26_spill] sm:$0xff] }
 0xa06   :  { %v2294_v13 = vpop.f32.mrf.mxu0  ;;  %v2225_v34 = vpop.f32.mrf.mxu1 }
 0xa07   :  { %v3710_v18 = vmul.f32 -1.442695, %v2298_v21  ;;  %v2305_v28 = vadd.f32 %v2225_v34, %v6482_v30  ;;  %v1962_v21 = vrot.slane %v1949_v58, %v7249_v22  ;;  %v2312_v53 = vadd.f32 %v2294_v13, %v6488_v1  ;;  %v7253_v58 = vld [vmem:[#allocation24_spill] sm:$0xff] }
 0xa08   :  { %v4450_v32 = vpop.f32.mrf.mxu0 }
 0xa09   :  { %4826 = vpow2.f32 %v3710_v18  ;;  %v3711_v29 = vmul.f32 -1.442695, %v2305_v28  ;;  %v6493_v20 = vadd.f32 %v2103_v33, %v1962_v21  ;;  %v7252_v33 = vld [vmem:[#allocation33_spill] sm:$0xff] }
 0xa0b   :  { %4828 = vpow2.f32 %v3711_v29 }
 0xa16   :  { %v4827_v39 = vpop.eup %4826 }
 0xa17   :  { %v2302_v60 = vadd.f32 1.0, %v4827_v39 }
 0xa18   :  { %v4829_v2 = vpop.eup %4828 }
 0xa19   :  { %4830 = vrcp.f32 %v2302_v60  ;;  %v2309_v32 = vadd.f32 1.0, %v4829_v2 }
 0xa1b   :  { %4832 = vrcp.f32 %v2309_v32 }
 0xa26   :  { %v4831_v18 = vpop.eup %4830 }
 0xa27   :  { %v2313_v28 = vmul.f32 %v4831_v18, %v2312_v53  ;;  %v7256_v53 = vld [vmem:[#allocation28_spill] sm:$0xff] }
 0xa28   :  { %v4833_v34 = vpop.eup %4832 }
 0xa29   :  { %v2314_v29 = vadd.f32 %v2313_v28, %v6493_v20  ;;  %v2316_v39 = vsub.f32 1.0, %v4833_v34  ;;  %v2318_v50 = vmul.f32 %v4833_v34, %v6389_v31  ;;  %v7251_v31 = vld [vmem:[#allocation25_spill] sm:$0xff]  ;;  %v7257_v34 = vld [vmem:[#allocation27_spill] sm:$0xff] }
 0xa2b   :  { %4834 = vtanh.f32 %v2314_v29 }
 0xa38   :  { %v4835_v60 = vpop.eup %4834 }
 0xa39   :  { %v2317_v30 = vmul.f32 %v4835_v60, %v2316_v39 }
 0xa3b   :  { %v6497_v26 = vadd.f32 %v2318_v50, %v2317_v30  ;;  %v7250_v30 = vld [vmem:[#allocation32_spill] sm:$0xff]  ;;  %v7255_v50 = vld [vmem:[#allocation29_spill] sm:$0xff] }
 0xa3d   :  { %2385 = vmatmul.mubr.f32.vlgmr.msra.gmra.mxu1 %v6497_v26  ;;  %4484 = vmatmul.mubr.f32.vlgmr.msra.gmra.mxu0 %v6497_v26 }
 0xa3e   :  { %2499 = vmatpush1.msra.mxu1 %v6235_v23  ;;  %4487 = vmatpush3.msra.mxu0 %v6241_v49 }
 0xa3f   :  { %2500 = vmatprep.subr.mxu1 %v6239_v55  ;;  %4488 = vmatprep.subr.mxu0 %v7199_v40 }
 0xa40   :  { %2501 = vmatpush1.msra.mxu1 %v6243_v48  ;;  %4489 = vmatpush3.msra.mxu0 %v6249_v63 }
 0xa41   :  { %2502 = vmatprep.subr.mxu1 %v6246_v25  ;;  %4490 = vmatprep.subr.mxu0 %v7199_v40 }
 0xa42   :  { %2503 = vmatpush1.msra.mxu1 %v6252_v27  ;;  %4491 = vmatpush3.msra.mxu0 %v6259_v61 }
 0xa43   :  { %2504 = vmatprep.subr.mxu1 %v6256_v38  ;;  %4492 = vmatprep.subr.mxu0 %v7199_v40 }
 0xa44   :  { %2505 = vmatpush1.msra.mxu1 %v6262_v56  ;;  %4493 = vmatpush3.msra.mxu0 %v6269_v0 }
 0xa45   :  { %2506 = vmatprep.subr.mxu1 %v6266_v35  ;;  %4494 = vmatprep.subr.mxu0 %v7199_v40 }
 0xa46   :  { %2507 = vmatpush1.msra.mxu1 %v6272_v41  ;;  %4495 = vmatpush3.msra.mxu0 %v6279_v47 }
 0xa47   :  { %2508 = vmatprep.subr.mxu1 %v6276_v51  ;;  %4496 = vmatprep.subr.mxu0 %v7199_v40 }
 0xa48   :  { %2509 = vmatpush1.msra.mxu1 %v6282_v54  ;;  %4497 = vmatpush3.msra.mxu0 %v6289_v43 }
 0xa49   :  { %2510 = vmatprep.subr.mxu1 %v6286_v52  ;;  %4498 = vmatprep.subr.mxu0 %v7199_v40 }
 0xa4a   :  { %2511 = vmatpush1.msra.mxu1 %v6292_v42  ;;  %4499 = vmatpush3.msra.mxu0 %v6299_v37 }
 0xa4b   :  { %2512 = vmatprep.subr.mxu1 %v6296_v36  ;;  %4500 = vmatprep.subr.mxu0 %v7199_v40 }
 0xa4c   :  { %2513 = vmatpush1.msra.mxu1 %v6302_v3  ;;  %4501 = vmatpush3.msra.mxu0 %v6309_v5 }
 0xa4d   :  { %2514 = vmatprep.subr.mxu1 %v6306_v4  ;;  %4502 = vmatprep.subr.mxu0 %v7199_v40 }
 0xa4e   :  { %2515 = vmatpush1.msra.mxu1 %v6312_v6  ;;  %4503 = vmatpush3.msra.mxu0 %v6319_v8 }
 0xa4f   :  { %2516 = vmatprep.subr.mxu1 %v6316_v7  ;;  %4504 = vmatprep.subr.mxu0 %v7199_v40 }
 0xa50   :  { %2517 = vmatpush1.msra.mxu1 %v6322_v9  ;;  %4505 = vmatpush3.msra.mxu0 %v6329_v11 }
 0xa51   :  { %2518 = vmatprep.subr.mxu1 %v6326_v10  ;;  %4506 = vmatprep.subr.mxu0 %v7199_v40 }
 0xa52   :  { %2519 = vmatpush1.msra.mxu1 %v6332_v12  ;;  %4507 = vmatpush3.msra.mxu0 %v6339_v15 }
 0xa53   :  { %2520 = vmatprep.subr.mxu1 %v6336_v14  ;;  %4508 = vmatprep.subr.mxu0 %v7199_v40 }
 0xa54   :  { %2521 = vmatpush1.msra.mxu1 %v6342_v16  ;;  %4509 = vmatpush3.msra.mxu0 %v6349_v19 }
 0xa55   :  { %2522 = vmatprep.subr.mxu1 %v6346_v17  ;;  %4510 = vmatprep.subr.mxu0 %v7199_v40 }
 0xa56   :  { %2523 = vmatpush1.msra.mxu1 %v6352_v46  ;;  %4511 = vmatpush3.msra.mxu0 %v6359_v44 }
 0xa57   :  { %2524 = vmatprep.subr.mxu1 %v6356_v59  ;;  %4512 = vmatprep.subr.mxu0 %v7199_v40 }
 0xa58   :  { %2525 = vmatpush1.msra.mxu1 %v6362_v45  ;;  %4513 = vmatpush3.msra.mxu0 %v6369_v24 }
 0xa59   :  { %2526 = vmatprep.subr.mxu1 %v6366_v57  ;;  %4514 = vmatprep.subr.mxu0 %v7199_v40 }
 0xa5a   :  { %2527 = vmatpush1.msra.mxu1 %v7250_v30  ;;  %4515 = vmatpush3.msra.mxu0 %v7251_v31 }
 0xa5b   :  { %2528 = vmatprep.subr.mxu1 %v7252_v33  ;;  %4516 = vmatprep.subr.mxu0 %v7199_v40 }
 0xa5c   :  { %2529 = vmatpush1.msra.mxu1 %v7253_v58  ;;  %2562 = vmatprep.mubr.f32.mxu1 %v7199_v40 }
 0xa5d   :  { %4517 = vmatpush3.msra.mxu0 %v7254_v62  ;;  %4518 = vmatprep.mubr.msk.f32.mxu0 %vm5208_vm0, %v7199_v40 }
 0xa5e   :  { %2675 = vmatprep.subr.mxu1 %v7255_v50  ;;  %4521 = vmatprep.subr.mxu0 %v7199_v40 }
 0xafd   :  { %v2386_v13 = vpop.f32.mrf.mxu1  ;;  %v2457_v2 = vpop.f32.mrf.mxu0 }
 0xafe   :  { %v2462_v22 = vrot.slane %v2386_v13, 7  ;;  %v2481_v33 = vadd.f32 %v2457_v2, %v6488_v1  ;;  %v7263_v2 = vld [vmem:[#allocation26_spill] sm:$0xff] }
 0xaff   :  { %v2388_v21 = vpop.f32.mrf.mxu1  ;;  %v4485_v32 = vpop.f32.mrf.mxu0 }
 0xb00   :  { %v2464_v18 = vadd.f32 %v2462_v22, %v7256_v53  ;;  %v2472_v29 = vrot.slane %v2388_v21, 7  ;;  %v2483_v30 = vrot.slane %v2481_v33, 7  ;;  %v2491_v32 = vrot.slane %v6497_v26, 7  ;;  %v7261_v33 = vld [vmem:[#allocation33_spill] sm:$0xff] }
 0xb02   :  { %v3712_v28 = vmul.f32 -1.442695, %v2464_v18  ;;  %v2474_v39 = vadd.f32 %v2472_v29, %v7257_v34 }
 0xb04   :  { %4836 = vpow2.f32 %v3712_v28  ;;  %v3713_v60 = vmul.f32 -1.442695, %v2474_v39 }
 0xb06   :  { %4838 = vpow2.f32 %v3713_v60  ;;  %v7264_v60 = vld [vmem:[#allocation29_spill] sm:$0xff] }
 0xb11   :  { %v4837_v62 = vpop.eup %4836 }
 0xb12   :  { %v2468_v58 = vadd.f32 1.0, %v4837_v62 }
 0xb13   :  { %v4839_v50 = vpop.eup %4838 }
 0xb14   :  { %4840 = vrcp.f32 %v2468_v58  ;;  %v2478_v31 = vadd.f32 1.0, %v4839_v50  ;;  %v7262_v50 = vld [vmem:[#allocation24_spill] sm:$0xff] }
 0xb16   :  { %4842 = vrcp.f32 %v2478_v31  ;;  %v7260_v31 = vld [vmem:[#allocation25_spill] sm:$0xff] }
 0xb21   :  { %v4841_v13 = vpop.eup %4840 }
 0xb22   :  { %v2485_v57 = vmul.f32 %v4841_v13, %v2483_v30  ;;  %v7259_v30 = vld [vmem:[#allocation32_spill] sm:$0xff] }
 0xb23   :  { %v4843_v21 = vpop.eup %4842 }
 0xb24   :  { %v2486_v22 = vadd.f32 %v2485_v57, %v6493_v20  ;;  %v2488_v18 = vsub.f32 1.0, %v4843_v21  ;;  %v2493_v39 = vmul.f32 %v4843_v21, %v2491_v32  ;;  %v7258_v57 = vld [vmem:[#allocation30_spill] sm:$0xff] }
 0xb26   :  { %4844 = vtanh.f32 %v2486_v22 }
 0xb33   :  { %v4845_v28 = vpop.eup %4844 }
 0xb34   :  { %v2489_v29 = vmul.f32 %v4845_v28, %v2488_v18 }
 0xb36   :  { %v6573_v62 = vadd.f32 %v2493_v39, %v2489_v29 }
 0xb38   :  { %v2496_v58 = vrot.slane %v6573_v62, 1 }
 0xb3a   :  { %2563 = vmatmul.mubr.f32.vlgmr.msra.gmra.mxu1 %v2496_v58  ;;  %4519 = vmatmul.mubr.f32.vlgmr.msra.gmra.mxu0 %v2496_v58 }
 0xb3b   :  { %2676 = vmatpush1.msra.mxu1 %v6235_v23  ;;  %4522 = vmatpush3.msra.mxu0 %v6241_v49 }
 0xb3c   :  { %2677 = vmatprep.subr.mxu1 %v6239_v55  ;;  %4523 = vmatprep.subr.mxu0 %v7199_v40 }
 0xb3d   :  { %2678 = vmatpush1.msra.mxu1 %v6243_v48  ;;  %4524 = vmatpush3.msra.mxu0 %v6249_v63 }
 0xb3e   :  { %2679 = vmatprep.subr.mxu1 %v6246_v25  ;;  %4525 = vmatprep.subr.mxu0 %v7199_v40 }
 0xb3f   :  { %2680 = vmatpush1.msra.mxu1 %v6252_v27  ;;  %4526 = vmatpush3.msra.mxu0 %v6259_v61 }
 0xb40   :  { %2681 = vmatprep.subr.mxu1 %v6256_v38  ;;  %4527 = vmatprep.subr.mxu0 %v7199_v40 }
 0xb41   :  { %2682 = vmatpush1.msra.mxu1 %v6262_v56  ;;  %4528 = vmatpush3.msra.mxu0 %v6269_v0 }
 0xb42   :  { %2683 = vmatprep.subr.mxu1 %v6266_v35  ;;  %4529 = vmatprep.subr.mxu0 %v7199_v40 }
 0xb43   :  { %2684 = vmatpush1.msra.mxu1 %v6272_v41  ;;  %4530 = vmatpush3.msra.mxu0 %v6279_v47 }
 0xb44   :  { %2685 = vmatprep.subr.mxu1 %v6276_v51  ;;  %4531 = vmatprep.subr.mxu0 %v7199_v40 }
 0xb45   :  { %2686 = vmatpush1.msra.mxu1 %v6282_v54  ;;  %4532 = vmatpush3.msra.mxu0 %v6289_v43 }
 0xb46   :  { %2687 = vmatprep.subr.mxu1 %v6286_v52  ;;  %4533 = vmatprep.subr.mxu0 %v7199_v40 }
 0xb47   :  { %2688 = vmatpush1.msra.mxu1 %v6292_v42  ;;  %4534 = vmatpush3.msra.mxu0 %v6299_v37 }
 0xb48   :  { %2689 = vmatprep.subr.mxu1 %v6296_v36  ;;  %4535 = vmatprep.subr.mxu0 %v7199_v40 }
 0xb49   :  { %2690 = vmatpush1.msra.mxu1 %v6302_v3  ;;  %4536 = vmatpush3.msra.mxu0 %v6309_v5 }
 0xb4a   :  { %2691 = vmatprep.subr.mxu1 %v6306_v4  ;;  %4537 = vmatprep.subr.mxu0 %v7199_v40 }
 0xb4b   :  { %2692 = vmatpush1.msra.mxu1 %v6312_v6  ;;  %4538 = vmatpush3.msra.mxu0 %v6319_v8 }
 0xb4c   :  { %2693 = vmatprep.subr.mxu1 %v6316_v7  ;;  %4539 = vmatprep.subr.mxu0 %v7199_v40 }
 0xb4d   :  { %2694 = vmatpush1.msra.mxu1 %v6322_v9  ;;  %4540 = vmatpush3.msra.mxu0 %v6329_v11 }
 0xb4e   :  { %2695 = vmatprep.subr.mxu1 %v6326_v10  ;;  %4541 = vmatprep.subr.mxu0 %v7199_v40 }
 0xb4f   :  { %2696 = vmatpush1.msra.mxu1 %v6332_v12  ;;  %4542 = vmatpush3.msra.mxu0 %v6339_v15 }
 0xb50   :  { %2697 = vmatprep.subr.mxu1 %v6336_v14  ;;  %4543 = vmatprep.subr.mxu0 %v7199_v40 }
 0xb51   :  { %2698 = vmatpush1.msra.mxu1 %v6342_v16  ;;  %4544 = vmatpush3.msra.mxu0 %v6349_v19 }
 0xb52   :  { %2699 = vmatprep.subr.mxu1 %v6346_v17  ;;  %4545 = vmatprep.subr.mxu0 %v7199_v40 }
 0xb53   :  { %2700 = vmatpush1.msra.mxu1 %v6352_v46  ;;  %4546 = vmatpush3.msra.mxu0 %v6359_v44 }
 0xb54   :  { %2701 = vmatprep.subr.mxu1 %v6356_v59  ;;  %4547 = vmatprep.subr.mxu0 %v7199_v40 }
 0xb55   :  { %2702 = vmatpush1.msra.mxu1 %v6362_v45  ;;  %4548 = vmatpush3.msra.mxu0 %v6369_v24 }
 0xb56   :  { %2703 = vmatprep.subr.mxu1 %v7258_v57  ;;  %4549 = vmatprep.subr.mxu0 %v7199_v40 }
 0xb57   :  { %2704 = vmatpush1.msra.mxu1 %v7259_v30  ;;  %4550 = vmatpush3.msra.mxu0 %v7260_v31 }
 0xb58   :  { %2705 = vmatprep.subr.mxu1 %v7261_v33  ;;  %4551 = vmatprep.subr.mxu0 %v7199_v40 }
 0xb59   :  { %2706 = vmatpush1.msra.mxu1 %v7262_v50  ;;  %2739 = vmatprep.mubr.f32.mxu1 %v7199_v40 }
 0xb5a   :  { %4552 = vmatpush3.msra.mxu0 %v7263_v2  ;;  %4553 = vmatprep.mubr.msk.f32.mxu0 %vm5208_vm0, %v7199_v40 }
 0xb5b   :  { %2852 = vmatprep.subr.mxu1 %v7264_v60  ;;  %4556 = vmatprep.subr.mxu0 %v7199_v40 }
 0xbfa   :  { %v2564_v13 = vpop.f32.mrf.mxu1  ;;  %v2635_v22 = vpop.f32.mrf.mxu0 }
 0xbfb   :  { %v2640_v21 = vrot.slane %v2564_v13, 6  ;;  %v2659_v31 = vadd.f32 %v2635_v22, %v6488_v1 }
 0xbfc   :  { %v2566_v32 = vpop.f32.mrf.mxu1  ;;  %v4520_v18 = vpop.f32.mrf.mxu0 }
 0xbfd   :  { %v2642_v28 = vadd.f32 %v2640_v21, %v7256_v53  ;;  %v2650_v39 = vrot.slane %v2566_v32, 6  ;;  %v2661_v57 = vrot.slane %v2659_v31, 6 }
 0xbff   :  { %v3714_v29 = vmul.f32 -1.442695, %v2642_v28  ;;  %v2652_v58 = vadd.f32 %v2650_v39, %v7257_v34  ;;  %v2668_v28 = vrot.slane %v6573_v62, 7 }
 0xc01   :  { %4846 = vpow2.f32 %v3714_v29  ;;  %v3715_v2 = vmul.f32 -1.442695, %v2652_v58 }
 0xc03   :  { %4848 = vpow2.f32 %v3715_v2 }
 0xc0e   :  { %v4847_v50 = vpop.eup %4846 }
 0xc0f   :  { %v2646_v33 = vadd.f32 1.0, %v4847_v50 }
 0xc10   :  { %v4849_v60 = vpop.eup %4848 }
 0xc11   :  { %4850 = vrcp.f32 %v2646_v33  ;;  %v2656_v30 = vadd.f32 1.0, %v4849_v60  ;;  %v3558_v33 = vsel %vm1887_vm2, %v6497_v26, %v6573_v62 }
 0xc13   :  { %4852 = vrcp.f32 %v2656_v30 }
 0xc1e   :  { %v4851_v13 = vpop.eup %4850 }
 0xc1f   :  { %v2663_v24 = vmul.f32 %v4851_v13, %v2661_v57 }
 0xc20   :  { %v4853_v32 = vpop.eup %4852 }
 0xc21   :  { %v2664_v21 = vadd.f32 %v2663_v24, %v6493_v20  ;;  %v2666_v18 = vsub.f32 1.0, %v4853_v32  ;;  %v2670_v39 = vmul.f32 %v4853_v32, %v2668_v28 }
 0xc23   :  { %4854 = vtanh.f32 %v2664_v21 }
 0xc30   :  { %v4855_v29 = vpop.eup %4854 }
 0xc31   :  { %v2667_v2 = vmul.f32 %v4855_v29, %v2666_v18 }
 0xc33   :  { %v6648_v50 = vadd.f32 %v2670_v39, %v2667_v2 }
 0xc35   :  { %v2673_v31 = vrot.slane %v6648_v50, 2  ;;  %v6656_v57 = vsel %vm1889_vm3, %v3558_v33, %v6648_v50  ;;  %v2845_v32 = vrot.slane %v6648_v50, 7  ;;  %v6746_v50 = vld [vmem:[#allocation11 + $0x158] sm:$0xff] }
 0xc37   :  { %2740 = vmatmul.mubr.f32.vlgmr.msra.gmra.mxu1 %v2673_v31  ;;  %4554 = vmatmul.mubr.f32.vlgmr.msra.gmra.mxu0 %v2673_v31  ;;  %v6740_v31 = vld [vmem:[#allocation11 + $0x168] sm:$0xff] }
 0xc38   :  { %2853 = vmatpush1.msra.mxu1 %v6235_v23  ;;  %4557 = vmatpush3.msra.mxu0 %v6241_v49  ;;  %v7265_v23 = vld [vmem:[#allocation23_spill] sm:$0xff]  ;;  %v7267_v49 = vld [vmem:[#allocation32_spill] sm:$0xff] }
 0xc39   :  { %2854 = vmatprep.subr.mxu1 %v6239_v55  ;;  %4558 = vmatprep.subr.mxu0 %v7199_v40  ;;  %v7266_v55 = vld [vmem:[#allocation30_spill] sm:$0xff] }
 0xc3a   :  { %2855 = vmatpush1.msra.mxu1 %v6243_v48  ;;  %4559 = vmatpush3.msra.mxu0 %v6249_v63  ;;  %v7268_v48 = vld [vmem:[#allocation25_spill] sm:$0xff]  ;;  %v7270_v63 = vld [vmem:[#allocation24_spill] sm:$0xff] }
 0xc3b   :  { %2856 = vmatprep.subr.mxu1 %v6246_v25  ;;  %4560 = vmatprep.subr.mxu0 %v7199_v40  ;;  %v7269_v25 = vld [vmem:[#allocation33_spill] sm:$0xff] }
 0xc3c   :  { %2857 = vmatpush1.msra.mxu1 %v6252_v27  ;;  %4561 = vmatpush3.msra.mxu0 %v6259_v61  ;;  %v7271_v27 = vld [vmem:[#allocation26_spill] sm:$0xff] }
 0xc3d   :  { %2858 = vmatprep.subr.mxu1 %v6256_v38  ;;  %4562 = vmatprep.subr.mxu0 %v7199_v40  ;;  %v6723_v38 = vld [vmem:[#allocation11 + $0x170] sm:$0xff] }
 0xc3e   :  { %2859 = vmatpush1.msra.mxu1 %v6262_v56  ;;  %4563 = vmatpush3.msra.mxu0 %v6269_v0 }
 0xc3f   :  { %2860 = vmatprep.subr.mxu1 %v6266_v35  ;;  %4564 = vmatprep.subr.mxu0 %v7199_v40 }
 0xc40   :  { %2861 = vmatpush1.msra.mxu1 %v6272_v41  ;;  %4565 = vmatpush3.msra.mxu0 %v6279_v47 }
 0xc41   :  { %2862 = vmatprep.subr.mxu1 %v6276_v51  ;;  %4566 = vmatprep.subr.mxu0 %v7199_v40 }
 0xc42   :  { %2863 = vmatpush1.msra.mxu1 %v6282_v54  ;;  %4567 = vmatpush3.msra.mxu0 %v6289_v43 }
 0xc43   :  { %2864 = vmatprep.subr.mxu1 %v6286_v52  ;;  %4568 = vmatprep.subr.mxu0 %v7199_v40 }
 0xc44   :  { %2865 = vmatpush1.msra.mxu1 %v6292_v42  ;;  %4569 = vmatpush3.msra.mxu0 %v6299_v37 }
 0xc45   :  { %2866 = vmatprep.subr.mxu1 %v6296_v36  ;;  %4570 = vmatprep.subr.mxu0 %v7199_v40 }
 0xc46   :  { %2867 = vmatpush1.msra.mxu1 %v6302_v3  ;;  %4571 = vmatpush3.msra.mxu0 %v6309_v5 }
 0xc47   :  { %2868 = vmatprep.subr.mxu1 %v6306_v4  ;;  %4572 = vmatprep.subr.mxu0 %v7199_v40 }
 0xc48   :  { %2869 = vmatpush1.msra.mxu1 %v6312_v6  ;;  %4573 = vmatpush3.msra.mxu0 %v6319_v8 }
 0xc49   :  { %2870 = vmatprep.subr.mxu1 %v6316_v7  ;;  %4574 = vmatprep.subr.mxu0 %v7199_v40 }
 0xc4a   :  { %2871 = vmatpush1.msra.mxu1 %v6322_v9  ;;  %4575 = vmatpush3.msra.mxu0 %v6329_v11 }
 0xc4b   :  { %2872 = vmatprep.subr.mxu1 %v6326_v10  ;;  %4576 = vmatprep.subr.mxu0 %v7199_v40 }
 0xc4c   :  { %2873 = vmatpush1.msra.mxu1 %v6332_v12  ;;  %4577 = vmatpush3.msra.mxu0 %v6339_v15 }
 0xc4d   :  { %2874 = vmatprep.subr.mxu1 %v6336_v14  ;;  %4578 = vmatprep.subr.mxu0 %v7199_v40 }
 0xc4e   :  { %2875 = vmatpush1.msra.mxu1 %v6342_v16  ;;  %4579 = vmatpush3.msra.mxu0 %v6349_v19 }
 0xc4f   :  { %2876 = vmatprep.subr.mxu1 %v6346_v17  ;;  %4580 = vmatprep.subr.mxu0 %v7199_v40 }
 0xc50   :  { %2877 = vmatpush1.msra.mxu1 %v6352_v46  ;;  %4581 = vmatpush3.msra.mxu0 %v6359_v44 }
 0xc51   :  { %2878 = vmatprep.subr.mxu1 %v6356_v59  ;;  %4582 = vmatprep.subr.mxu0 %v7199_v40 }
 0xc52   :  { %2879 = vmatpush1.msra.mxu1 %v6362_v45  ;;  %4583 = vmatpush3.msra.mxu0 %v7265_v23 }
 0xc53   :  { %2880 = vmatprep.subr.mxu1 %v7266_v55  ;;  %4584 = vmatprep.subr.mxu0 %v7199_v40 }
 0xc54   :  { %2881 = vmatpush1.msra.mxu1 %v7267_v49  ;;  %4585 = vmatpush3.msra.mxu0 %v7268_v48 }
 0xc55   :  { %2882 = vmatprep.subr.mxu1 %v7269_v25  ;;  %4586 = vmatprep.subr.mxu0 %v7199_v40 }
 0xc56   :  { %2883 = vmatpush1.msra.mxu1 %v7270_v63  ;;  %2916 = vmatprep.mubr.f32.mxu1 %v7199_v40 }
 0xc57   :  { %4587 = vmatpush3.msra.mxu0 %v7271_v27  ;;  %4588 = vmatprep.mubr.msk.f32.mxu0 %vm5208_vm0, %v7199_v40 }
 0xc58   :  { %3029 = vmatprep.subr.mxu1 %v6723_v38  ;;  %4591 = vmatprep.subr.mxu0 %v7199_v40 }
 0xcf7   :  { %v2741_v61 = vpop.f32.mrf.mxu1  ;;  %v2812_v56 = vpop.f32.mrf.mxu0 }
 0xcf8   :  { %v2817_v35 = vrot.slane %v2741_v61, 5  ;;  %v2836_v26 = vadd.f32 %v2812_v56, %v6488_v1  ;;  %v6743_v61 = vld [vmem:[#allocation11 + $0x178] sm:$0xff]  ;;  %v6750_v56 = vld [vmem:[#allocation11 + $0x150] sm:$0xff] }
 0xcf9   :  { %v2743_v0 = vpop.f32.mrf.mxu1  ;;  %v4555_v41 = vpop.f32.mrf.mxu0 }
 0xcfa   :  { %v2819_v51 = vadd.f32 %v2817_v35, %v7256_v53  ;;  %v2827_v54 = vrot.slane %v2743_v0, 5  ;;  %v2838_v30 = vrot.slane %v2836_v26, 5  ;;  %v6756_v35 = vld [vmem:[#allocation11 + $0x140] sm:$0xff]  ;;  %v6760_v0 = vld [vmem:[#allocation11 + $0x138] sm:$0xff]  ;;  %v6763_v41 = vld [vmem:[#allocation11 + $0x148] sm:$0xff] }
 0xcfb   :  { %v6793_v26 = vld [vmem:[#allocation11 + $0x100] sm:$0xff] }
 0xcfc   :  { %v3716_v47 = vmul.f32 -1.442695, %v2819_v51  ;;  %v2829_v52 = vadd.f32 %v2827_v54, %v7257_v34  ;;  %v6766_v51 = vld [vmem:[#allocation11 + $0x128] sm:$0xff]  ;;  %v6773_v54 = vld [vmem:[#allocation11 + $0x130] sm:$0xff] }
 0xcfe   :  { %4856 = vpow2.f32 %v3716_v47  ;;  %v3717_v43 = vmul.f32 -1.442695, %v2829_v52  ;;  %v6770_v47 = vld [vmem:[#allocation11 + $0x120] sm:$0xff]  ;;  %v6776_v52 = vld [vmem:[#allocation11 + $0x110] sm:$0xff] }
 0xd00   :  { %4858 = vpow2.f32 %v3717_v43  ;;  %v6780_v43 = vld [vmem:[#allocation11 + $0x108] sm:$0xff] }
 0xd0b   :  { %v4857_v42 = vpop.eup %4856 }
 0xd0c   :  { %v2823_v36 = vadd.f32 1.0, %v4857_v42  ;;  %v6783_v42 = vld [vmem:[#allocation11 + $0x118] sm:$0xff] }
 0xd0d   :  { %v4859_v24 = vpop.eup %4858 }
 0xd0e   :  { %4860 = vrcp.f32 %v2823_v36  ;;  %v2833_v62 = vadd.f32 1.0, %v4859_v24  ;;  %v6786_v36 = vld [vmem:[#allocation11 + $0xf8] sm:$0xff]  ;;  %v6790_v24 = vld [vmem:[#allocation11 + $0xf0] sm:$0xff] }
 0xd10   :  { %4862 = vrcp.f32 %v2833_v62  ;;  %v6796_v62 = vld [vmem:[#allocation11 + $0xe0] sm:$0xff] }
 0xd1b   :  { %v4861_v22 = vpop.eup %4860 }
 0xd1c   :  { %v2840_v58 = vmul.f32 %v4861_v22, %v2838_v30  ;;  %v6800_v30 = vld [vmem:[#allocation11 + $0xd8] sm:$0xff]  ;;  %v6804_v22 = vld [vmem:[#allocation11 + $0xc8] sm:$0xff] }
 0xd1d   :  { %v4863_v13 = vpop.eup %4862 }
 0xd1e   :  { %v2841_v60 = vadd.f32 %v2840_v58, %v6493_v20  ;;  %v2843_v21 = vsub.f32 1.0, %v4863_v13  ;;  %v2847_v29 = vmul.f32 %v4863_v13, %v2845_v32  ;;  %v6890_v13 = vld [vmem:[#allocation11 + $0xc0] sm:$0xff]  ;;  %v6896_v32 = vld [vmem:[#allocation11 + $0xb0] sm:$0xff] }
 0xd20   :  { %4864 = vtanh.f32 %v2841_v60  ;;  %v6885_v60 = vld [vmem:[#allocation11 + $0xe8] sm:$0xff] }
 0xd2d   :  { %v4865_v18 = vpop.eup %4864 }
 0xd2e   :  { %v2844_v28 = vmul.f32 %v4865_v18, %v2843_v21  ;;  %v6893_v21 = vld [vmem:[#allocation11 + $0xd0] sm:$0xff]  ;;  %v6900_v18 = vld [vmem:[#allocation11 + $0xa8] sm:$0xff] }
 0xd30   :  { %v6732_v2 = vadd.f32 %v2847_v29, %v2844_v28  ;;  %v6903_v28 = vld [vmem:[#allocation11 + $0xb8] sm:$0xff] }
 0xd31   :  { %v6906_v29 = vld [vmem:[#allocation11 + $0x98] sm:$0xff] }
 0xd32   :  { %v2850_v39 = vrot.slane %v6732_v2, 3  ;;  %v6738_v33 = vsel %vm1891_vm4, %v6656_v57, %v6732_v2  ;;  %v6753_v57 = vld [vmem:[#allocation11 + $0x160] sm:$0xff] }
 0xd34   :  { %2917 = vmatmul.mubr.f32.vlgmr.msra.gmra.mxu1 %v2850_v39  ;;  %4589 = vmatmul.mubr.f32.vlgmr.msra.gmra.mxu0 %v2850_v39  ;;  %v6913_v39 = vld [vmem:[#allocation11 + $0xa0] sm:$0xff] }
 0xd35   :  { %3030 = vmatpush1.msra.mxu1 %v6740_v31  ;;  %4592 = vmatpush3.msra.mxu0 %v6743_v61 }
 0xd36   :  { %3031 = vmatprep.subr.mxu1 %v6746_v50  ;;  %4593 = vmatprep.subr.mxu0 %v7199_v40 }
 0xd37   :  { %3032 = vmatpush1.msra.mxu1 %v6750_v56  ;;  %4594 = vmatpush3.msra.mxu0 %v6753_v57 }
 0xd38   :  { %3033 = vmatprep.subr.mxu1 %v6756_v35  ;;  %4595 = vmatprep.subr.mxu0 %v7199_v40 }
 0xd39   :  { %3034 = vmatpush1.msra.mxu1 %v6760_v0  ;;  %4596 = vmatpush3.msra.mxu0 %v6763_v41 }
 0xd3a   :  { %3035 = vmatprep.subr.mxu1 %v6766_v51  ;;  %4597 = vmatprep.subr.mxu0 %v7199_v40 }
 0xd3b   :  { %3036 = vmatpush1.msra.mxu1 %v6770_v47  ;;  %4598 = vmatpush3.msra.mxu0 %v6773_v54 }
 0xd3c   :  { %3037 = vmatprep.subr.mxu1 %v6776_v52  ;;  %4599 = vmatprep.subr.mxu0 %v7199_v40 }
 0xd3d   :  { %3038 = vmatpush1.msra.mxu1 %v6780_v43  ;;  %4600 = vmatpush3.msra.mxu0 %v6783_v42 }
 0xd3e   :  { %3039 = vmatprep.subr.mxu1 %v6786_v36  ;;  %4601 = vmatprep.subr.mxu0 %v7199_v40 }
 0xd3f   :  { %3040 = vmatpush1.msra.mxu1 %v6790_v24  ;;  %4602 = vmatpush3.msra.mxu0 %v6793_v26 }
 0xd40   :  { %3041 = vmatprep.subr.mxu1 %v6796_v62  ;;  %4603 = vmatprep.subr.mxu0 %v7199_v40 }
 0xd41   :  { %3042 = vmatpush1.msra.mxu1 %v6800_v30  ;;  %4604 = vmatpush3.msra.mxu0 %v6299_v37 }
 0xd42   :  { %3043 = vmatprep.subr.mxu1 %v6804_v22  ;;  %4605 = vmatprep.subr.mxu0 %v7199_v40 }
 0xd43   :  { %3044 = vmatpush1.msra.mxu1 %v6302_v3  ;;  %4606 = vmatpush3.msra.mxu0 %v6309_v5 }
 0xd44   :  { %3045 = vmatprep.subr.mxu1 %v6306_v4  ;;  %4607 = vmatprep.subr.mxu0 %v7199_v40 }
 0xd45   :  { %3046 = vmatpush1.msra.mxu1 %v6312_v6  ;;  %4608 = vmatpush3.msra.mxu0 %v6319_v8 }
 0xd46   :  { %3047 = vmatprep.subr.mxu1 %v6316_v7  ;;  %4609 = vmatprep.subr.mxu0 %v7199_v40 }
 0xd47   :  { %3048 = vmatpush1.msra.mxu1 %v6322_v9  ;;  %4610 = vmatpush3.msra.mxu0 %v6329_v11 }
 0xd48   :  { %3049 = vmatprep.subr.mxu1 %v6326_v10  ;;  %4611 = vmatprep.subr.mxu0 %v7199_v40 }
 0xd49   :  { %3050 = vmatpush1.msra.mxu1 %v6332_v12  ;;  %4612 = vmatpush3.msra.mxu0 %v6339_v15 }
 0xd4a   :  { %3051 = vmatprep.subr.mxu1 %v6336_v14  ;;  %4613 = vmatprep.subr.mxu0 %v7199_v40 }
 0xd4b   :  { %3052 = vmatpush1.msra.mxu1 %v6342_v16  ;;  %4614 = vmatpush3.msra.mxu0 %v6349_v19 }
 0xd4c   :  { %3053 = vmatprep.subr.mxu1 %v6346_v17  ;;  %4615 = vmatprep.subr.mxu0 %v7199_v40 }
 0xd4d   :  { %3054 = vmatpush1.msra.mxu1 %v6352_v46  ;;  %4616 = vmatpush3.msra.mxu0 %v6359_v44 }
 0xd4e   :  { %3055 = vmatprep.subr.mxu1 %v6356_v59  ;;  %4617 = vmatprep.subr.mxu0 %v7199_v40 }
 0xd4f   :  { %3056 = vmatpush1.msra.mxu1 %v6362_v45  ;;  %4618 = vmatpush3.msra.mxu0 %v7265_v23 }
 0xd50   :  { %3057 = vmatprep.subr.mxu1 %v7266_v55  ;;  %4619 = vmatprep.subr.mxu0 %v7199_v40  ;;  %v3022_v55 = vrot.slane %v6732_v2, 7  ;;  %v6910_v2 = vld [vmem:[#allocation11 + $0x90] sm:$0xff] }
 0xd51   :  { %3058 = vmatpush1.msra.mxu1 %v7267_v49  ;;  %4620 = vmatpush3.msra.mxu0 %v7268_v48 }
 0xd52   :  { %3059 = vmatprep.subr.mxu1 %v7269_v25  ;;  %4621 = vmatprep.subr.mxu0 %v7199_v40 }
 0xd53   :  { %3060 = vmatpush1.msra.mxu1 %v7270_v63  ;;  %3093 = vmatprep.mubr.f32.mxu1 %v7199_v40 }
 0xd54   :  { %4622 = vmatpush3.msra.mxu0 %v7271_v27  ;;  %4623 = vmatprep.mubr.msk.f32.mxu0 %vm5208_vm0, %v7199_v40 }
 0xd55   :  { %3206 = vmatprep.subr.mxu1 %v6723_v38  ;;  %4626 = vmatprep.subr.mxu0 %v7199_v40 }
 0xdf4   :  { %v2918_v37 = vpop.f32.mrf.mxu1  ;;  %v2989_v3 = vpop.f32.mrf.mxu0 }
 0xdf5   :  { %v2994_v4 = vrot.slane %v2918_v37, 4  ;;  %v3013_v16 = vadd.f32 %v2989_v3, %v6488_v1  ;;  %v6920_v37 = vld [vmem:[#allocation11 + $0x78] sm:$0xff]  ;;  %v6923_v3 = vld [vmem:[#allocation11 + $0x88] sm:$0xff] }
 0xdf6   :  { %v2920_v5 = vpop.f32.mrf.mxu1  ;;  %v4590_v6 = vpop.f32.mrf.mxu0 }
 0xdf7   :  { %v2996_v7 = vadd.f32 %v2994_v4, %v7256_v53  ;;  %v3004_v9 = vrot.slane %v2920_v5, 4  ;;  %v3015_v19 = vrot.slane %v3013_v16, 4  ;;  %v6926_v4 = vld [vmem:[#allocation11 + $0x68] sm:$0xff]  ;;  %v6930_v5 = vld [vmem:[#allocation11 + $0x60] sm:$0xff]  ;;  %v6933_v6 = vld [vmem:[#allocation11 + $0x70] sm:$0xff] }
 0xdf8   :  { %v6963_v16 = vld [vmem:[#allocation11 + $0x28] sm:$0xff] }
 0xdf9   :  { %v3718_v8 = vmul.f32 -1.442695, %v2996_v7  ;;  %v3006_v10 = vadd.f32 %v3004_v9, %v7257_v34  ;;  %v6936_v7 = vld [vmem:[#allocation11 + $0x50] sm:$0xff]  ;;  %v6943_v9 = vld [vmem:[#allocation11 + $0x58] sm:$0xff]  ;;  %7275 = vst [vmem:[#allocation29_spill] sm:$0xff] %v6963_v16 }
 0xdfb   :  { %4866 = vpow2.f32 %v3718_v8  ;;  %v3719_v11 = vmul.f32 -1.442695, %v3006_v10  ;;  %v6940_v8 = vld [vmem:[#allocation11 + $0x48] sm:$0xff]  ;;  %v6946_v10 = vld [vmem:[#allocation11 + $0x38] sm:$0xff] }
 0xdfd   :  { %4868 = vpow2.f32 %v3719_v11  ;;  %v6950_v11 = vld [vmem:[#allocation11 + $0x30] sm:$0xff] }
 0xe08   :  { %v4867_v12 = vpop.eup %4866 }
 0xe09   :  { %v3000_v14 = vadd.f32 1.0, %v4867_v12  ;;  %v6953_v12 = vld [vmem:[#allocation11 + $0x40] sm:$0xff] }
 0xe0a   :  { %v4869_v15 = vpop.eup %4868  ;;  %7272 = vst [vmem:[#allocation31_spill] sm:$0xff] %v6953_v12 }
 0xe0b   :  { %4870 = vrcp.f32 %v3000_v14  ;;  %v3010_v17 = vadd.f32 1.0, %v4869_v15  ;;  %v6956_v14 = vld [vmem:[#allocation11 + $0x20] sm:$0xff]  ;;  %v6960_v15 = vld [vmem:[#allocation11 + $0x18] sm:$0xff] }
 0xe0c   :  { %7273 = vst [vmem:[#allocation28_spill] sm:$0xff] %v6956_v14  ;;  %7274 = vst [vmem:[#allocation27_spill] sm:$0xff] %v6960_v15 }
 0xe0d   :  { %4872 = vrcp.f32 %v3010_v17  ;;  %v6966_v17 = vld [vmem:[#allocation11 + $0x8] sm:$0xff] }
 0xe0e   :  { %7276 = vst [vmem:[#allocation23_spill] sm:$0xff] %v6966_v17 }
 0xe18   :  { %v4871_v46 = vpop.eup %4870 }
 0xe19   :  { %v3017_v59 = vmul.f32 %v4871_v46, %v3015_v19  ;;  %v6970_v19 = vld [vmem:[#allocation11] sm:$0xff]  ;;  %v6974_v46 = vld [vmem:[#allocation11 + $0x10] sm:$0xff] }
 0xe1a   :  { %v4873_v45 = vpop.eup %4872  ;;  %7277 = vst [vmem:[#allocation30_spill] sm:$0xff] %v6970_v19  ;;  %7278 = vst [vmem:[#allocation32_spill] sm:$0xff] %v6974_v46 }
 0xe1b   :  { %v3018_v44 = vadd.f32 %v3017_v59, %v6493_v20  ;;  %v3020_v23 = vsub.f32 1.0, %v4873_v45  ;;  %v3024_v25 = vmul.f32 %v4873_v45, %v3022_v55 }
 0xe1d   :  { %4874 = vtanh.f32 %v3018_v44 }
 0xe2a   :  { %v4875_v49 = vpop.eup %4874 }
 0xe2b   :  { %v3021_v48 = vmul.f32 %v4875_v49, %v3020_v23 }
 0xe2d   :  { %v6852_v63 = vadd.f32 %v3024_v25, %v3021_v48 }
 0xe2f   :  { %v3027_v27 = vrot.slane %v6852_v63, 4  ;;  %v6858_v58 = vsel %vm1893_vm5, %v6738_v33, %v6852_v63  ;;  %v6916_v33 = vld [vmem:[#allocation11 + $0x80] sm:$0xff] }
 0xe31   :  { %3094 = vmatmul.mubr.f32.vlgmr.msra.gmra.mxu1 %v3027_v27  ;;  %4624 = vmatmul.mubr.f32.vlgmr.msra.gmra.mxu0 %v3027_v27 }
 0xe32   :  { %3207 = vmatpush1.msra.mxu1 %v6740_v31  ;;  %4627 = vmatpush3.msra.mxu0 %v6743_v61 }
 0xe33   :  { %3208 = vmatprep.subr.mxu1 %v6746_v50  ;;  %4628 = vmatprep.subr.mxu0 %v7199_v40 }
 0xe34   :  { %3209 = vmatpush1.msra.mxu1 %v6750_v56  ;;  %4629 = vmatpush3.msra.mxu0 %v6753_v57 }
 0xe35   :  { %3210 = vmatprep.subr.mxu1 %v6756_v35  ;;  %4630 = vmatprep.subr.mxu0 %v7199_v40 }
 0xe36   :  { %3211 = vmatpush1.msra.mxu1 %v6760_v0  ;;  %4631 = vmatpush3.msra.mxu0 %v6763_v41 }
 0xe37   :  { %3212 = vmatprep.subr.mxu1 %v6766_v51  ;;  %4632 = vmatprep.subr.mxu0 %v7199_v40 }
 0xe38   :  { %3213 = vmatpush1.msra.mxu1 %v6770_v47  ;;  %4633 = vmatpush3.msra.mxu0 %v6773_v54 }
 0xe39   :  { %3214 = vmatprep.subr.mxu1 %v6776_v52  ;;  %4634 = vmatprep.subr.mxu0 %v7199_v40 }
 0xe3a   :  { %3215 = vmatpush1.msra.mxu1 %v6780_v43  ;;  %4635 = vmatpush3.msra.mxu0 %v6783_v42 }
 0xe3b   :  { %3216 = vmatprep.subr.mxu1 %v6786_v36  ;;  %4636 = vmatprep.subr.mxu0 %v7199_v40 }
 0xe3c   :  { %3217 = vmatpush1.msra.mxu1 %v6790_v24  ;;  %4637 = vmatpush3.msra.mxu0 %v6793_v26 }
 0xe3d   :  { %3218 = vmatprep.subr.mxu1 %v6796_v62  ;;  %4638 = vmatprep.subr.mxu0 %v7199_v40 }
 0xe3e   :  { %3219 = vmatpush1.msra.mxu1 %v6800_v30  ;;  %4639 = vmatpush3.msra.mxu0 %v6885_v60 }
 0xe3f   :  { %3220 = vmatprep.subr.mxu1 %v6804_v22  ;;  %4640 = vmatprep.subr.mxu0 %v7199_v40 }
 0xe40   :  { %3221 = vmatpush1.msra.mxu1 %v6890_v13  ;;  %4641 = vmatpush3.msra.mxu0 %v6893_v21 }
 0xe41   :  { %3222 = vmatprep.subr.mxu1 %v6896_v32  ;;  %4642 = vmatprep.subr.mxu0 %v7199_v40 }
 0xe42   :  { %3223 = vmatpush1.msra.mxu1 %v6900_v18  ;;  %4643 = vmatpush3.msra.mxu0 %v6903_v28 }
 0xe43   :  { %3224 = vmatprep.subr.mxu1 %v6906_v29  ;;  %4644 = vmatprep.subr.mxu0 %v7199_v40 }
 0xe44   :  { %3225 = vmatpush1.msra.mxu1 %v6910_v2  ;;  %4645 = vmatpush3.msra.mxu0 %v6913_v39 }
 0xe45   :  { %3226 = vmatprep.subr.mxu1 %v6916_v33  ;;  %4646 = vmatprep.subr.mxu0 %v7199_v40 }
 0xe46   :  { %3227 = vmatpush1.msra.mxu1 %v6920_v37  ;;  %4647 = vmatpush3.msra.mxu0 %v6923_v3 }
 0xe47   :  { %3228 = vmatprep.subr.mxu1 %v6926_v4  ;;  %4648 = vmatprep.subr.mxu0 %v7199_v40 }
 0xe48   :  { %3229 = vmatpush1.msra.mxu1 %v6930_v5  ;;  %4649 = vmatpush3.msra.mxu0 %v6933_v6 }
 0xe49   :  { %3230 = vmatprep.subr.mxu1 %v6936_v7  ;;  %4650 = vmatprep.subr.mxu0 %v7199_v40 }
 0xe4a   :  { %3231 = vmatpush1.msra.mxu1 %v6940_v8  ;;  %4651 = vmatpush3.msra.mxu0 %v6943_v9 }
 0xe4b   :  { %3232 = vmatprep.subr.mxu1 %v6946_v10  ;;  %4652 = vmatprep.subr.mxu0 %v7199_v40 }
 0xe4c   :  { %3233 = vmatpush1.msra.mxu1 %v6950_v11  ;;  %4653 = vmatpush3.msra.mxu0 %v6953_v12 }
 0xe4d   :  { %3234 = vmatprep.subr.mxu1 %v6956_v14  ;;  %4654 = vmatprep.subr.mxu0 %v7199_v40 }
 0xe4e   :  { %3235 = vmatpush1.msra.mxu1 %v6960_v15  ;;  %4655 = vmatpush3.msra.mxu0 %v6963_v16 }
 0xe4f   :  { %3236 = vmatprep.subr.mxu1 %v6966_v17  ;;  %4656 = vmatprep.subr.mxu0 %v7199_v40 }
 0xe50   :  { %3237 = vmatpush1.msra.mxu1 %v6970_v19  ;;  %3270 = vmatprep.mubr.f32.mxu1 %v7199_v40 }
 0xe51   :  { %4657 = vmatpush3.msra.mxu0 %v6974_v46  ;;  %4658 = vmatprep.mubr.msk.f32.mxu0 %vm5208_vm0, %v7199_v40 }
 0xe52   :  { %3383 = vmatprep.subr.mxu1 %v6723_v38  ;;  %4661 = vmatprep.subr.mxu0 %v7199_v40 }
 0xef1   :  { %v3095_v59 = vpop.f32.mrf.mxu1  ;;  %v3166_v44 = vpop.f32.mrf.mxu0 }
 0xef2   :  { %v3171_v45 = vrot.slane %v3095_v59, 3  ;;  %v3190_v16 = vadd.f32 %v3166_v44, %v6488_v1  ;;  %v3571_v44 = vld [vmem:[#allocation13 + $0x28] sm:$0xff] }
 0xef3   :  { %v3097_v23 = vpop.f32.mrf.mxu1  ;;  %v4625_v55 = vpop.f32.mrf.mxu0 }
 0xef4   :  { %v3173_v49 = vadd.f32 %v3171_v45, %v7256_v53  ;;  %v3181_v25 = vrot.slane %v3097_v23, 3  ;;  %v3192_v14 = vrot.slane %v3190_v16, 3  ;;  %v3572_v16 = vld [vmem:[#allocation13 + $0x30] sm:$0xff] }
 0xef6   :  { %v3720_v48 = vmul.f32 -1.442695, %v3173_v49  ;;  %v3183_v27 = vadd.f32 %v3181_v25, %v7257_v34  ;;  %v3199_v49 = vrot.slane %v6852_v63, 7  ;;  %v7065_v63 = vld [vmem:[%s7121_s10] sm:$0x1]  ;;  %s5209_s10 = smov [#allocation15]  }
 0xef7   :  { %s3676_s1 = sshll.u32 %s5209_s10, 4  ;;  %s3677_s1 = int_to_ptr.vmem [resolvable:$true] %s3676_s1 }
 0xef8   :  { %4876 = vpow2.f32 %v3720_v48  ;;  %v3721_v46 = vmul.f32 -1.442695, %v3183_v27  ;;  %v3570_v27 = vld [vmem:[#allocation13 + $0x20] sm:$0xff]  ;;  %s5144_s19 = scalar_lea.vmem %s3677_s1, 32  ;;  %p5149_p8 = scmp.lt.s32.totalorder %s3677_s1, %s3677_s1 }
 0xef9   :  { %p5145_p7 = scmp.ne.s32.totalorder %s3677_s1, %s5144_s19  ;;  %p5150_p9 = scmp.lt.s32.totalorder %s5144_s19, %s5144_s19 }
 0xefa   :  { %4878 = vpow2.f32 %v3721_v46 }
 0xefb   :  { %p5151_p10 = por %p5150_p9, %p5149_p8 }
 0xefd   :  { %p5152_p11 = pnand %p5151_p10, %p5145_p7 }
 0xf05   :  { %v4877_v19 = vpop.eup %4876 }
 0xf06   :  { %v3177_v17 = vadd.f32 1.0, %v4877_v19 }
 0xf07   :  { %v4879_v38 = vpop.eup %4878 }
 0xf08   :  { %4880 = vrcp.f32 %v3177_v17  ;;  %v3187_v15 = vadd.f32 1.0, %v4879_v38  ;;  %v3569_v38 = vld [vmem:[#allocation13 + $0x18] sm:$0xff] }
 0xf0a   :  { %4882 = vrcp.f32 %v3187_v15  ;;  %v3573_v15 = vld [vmem:[#allocation13 + $0x38] sm:$0xff] }
 0xf15   :  { %v4881_v59 = vpop.eup %4880 }
 0xf16   :  { %v3194_v12 = vmul.f32 %v4881_v59, %v3192_v14  ;;  %v3574_v14 = vld [vmem:[#allocation13 + $0x40] sm:$0xff]  ;;  %v3568_v59 = vld [vmem:[#allocation13 + $0x10] sm:$0xff] }
 0xf17   :  { %v4883_v23 = vpop.eup %4882 }
 0xf18   :  { %v3195_v45 = vadd.f32 %v3194_v12, %v6493_v20  ;;  %v3197_v55 = vsub.f32 1.0, %v4883_v23  ;;  %v3201_v25 = vmul.f32 %v4883_v23, %v3199_v49  ;;  %v3575_v12 = vld [vmem:[#allocation13 + $0x48] sm:$0xff]  ;;  %v3566_v23 = vld [vmem:[#allocation13] sm:$0xff] }
 0xf1a   :  { %4884 = vtanh.f32 %v3195_v45  ;;  %v3567_v45 = vld [vmem:[#allocation13 + $0x8] sm:$0xff] }
 0xf27   :  { %v4885_v48 = vpop.eup %4884 }
 0xf28   :  { %v3198_v46 = vmul.f32 %v4885_v48, %v3197_v55 }
 0xf2a   :  { %v6986_v19 = vadd.f32 %v3201_v25, %v3198_v46 }
 0xf2c   :  { %v3204_v17 = vrot.slane %v6986_v19, 5  ;;  %v6992_v1 = vsel %vm1895_vm6, %v6858_v58, %v6986_v19 }
 0xf2e   :  { %3271 = vmatmul.mubr.f32.vlgmr.msra.gmra.mxu1 %v3204_v17  ;;  %4659 = vmatmul.mubr.f32.vlgmr.msra.gmra.mxu0 %v3204_v17 }
 0xf2f   :  { %3384 = vmatpush1.msra.mxu1 %v6740_v31  ;;  %4662 = vmatpush3.msra.mxu0 %v6743_v61  ;;  %v7279_v31 = vld [vmem:[#allocation31_spill] sm:$0xff]  ;;  %v7280_v61 = vld [vmem:[#allocation28_spill] sm:$0xff] }
 0xf30   :  { %3385 = vmatprep.subr.mxu1 %v6746_v50  ;;  %4663 = vmatprep.subr.mxu0 %v7199_v40  ;;  %v7281_v50 = vld [vmem:[#allocation27_spill] sm:$0xff] }
 0xf31   :  { %3386 = vmatpush1.msra.mxu1 %v6750_v56  ;;  %4664 = vmatpush3.msra.mxu0 %v6753_v57  ;;  %v7282_v56 = vld [vmem:[#allocation29_spill] sm:$0xff]  ;;  %v7283_v57 = vld [vmem:[#allocation23_spill] sm:$0xff] }
 0xf32   :  { %3387 = vmatprep.subr.mxu1 %v6756_v35  ;;  %4665 = vmatprep.subr.mxu0 %v7199_v40  ;;  %v7284_v35 = vld [vmem:[#allocation30_spill] sm:$0xff] }
 0xf33   :  { %3388 = vmatpush1.msra.mxu1 %v6760_v0  ;;  %4666 = vmatpush3.msra.mxu0 %v6763_v41  ;;  %v7285_v0 = vld [vmem:[#allocation32_spill] sm:$0xff] }
 0xf34   :  { %3389 = vmatprep.subr.mxu1 %v6766_v51  ;;  %4667 = vmatprep.subr.mxu0 %v7199_v40 }
 0xf35   :  { %3390 = vmatpush1.msra.mxu1 %v6770_v47  ;;  %4668 = vmatpush3.msra.mxu0 %v6773_v54 }
 0xf36   :  { %3391 = vmatprep.subr.mxu1 %v6776_v52  ;;  %4669 = vmatprep.subr.mxu0 %v7199_v40 }
 0xf37   :  { %3392 = vmatpush1.msra.mxu1 %v6780_v43  ;;  %4670 = vmatpush3.msra.mxu0 %v6783_v42 }
 0xf38   :  { %3393 = vmatprep.subr.mxu1 %v6786_v36  ;;  %4671 = vmatprep.subr.mxu0 %v7199_v40 }
 0xf39   :  { %3394 = vmatpush1.msra.mxu1 %v6790_v24  ;;  %4672 = vmatpush3.msra.mxu0 %v6793_v26 }
 0xf3a   :  { %3395 = vmatprep.subr.mxu1 %v6796_v62  ;;  %4673 = vmatprep.subr.mxu0 %v7199_v40 }
 0xf3b   :  { %3396 = vmatpush1.msra.mxu1 %v6800_v30  ;;  %4674 = vmatpush3.msra.mxu0 %v6885_v60 }
 0xf3c   :  { %3397 = vmatprep.subr.mxu1 %v6804_v22  ;;  %4675 = vmatprep.subr.mxu0 %v7199_v40 }
 0xf3d   :  { %3398 = vmatpush1.msra.mxu1 %v6890_v13  ;;  %4676 = vmatpush3.msra.mxu0 %v6893_v21 }
 0xf3e   :  { %3399 = vmatprep.subr.mxu1 %v6896_v32  ;;  %4677 = vmatprep.subr.mxu0 %v7199_v40 }
 0xf3f   :  { %3400 = vmatpush1.msra.mxu1 %v6900_v18  ;;  %4678 = vmatpush3.msra.mxu0 %v6903_v28 }
 0xf40   :  { %3401 = vmatprep.subr.mxu1 %v6906_v29  ;;  %4679 = vmatprep.subr.mxu0 %v7199_v40 }
 0xf41   :  { %3402 = vmatpush1.msra.mxu1 %v6910_v2  ;;  %4680 = vmatpush3.msra.mxu0 %v6913_v39  ;;  %v3376_v2 = vrot.slane %v6986_v19, 7 }
 0xf42   :  { %3403 = vmatprep.subr.mxu1 %v6916_v33  ;;  %4681 = vmatprep.subr.mxu0 %v7199_v40 }
 0xf43   :  { %3404 = vmatpush1.msra.mxu1 %v6920_v37  ;;  %4682 = vmatpush3.msra.mxu0 %v6923_v3 }
 0xf44   :  { %3405 = vmatprep.subr.mxu1 %v6926_v4  ;;  %4683 = vmatprep.subr.mxu0 %v7199_v40 }
 0xf45   :  { %3406 = vmatpush1.msra.mxu1 %v6930_v5  ;;  %4684 = vmatpush3.msra.mxu0 %v6933_v6  ;;  %v3581_v6 = vld [vmem:[#allocation13 + $0x78] sm:$0xff] }
 0xf46   :  { %3407 = vmatprep.subr.mxu1 %v6936_v7  ;;  %4685 = vmatprep.subr.mxu0 %v7199_v40  ;;  %v3580_v7 = vld [vmem:[#allocation13 + $0x70] sm:$0xff] }
 0xf47   :  { %3408 = vmatpush1.msra.mxu1 %v6940_v8  ;;  %4686 = vmatpush3.msra.mxu0 %v6943_v9  ;;  %v3579_v8 = vld [vmem:[#allocation13 + $0x68] sm:$0xff]  ;;  %v3578_v9 = vld [vmem:[#allocation13 + $0x60] sm:$0xff] }
 0xf48   :  { %3409 = vmatprep.subr.mxu1 %v6946_v10  ;;  %4687 = vmatprep.subr.mxu0 %v7199_v40  ;;  %v3577_v10 = vld [vmem:[#allocation13 + $0x58] sm:$0xff] }
 0xf49   :  { %3410 = vmatpush1.msra.mxu1 %v6950_v11  ;;  %4688 = vmatpush3.msra.mxu0 %v7279_v31  ;;  %v3576_v11 = vld [vmem:[#allocation13 + $0x50] sm:$0xff] }
 0xf4a   :  { %3411 = vmatprep.subr.mxu1 %v7280_v61  ;;  %4689 = vmatprep.subr.mxu0 %v7199_v40 }
 0xf4b   :  { %3412 = vmatpush1.msra.mxu1 %v7281_v50  ;;  %4690 = vmatpush3.msra.mxu0 %v7282_v56 }
 0xf4c   :  { %3413 = vmatprep.subr.mxu1 %v7283_v57  ;;  %4691 = vmatprep.subr.mxu0 %v7199_v40 }
 0xf4d   :  { %3414 = vmatpush1.msra.mxu1 %v7284_v35  ;;  %3447 = vmatprep.mubr.f32.mxu1 %v7199_v40 }
 0xf4e   :  { %4692 = vmatpush3.msra.mxu0 %v7285_v0  ;;  %4693 = vmatprep.mubr.msk.f32.mxu0 %vm5208_vm0, %v7199_v40 }
 0xf4f   :  { %4696 = vmatprep.subr.mxu1 %v7199_v40 }
 0xfee   :  { %v3272_v41 = vpop.f32.mrf.mxu1  ;;  %v3343_v51 = vpop.f32.mrf.mxu0 }
 0xfef   :  { %v3348_v47 = vrot.slane %v3272_v41, 2  ;;  %v3367_v58 = vadd.f32 %v7065_v63, %v3343_v51 }
 0xff0   :  { %v3274_v54 = vpop.f32.mrf.mxu1  ;;  %v4660_v52 = vpop.f32.mrf.mxu0 }
 0xff1   :  { %v3350_v43 = vadd.f32 %v3348_v47, %v7256_v53  ;;  %v3358_v36 = vrot.slane %v3274_v54, 2  ;;  %v3369_v13 = vrot.slane %v3367_v58, 2 }
 0xff3   :  { %v3722_v42 = vmul.f32 -1.442695, %v3350_v43  ;;  %v3360_v24 = vadd.f32 %v3358_v36, %v7257_v34 }
 0xff5   :  { %4886 = vpow2.f32 %v3722_v42  ;;  %v3723_v26 = vmul.f32 -1.442695, %v3360_v24 }
 0xff7   :  { %4888 = vpow2.f32 %v3723_v26 }
0x1002   :  { %v4887_v62 = vpop.eup %4886 }
0x1003   :  { %v3354_v30 = vadd.f32 1.0, %v4887_v62 }
0x1004   :  { %v4889_v22 = vpop.eup %4888 }
0x1005   :  { %4890 = vrcp.f32 %v3354_v30  ;;  %v3364_v60 = vadd.f32 1.0, %v4889_v22 }
0x1007   :  { %4892 = vrcp.f32 %v3364_v60 }
0x1012   :  { %v4891_v21 = vpop.eup %4890 }
0x1013   :  { %v3371_v32 = vmul.f32 %v4891_v21, %v3369_v13 }
0x1014   :  { %v4893_v28 = vpop.eup %4892 }
0x1015   :  { %v3372_v18 = vadd.f32 %v3371_v32, %v6493_v20  ;;  %v3374_v29 = vsub.f32 1.0, %v4893_v28  ;;  %v3378_v37 = vmul.f32 %v4893_v28, %v3376_v2 }
0x1017   :  { %4894 = vtanh.f32 %v3372_v18 }
0x1024   :  { %v4895_v39 = vpop.eup %4894 }
0x1025   :  { %v3375_v33 = vmul.f32 %v4895_v39, %v3374_v29 }
0x1027   :  { %v7070_v3 = vadd.f32 %v3378_v37, %v3375_v33 }
0x1029   :  { %v3381_v4 = vrot.slane %v7070_v3, 6  ;;  %v7076_v5 = vsel %vm1897_vm7, %v6992_v1, %v7070_v3 }
0x102b   :  { %3448 = vmatmul.mubr.f32.vlgmr.msra.gmra.mxu1 %v3381_v4  ;;  %4694 = vmatmul.mubr.f32.vlgmr.msra.gmra.mxu0 %v3381_v4 }
0x102c   :  { %4728 = vmatprep.mubr.msk.f32.mxu1 %vm5208_vm0, %v7199_v40  ;;  %4697 = vmatpush3.msra.mxu1 %v3581_v6 }
0x102d   :  { %4698 = vmatprep.subr.mxu1 %v7199_v40 }
0x102e   :  { %4699 = vmatpush3.msra.mxu1 %v3580_v7 }
0x102f   :  { %4700 = vmatprep.subr.mxu1 %v7199_v40 }
0x1030   :  { %4701 = vmatpush3.msra.mxu1 %v3579_v8 }
0x1031   :  { %4702 = vmatprep.subr.mxu1 %v7199_v40 }
0x1032   :  { %4703 = vmatpush3.msra.mxu1 %v3578_v9 }
0x1033   :  { %4704 = vmatprep.subr.mxu1 %v7199_v40 }
0x1034   :  { %4705 = vmatpush3.msra.mxu1 %v3577_v10 }
0x1035   :  { %4706 = vmatprep.subr.mxu1 %v7199_v40 }
0x1036   :  { %4707 = vmatpush3.msra.mxu1 %v3576_v11 }
0x1037   :  { %4708 = vmatprep.subr.mxu1 %v7199_v40 }
0x1038   :  { %4709 = vmatpush3.msra.mxu1 %v3575_v12 }
0x1039   :  { %4710 = vmatprep.subr.mxu1 %v7199_v40 }
0x103a   :  { %4711 = vmatpush3.msra.mxu1 %v3574_v14 }
0x103b   :  { %4712 = vmatprep.subr.mxu1 %v7199_v40 }
0x103c   :  { %4713 = vmatpush3.msra.mxu1 %v3573_v15 }
0x103d   :  { %4714 = vmatprep.subr.mxu1 %v7199_v40 }
0x103e   :  { %4715 = vmatpush3.msra.mxu1 %v3572_v16 }
0x103f   :  { %4716 = vmatprep.subr.mxu1 %v7199_v40 }
0x1040   :  { %4717 = vmatpush3.msra.mxu1 %v3571_v44 }
0x1041   :  { %4718 = vmatprep.subr.mxu1 %v7199_v40 }
0x1042   :  { %4719 = vmatpush3.msra.mxu1 %v3570_v27 }
0x1043   :  { %4720 = vmatprep.subr.mxu1 %v7199_v40 }
0x1044   :  { %4721 = vmatpush3.msra.mxu1 %v3569_v38 }
0x1045   :  { %4722 = vmatprep.subr.mxu1 %v7199_v40 }
0x1046   :  { %4723 = vmatpush3.msra.mxu1 %v3568_v59 }
0x1047   :  { %4724 = vmatprep.subr.mxu1 %v7199_v40 }
0x1048   :  { %4725 = vmatpush3.msra.mxu1 %v3567_v45 }
0x1049   :  { %4726 = vmatprep.subr.mxu1 %v7199_v40 }
0x104a   :  { %4727 = vmatpush3.msra.mxu1 %v3566_v23 }
0x10eb   :  { %v3449_v55 = vpop.f32.mrf.mxu1  ;;  %v3520_v49 = vpop.f32.mrf.mxu0 }
0x10ec   :  { %v3525_v48 = vrot.slane %v3449_v55, 1  ;;  %v3544_v40 = vadd.f32 %v7065_v63, %v3520_v49 }
0x10ed   :  { %v3451_v46 = vpop.f32.mrf.mxu1  ;;  %v4695_v25 = vpop.f32.mrf.mxu0 }
0x10ee   :  { %v3527_v19 = vadd.f32 %v3525_v48, %v7256_v53  ;;  %v3535_v1 = vrot.slane %v3451_v46, 1  ;;  %v3546_v0 = vrot.slane %v3544_v40, 1 }
0x10f0   :  { %v3724_v17 = vmul.f32 -1.442695, %v3527_v19  ;;  %v3537_v31 = vadd.f32 %v3535_v1, %v7257_v34  ;;  %v3553_v34 = vrot.slane %v7070_v3, 7 }
0x10f2   :  { %4896 = vpow2.f32 %v3724_v17  ;;  %v3725_v61 = vmul.f32 -1.442695, %v3537_v31 }
0x10f4   :  { %4898 = vpow2.f32 %v3725_v61 }
0x10ff   :  { %v4897_v50 = vpop.eup %4896 }
0x1100   :  { %v3531_v56 = vadd.f32 1.0, %v4897_v50 }
0x1101   :  { %v4899_v57 = vpop.eup %4898 }
0x1102   :  { %4900 = vrcp.f32 %v3531_v56  ;;  %v3541_v35 = vadd.f32 1.0, %v4899_v57 }
0x1104   :  { %4902 = vrcp.f32 %v3541_v35 }
0x110f   :  { %v4901_v41 = vpop.eup %4900 }
0x1110   :  { %v3548_v51 = vmul.f32 %v4901_v41, %v3546_v0 }
0x1111   :  { %v4903_v47 = vpop.eup %4902 }
0x1112   :  { %v3549_v53 = vadd.f32 %v3548_v51, %v6493_v20  ;;  %v3551_v54 = vsub.f32 1.0, %v4903_v47  ;;  %v3555_v42 = vmul.f32 %v4903_v47, %v3553_v34 }
0x1114   :  { %4904 = vtanh.f32 %v3549_v53 }
0x1121   :  { %v4905_v52 = vpop.eup %4904 }
0x1122   :  { %v3552_v43 = vmul.f32 %v4905_v52, %v3551_v54 }
0x1124   :  { %v3556_v36 = vadd.f32 %v3555_v42, %v3552_v43 }
0x1126   :  { %v3564_v24 = vsel %vm1899_vm8, %v7076_v5, %v3556_v36  ;;  %3557 = vst [vmem:[#allocation15 - $0x6] sm:$0x80] %v3556_v36 }
0x1127   :  { %v3565_v26 = vmax.f32 %v3564_v24, 0.0 }
0x1129   :  { %4729 = vmatmul.mubr.f32.vlgmr.msra.gmra.mxu1 %v3565_v26 }
0x112a   :  { %5155 = shalt.err (!%p5152_p11)
}
0x112b   :  { %3679 = dma.vmem_to_hbm [thread:$0]  %s3677_s1, 32, %s7126_s15, [#allocation16]   ;;  %v3726_v20 = vld [vmem:[%s7123_s12] ss:$0 sm:$0xff] }
0x112c   :  { %s5210_s3 = smov [#allocation14]  }
0x112d   :  { %s3666_s25 = sshll.u32 %s5210_s3, 4  ;;  %s3667_s25 = int_to_ptr.vmem [resolvable:$true] %s3666_s25 }
0x112e   :  { %s5164_s4 = scalar_lea.vmem %s3667_s25, 128  ;;  %p5169_p13 = scmp.lt.s32.totalorder %s3667_s25, %s3667_s25 }
0x112f   :  { %p5165_p12 = scmp.ne.s32.totalorder %s3667_s25, %s5164_s4  ;;  %p5170_p0 = scmp.lt.s32.totalorder %s5164_s4, %s5164_s4 }
0x1131   :  { %p5171_p1 = por %p5170_p0, %p5169_p13 }
0x1133   :  { %p5172_p2 = pnand %p5171_p1, %p5165_p12 }
0x11e9   :  { %v3655_v62 = vpop.f32.mrf.mxu1 }
0x11ea   :  { %v3656_v30 = vadd.f32 %v3726_v20, %v3655_v62 }
0x11eb   :  { %v4730_v22 = vpop.f32.mrf.mxu1 }
0x11ec   :  { %3659 = vst [vmem:[#allocation14] sm:$0xff] %v3656_v30 }
0x11ed   :  { %5175 = shalt.err (!%p5172_p2)
}
0x11ee   :  { %3669 = dma.vmem_to_hbm [thread:$0]  %s3667_s25, 128, %s7125_s14, [#allocation4]  }
0x11ef   :  { %5192 = dma.done.wait [#allocation4], 128  }
0x11f0   :  { %5193 = vsyncadd [#allocation4], 4294967168 }
0x11f1   :  { %5194 = dma.done.wait [#allocation16], 32  }
0x11f2   :  { %5195 = vsyncadd [#allocation16], 4294967264 }
0x11f3   :  { %3686 = vsyncpa [#allocation3], 1 }
0x11f4   :  { %3687 = vsyncpa [#allocation6], 1 }
0x11f5   :  { %3688 = vsyncpa [#allocation9], 1 }
0x11f6   :  { %3689 = vsyncpa [#allocation12], 1 }
0x11f7   :  { %3690 = vsyncpa [#allocation4], 1 }
0x11f8   :  { %3691 = vsyncpa [#allocation16], 1 }

</bundles_post_ra>
